<compile_context>
chip_gen: v6e
topology: v6e:2x2x1
jax: 0.10.0
libtpu: 0.0.40
codegen_flags: <defaults>
</compile_context>

<pallas_src>
import functools

import jax
import jax.numpy as jnp
from jax.experimental import pallas as pl
from jax.experimental.pallas import tpu as pltpu

D_IN = 22 * 20 * 20   # 8800
H1 = 1024
H2 = 128

TK = 1280             # K tile for streaming W1 (divisible by 128)
KP = ((D_IN + TK - 1) // TK) * TK   # 8960 -> 7 K steps


def _round_up(x, m):
    return ((x + m - 1) // m) * m


def _fused_mlp_kernel(x_ref, w1_ref, b1_ref, w2_ref, b2_ref, w3_ref, b3_ref,
                      o_ref, acc_ref):
    """Fused 3-layer MLP.

    Grid = (M_tiles, K_tiles).  Layer-1 partial products accumulate into the
    VMEM scratch across the K axis; layers 2 and 3 (tiny, fully resident) are
    computed in the final-K epilogue and written straight to the output block.
    """
    k = pl.program_id(1)

    @pl.when(k == 0)
    def _():
        acc_ref[...] = jnp.zeros_like(acc_ref)

    acc_ref[...] += jnp.dot(
        x_ref[...], w1_ref[...], preferred_element_type=jnp.float32
    )

    @pl.when(k == pl.num_programs(1) - 1)
    def _():
        h1 = jnp.maximum(acc_ref[...] + b1_ref[...], 0.0)          # (tm, 1024)
        h2 = jnp.dot(h1, w2_ref[...],
                     preferred_element_type=jnp.float32) + b2_ref[...]
        h2 = jnp.maximum(h2, 0.0)                                   # (tm, 128)
        out = jnp.dot(h2, w3_ref[...],
                      preferred_element_type=jnp.float32) + b3_ref[...]
        o_ref[...] = out.astype(o_ref.dtype)


def init_params(num_classes, key):
    """Deterministic synthetic parameters with the module's shapes."""
    k1, k2, k3, k4, k5, k6 = jax.random.split(key, 6)

    def lin(kw, kb, fan_in, fan_out):
        bound = 1.0 / jnp.sqrt(fan_in)
        w = jax.random.uniform(kw, (fan_in, fan_out), jnp.float32, -bound, bound)
        b = jax.random.uniform(kb, (fan_out,), jnp.float32, -bound, bound)
        return w, b

    w1, b1 = lin(k1, k2, D_IN, H1)
    w2, b2 = lin(k3, k4, H1, H2)
    w3, b3 = lin(k5, k6, H2, num_classes)
    return (w1, b1, w2, b2, w3, b3)


def prepare_params(params, num_classes):
    """Pad weights/biases ONCE (hoisted out of the per-call path)."""
    w1, b1, w2, b2, w3, b3 = params
    n3p = _round_up(num_classes, 128)

    w1p = jnp.zeros((KP, H1), jnp.float32).at[:D_IN, :].set(w1)
    b1p = b1.reshape(1, H1).astype(jnp.float32)
    w2p = w2.astype(jnp.float32)                                  # (1024, 128)
    b2p = b2.reshape(1, H2).astype(jnp.float32)
    w3p = jnp.zeros((H2, n3p), jnp.float32).at[:, :num_classes].set(w3)
    b3p = jnp.zeros((1, n3p), jnp.float32).at[0, :num_classes].set(b3)
    return (w1p, b1p, w2p, b2p, w3p, b3p)


def widar_mlp_forward(x, padded_params, num_classes):
    """x: (B, 22, 20, 20) f32 (NCHW, same as the PyTorch module)."""
    w1p, b1p, w2p, b2p, w3p, b3p = padded_params
    n3p = w3p.shape[1]

    B = x.shape[0]
    x = x.reshape(B, -1).astype(jnp.float32)       # == torch .view(-1, 8800)

    tm = min(128, _round_up(B, 8))
    Mp = _round_up(B, tm)
    xp = jnp.zeros((Mp, KP), jnp.float32).at[:B, :D_IN].set(x)

    grid = (Mp // tm, KP // TK)

    out = pl.pallas_call(
        _fused_mlp_kernel,
        out_shape=jax.ShapeDtypeStruct((Mp, n3p), jnp.float32),
        grid_spec=pltpu.PrefetchScalarGridSpec(
            num_scalar_prefetch=0,
            grid=grid,
            in_specs=[
                pl.BlockSpec((tm, TK), lambda m, k: (m, k)),    # x (streamed)
                pl.BlockSpec((TK, H1), lambda m, k: (k, 0)),    # W1 (streamed)
                pl.BlockSpec((1, H1), lambda m, k: (0, 0)),     # b1 (resident)
                pl.BlockSpec((H1, H2), lambda m, k: (0, 0)),    # W2 (resident)
                pl.BlockSpec((1, H2), lambda m, k: (0, 0)),     # b2 (resident)
                pl.BlockSpec((H2, n3p), lambda m, k: (0, 0)),   # W3 (resident)
                pl.BlockSpec((1, n3p), lambda m, k: (0, 0)),    # b3 (resident)
            ],
            out_specs=pl.BlockSpec((tm, n3p), lambda m, k: (m, 0)),
            scratch_shapes=[pltpu.VMEM((tm, H1), jnp.float32)],
        ),
        compiler_params=pltpu.CompilerParams(
            dimension_semantics=("parallel", "arbitrary"),
            vmem_limit_bytes=32 * 1024 * 1024,
        ),
    )(xp, w1p, b1p, w2p, b2p, w3p, b3p)

    return out[:B, :num_classes]


if __name__ == "__main__":
    num_classes = 6
    batch = 2

    key = jax.random.PRNGKey(0)
    kx, kp = jax.random.split(key)

    # Input shape is dictated by the module (.view(-1, 22*20*20)); only the
    # batch dimension is free, so keep it small.
    x = jax.random.normal(kx, (batch, 22, 20, 20), jnp.float32)
    params = init_params(num_classes, kp)
    padded_params = prepare_params(params, num_classes)

    fwd = jax.jit(functools.partial(widar_mlp_forward, num_classes=num_classes))
    out = fwd(x, padded_params)
    out = jax.block_until_ready(out)

    # Pure-JAX reference check.
    w1, b1, w2, b2, w3, b3 = params
    xf = x.reshape(batch, -1)
    ref = jnp.maximum(xf @ w1 + b1, 0.0)
    ref = jnp.maximum(ref @ w2 + b2, 0.0)
    ref = ref @ w3 + b3
    assert out.shape == (batch, num_classes)
    assert jnp.allclose(out, ref, atol=1e-3, rtol=1e-3)

    print("KERNEL_OK")
</pallas_src>

<mosaic_0001>
module attributes {stable_mosaic.version = 11 : i64} {
  func.func @_fused_mlp_kernel(%arg0: i32, %arg1: i32, %arg2: memref<8x1280xf32, #tpu.memory_space<vmem>>, %arg3: memref<1280x1024xf32, #tpu.memory_space<vmem>>, %arg4: memref<1x1024xf32, #tpu.memory_space<vmem>>, %arg5: memref<1024x128xf32, #tpu.memory_space<vmem>>, %arg6: memref<1x128xf32, #tpu.memory_space<vmem>>, %arg7: memref<128x128xf32, #tpu.memory_space<vmem>>, %arg8: memref<1x128xf32, #tpu.memory_space<vmem>>, %arg9: memref<8x128xf32, #tpu.memory_space<vmem>>, %arg10: memref<8x1024xf32, #tpu.memory_space<vmem>>) attributes {dimension_semantics = [#tpu.dimension_semantics<parallel>, #tpu.dimension_semantics<arbitrary>], iteration_bounds = array<i64: 1, 7>, scalar_prefetch = 0 : i64, scratch_operands = 1 : i64, tpu.core_type = #tpu.core_type<tc>, window_params = [{transform_indices = @transform_0, window_bounds = array<i64: 8, 1280>}, {transform_indices = @transform_1, window_bounds = array<i64: 1280, 1024>}, {pipeline_mode = #tpu.pipeline_mode<synchronous>, transform_indices = @transform_2, window_bounds = array<i64: 1, 1024>}, {pipeline_mode = #tpu.pipeline_mode<synchronous>, transform_indices = @transform_3, window_bounds = array<i64: 1024, 128>}, {pipeline_mode = #tpu.pipeline_mode<synchronous>, transform_indices = @transform_4, window_bounds = array<i64: 1, 128>}, {pipeline_mode = #tpu.pipeline_mode<synchronous>, transform_indices = @transform_5, window_bounds = array<i64: 128, 128>}, {pipeline_mode = #tpu.pipeline_mode<synchronous>, transform_indices = @transform_6, window_bounds = array<i64: 1, 128>}, {transform_indices = @transform_7, window_bounds = array<i64: 8, 128>}]} {
    %c0_i32 = arith.constant 0 : i32
    %0 = arith.cmpi eq, %arg1, %c0_i32 : i32
    %1 = arith.extui %0 : i1 to i32
    %c0_i32_0 = arith.constant 0 : i32
    %2 = arith.cmpi ne, %1, %c0_i32_0 : i32
    scf.if %2 {
      %cst_9 = arith.constant 0.000000e+00 : f32
      %12 = vector.broadcast %cst_9 : f32 to vector<8x1024xf32>
      %c0_10 = arith.constant 0 : index
      %c0_11 = arith.constant 0 : index
      %13 = vector.load %arg10[%c0_10, %c0_11] : memref<8x1024xf32, #tpu.memory_space<vmem>>, vector<8x1024xf32>
      tpu.vector_store %arg10[%c0_10, %c0_11], %12 {strides = array<i32>} : memref<8x1024xf32, #tpu.memory_space<vmem>>, vector<8x1024xf32>,
    } else {
    }
    %c0 = arith.constant 0 : index
    %c0_1 = arith.constant 0 : index
    %3 = vector.load %arg10[%c0, %c0_1] : memref<8x1024xf32, #tpu.memory_space<vmem>>, vector<8x1024xf32>
    %c0_2 = arith.constant 0 : index
    %c0_3 = arith.constant 0 : index
    %4 = vector.load %arg2[%c0_2, %c0_3] : memref<8x1280xf32, #tpu.memory_space<vmem>>, vector<8x1280xf32>
    %c0_4 = arith.constant 0 : index
    %c0_5 = arith.constant 0 : index
    %5 = vector.load %arg3[%c0_4, %c0_5] : memref<1280x1024xf32, #tpu.memory_space<vmem>>, vector<1280x1024xf32>
    %cst = arith.constant dense<0.000000e+00> : vector<8x1024xf32>
    %6 = tpu.matmul %4, %5, %cst {dimension_numbers = #tpu.dot_dimension_numbers<[1], [0], [0], [1], [0, 0, 1, 1], [], []>} : vector<8x1280xf32>, vector<1280x1024xf32>, vector<8x1024xf32> -> vector<8x1024xf32>
    %7 = arith.addf %3, %6 : vector<8x1024xf32>
    %c0_6 = arith.constant 0 : index
    %c0_7 = arith.constant 0 : index
    %8 = vector.load %arg10[%c0_6, %c0_7] : memref<8x1024xf32, #tpu.memory_space<vmem>>, vector<8x1024xf32>
    tpu.vector_store %arg10[%c0_6, %c0_7], %7 {strides = array<i32>} : memref<8x1024xf32, #tpu.memory_space<vmem>>, vector<8x1024xf32>,
    %c6_i32 = arith.constant 6 : i32
    %9 = arith.cmpi eq, %arg1, %c6_i32 : i32
    %10 = arith.extui %9 : i1 to i32
    %c0_i32_8 = arith.constant 0 : i32
    %11 = arith.cmpi ne, %10, %c0_i32_8 : i32
    scf.if %11 {
      %c0_9 = arith.constant 0 : index
      %c0_10 = arith.constant 0 : index
      %12 = vector.load %arg10[%c0_9, %c0_10] : memref<8x1024xf32, #tpu.memory_space<vmem>>, vector<8x1024xf32>
      %c0_11 = arith.constant 0 : index
      %c0_12 = arith.constant 0 : index
      %13 = vector.load %arg4[%c0_11, %c0_12] : memref<1x1024xf32, #tpu.memory_space<vmem>>, vector<1x1024xf32>
      %14 = vector.broadcast %13 : vector<1x1024xf32> to vector<8x1024xf32>
      %15 = arith.addf %12, %14 : vector<8x1024xf32>
      %cst_13 = arith.constant 0.000000e+00 : f32
      %16 = vector.broadcast %cst_13 : f32 to vector<8x1024xf32>
      %17 = arith.maximumf %15, %16 : vector<8x1024xf32>
      %c0_14 = arith.constant 0 : index
      %c0_15 = arith.constant 0 : index
      %18 = vector.load %arg5[%c0_14, %c0_15] : memref<1024x128xf32, #tpu.memory_space<vmem>>, vector<1024x128xf32>
      %cst_16 = arith.constant dense<0.000000e+00> : vector<8x128xf32>
      %19 = tpu.matmul %17, %18, %cst_16 {dimension_numbers = #tpu.dot_dimension_numbers<[1], [0], [0], [1], [0, 0, 1, 1], [], []>} : vector<8x1024xf32>, vector<1024x128xf32>, vector<8x128xf32> -> vector<8x128xf32>
      %c0_17 = arith.constant 0 : index
      %c0_18 = arith.constant 0 : index
      %20 = vector.load %arg6[%c0_17, %c0_18] : memref<1x128xf32, #tpu.memory_space<vmem>>, vector<1x128xf32>
      %21 = vector.broadcast %20 : vector<1x128xf32> to vector<8x128xf32>
      %22 = arith.addf %19, %21 : vector<8x128xf32>
      %cst_19 = arith.constant 0.000000e+00 : f32
      %23 = vector.broadcast %cst_19 : f32 to vector<8x128xf32>
      %24 = arith.maximumf %22, %23 : vector<8x128xf32>
      %c0_20 = arith.constant 0 : index
      %c0_21 = arith.constant 0 : index
      %25 = vector.load %arg7[%c0_20, %c0_21] : memref<128x128xf32, #tpu.memory_space<vmem>>, vector<128x128xf32>
      %cst_22 = arith.constant dense<0.000000e+00> : vector<8x128xf32>
      %26 = tpu.matmul %24, %25, %cst_22 {dimension_numbers = #tpu.dot_dimension_numbers<[1], [0], [0], [1], [0, 0, 1, 1], [], []>} : vector<8x128xf32>, vector<128x128xf32>, vector<8x128xf32> -> vector<8x128xf32>
      %c0_23 = arith.constant 0 : index
      %c0_24 = arith.constant 0 : index
      %27 = vector.load %arg8[%c0_23, %c0_24] : memref<1x128xf32, #tpu.memory_space<vmem>>, vector<1x128xf32>
      %28 = vector.broadcast %27 : vector<1x128xf32> to vector<8x128xf32>
      %29 = arith.addf %26, %28 : vector<8x128xf32>
      %c0_25 = arith.constant 0 : index
      %c0_26 = arith.constant 0 : index
      %30 = vector.load %arg9[%c0_25, %c0_26] : memref<8x128xf32, #tpu.memory_space<vmem>>, vector<8x128xf32>
      tpu.vector_store %arg9[%c0_25, %c0_26], %29 {strides = array<i32>} : memref<8x128xf32, #tpu.memory_space<vmem>>, vector<8x128xf32>,
    } else {
    }
    return
  }
  func.func @transform_0(%arg0: i32, %arg1: i32) -> (i32, i32) {
    %c0_i32 = arith.constant 0 : i32
    return %arg0, %arg1 : i32, i32
  }
  func.func @transform_1(%arg0: i32, %arg1: i32) -> (i32, i32) {
    %c0_i32 = arith.constant 0 : i32
    %c0_i32_0 = arith.constant 0 : i32
    return %arg1, %c0_i32 : i32, i32
  }
  func.func @transform_2(%arg0: i32, %arg1: i32) -> (i32, i32) {
    %c0_i32 = arith.constant 0 : i32
    %c0_i32_0 = arith.constant 0 : i32
    %c0_i32_1 = arith.constant 0 : i32
    return %c0_i32, %c0_i32_0 : i32, i32
  }
  func.func @transform_3(%arg0: i32, %arg1: i32) -> (i32, i32) {
    %c0_i32 = arith.constant 0 : i32
    %c0_i32_0 = arith.constant 0 : i32
    %c0_i32_1 = arith.constant 0 : i32
    return %c0_i32, %c0_i32_0 : i32, i32
  }
  func.func @transform_4(%arg0: i32, %arg1: i32) -> (i32, i32) {
    %c0_i32 = arith.constant 0 : i32
    %c0_i32_0 = arith.constant 0 : i32
    %c0_i32_1 = arith.constant 0 : i32
    return %c0_i32, %c0_i32_0 : i32, i32
  }
  func.func @transform_5(%arg0: i32, %arg1: i32) -> (i32, i32) {
    %c0_i32 = arith.constant 0 : i32
    %c0_i32_0 = arith.constant 0 : i32
    %c0_i32_1 = arith.constant 0 : i32
    return %c0_i32, %c0_i32_0 : i32, i32
  }
  func.func @transform_6(%arg0: i32, %arg1: i32) -> (i32, i32) {
    %c0_i32 = arith.constant 0 : i32
    %c0_i32_0 = arith.constant 0 : i32
    %c0_i32_1 = arith.constant 0 : i32
    return %c0_i32, %c0_i32_0 : i32, i32
  }
  func.func @transform_7(%arg0: i32, %arg1: i32) -> (i32, i32) {
    %c0_i32 = arith.constant 0 : i32
    %c0_i32_0 = arith.constant 0 : i32
    return %arg0, %c0_i32 : i32, i32
  }
}

</mosaic_0001>

<bundles_post_ra>
// kernel: widar_mlp_forward.1
= control target key start
LH: loop header
LB: loop body
LE: loop exit
PB: predicated region body
PF: predicated region fallthrough
CT: control target
= control target key end

     0   :  { %12 = vsyncpa [#allocation4], 0  ;;  %s6036_s0 = inlined_call_operand.vmem [shape: f32[8,8960], index: 0, kind: input, shape index: {}]   ;;  %s6037_s1 = inlined_call_operand.hbm [shape: f32[8960,1024], index: 1, kind: input, shape index: {}]   ;;  %s6038_s2 = inlined_call_operand.hbm [shape: f32[1,1024], index: 2, kind: input, shape index: {}]   ;;  %s6039_s3 = inlined_call_operand.hbm [shape: f32[1024,128], index: 3, kind: input, shape index: {}]   ;;  %s6040_s4 = inlined_call_operand.hbm [shape: f32[1,128], index: 4, kind: input, shape index: {}]   ;;  %s6041_s5 = inlined_call_operand.hbm [shape: f32[128,128], index: 5, kind: input, shape index: {}]   ;;  %s6042_s6 = inlined_call_operand.hbm [shape: f32[1,128], index: 6, kind: input, shape index: {}]   ;;  %s6043_s7 = inlined_call_operand.vmem [shape: f32[8,128], index: 7, kind: output, shape index: {}]  }
   0x1   :  { %14 = vsyncpa [#allocation4 + $0x1], 0 }
   0x2   :  { %15 = vsyncpa [#allocation6], 0 }
   0x3   :  { %16 = vsyncpa [#allocation9], 0 }
   0x4   :  { %17 = vsyncpa [#allocation12], 0  ;;  %s4515_s24 = smov 0   ;;  %s4517_s25 = smov 0  }
   0x5   :  { %s4519_s26 = smov 0   ;;  %s4521_s27 = smov 0  }
   0x6   :  { %s4523_s28 = smov 0   ;;  %s4525_s29 = smov 0  }
   0x7 LB: > { %s3876_s30 = sadd.s32 4294967295, %s4460_s29   ;;  %p3877_p0 = scmp.ge.s32.totalorder %s4460_s29, 1  ;;  %s4460_s29 = sphi %s4525_s29, %s23_s29   ;;  %s4456_s28 = sphi %s4523_s28, %s6060_s28   ;;  %s4452_s27 = sphi %s4521_s27, %s6059_s27   ;;  %s4448_s26 = sphi %s4519_s26, %s6058_s26   ;;  %s4444_s25 = sphi %s4517_s25, %s6057_s25   ;;  %s4440_s24 = sphi %s4515_s24, %s6056_s24  }
   0x8   : > { %p4547_p1 = scmp.eq.s32.totalorder %s3876_s30, 0  ;;  %p225_p2 = scmp.lt.s32.totalorder %s4460_s29, 8 }
   0x9   : > { %s4462_s10 = smov [#allocation5]   ;;  %s4463_s12 = smov [#allocation8]  }
   0xa   : > { %s6047_s8 = scalar_select %p4547_p1, 1, 0 }
   0xb   : > { %p4552_p3 = pnand %p3877_p0, %p225_p2  ;;  %s238_s11 = sshll.u32 %s4462_s10, 4  ;;  %s239_s11 = int_to_ptr.vmem [resolvable:$true] %s238_s11 }
   0xc   : > { %s262_s13 = sshll.u32 %s4463_s12, 4  ;;  %s4464_s15 = smov [#allocation7]   ;;  %s263_s13 = int_to_ptr.vmem [resolvable:$true] %s262_s13 }
   0xd   : > { %s6048_s9 = scalar_select %p4552_p3, 1, 0 }
   0xe   : > { %p4119_p4 = pneg %p4552_p3  ;;  %s248_s16 = sshll.u32 %s4464_s15, 4  ;;  %s4564_s16 = int_to_ptr.vmem [resolvable:$true] %s248_s16 }
   0xf   : > { %s4251_s18 = scalar_lea.vmem %s239_s11, 128  ;;  %p4259_p10 = scmp.lt.s32.totalorder %s239_s11, %s239_s11 }
  0x10   : > { %p4560_p5 = pnand %p4119_p4, %p4547_p1  ;;  %p4252_p7 = scmp.ne.s32.totalorder %s239_s11, %s4251_s18 }
  0x11   : > { %p4260_p11 = scmp.lt.s32.totalorder %s4251_s18, %s4251_s18 }
  0x12   : > { %p4568_p6 = pneg %p4560_p5 }
  0x13   : > { %p4261_p12 = por %p4260_p11, %p4259_p10 }
  0x14   : > { %p4254_p8 = pnand %p4252_p7, %p4568_p6 }
  0x16   : > { %p4255_p9 = pneg %p4254_p8 }
  0x18   : > { %p4262_p13 = pnand %p4261_p12, %p4255_p9 }
  0x1a   : > { %4265 = shalt.err (!%p4262_p13)
}
  0x1b   : > { %4122 = dma.hbm_to_vmem [thread:$0]  (!%p4560_p5), %s6038_s2, 128, %s239_s11, [#allocation6]  }
  0x1c   : > { %s4277_s21 = scalar_lea.vmem %s263_s13, 16  ;;  %s4284_s22 = scalar_lea.vmem %s263_s13, 32 }
  0x1d   : > { %p4278_p0 = scmp.ne.s32.totalorder %s263_s13, %s4277_s21  ;;  %p4285_p7 = scmp.lt.s32.totalorder %s263_s13, %s263_s13 }
  0x1e   : > { %p4286_p8 = scmp.lt.s32.totalorder %s4284_s22, %s4277_s21 }
  0x1f   : > { %p4280_p2 = pnand %p4278_p0, %p4568_p6 }
  0x20   : > { %p4287_p3 = por %p4286_p8, %p4285_p7 }
  0x21   : > { %p4281_p4 = pneg %p4280_p2 }
  0x23   : > { %p4288_p1 = pnand %p4287_p3, %p4281_p4 }
  0x25   : > { %4291 = shalt.err (!%p4288_p1)
}
  0x26   : > { %4128 = dma.hbm_to_vmem [thread:$0]  (!%p4560_p5), %s6040_s4, 16, %s263_s13, [#allocation9]  }
  0x27   : > { %s4303_s10 = scalar_lea.vmem %s4564_s16, 16384  ;;  %p4311_p12 = scmp.lt.s32.totalorder %s4564_s16, %s4564_s16 }
  0x28   : > { %p4304_p9 = scmp.ne.s32.totalorder %s4564_s16, %s4303_s10  ;;  %p4312_p13 = scmp.lt.s32.totalorder %s4303_s10, %s4303_s10 }
  0x2a   : > { %p4306_p10 = pnand %p4304_p9, %p4568_p6  ;;  %p4313_p3 = por %p4312_p13, %p4311_p12 }
  0x2c   : > { %p4307_p11 = pneg %p4306_p10 }
  0x2e   : > { %p4314_p1 = pnand %p4313_p3, %p4307_p11 }
  0x30   : > { %4317 = shalt.err (!%p4314_p1)
}
  0x31   : > { %s4465_s11 = smov 128   ;;  %s4466_s12 = smov 8  }
  0x32   : > { %4125 = dma.hbm_to_vmem [thread:$0]  (!%p4560_p5), %s6039_s3, 16384, %s4564_s16, [#allocation6], %s4465_s11, %s4465_s11, %s4466_s12  }
  0x33   : > { %s4467_s13 = smov [#allocation10]   ;;  %s4468_s20 = smov [#allocation11]  }
  0x34   : > { %s272_s19 = sshll.u32 %s4467_s13, 4  ;;  %s286_s21 = sshll.u32 %s4468_s20, 4  ;;  %s273_s19 = int_to_ptr.vmem [resolvable:$true] %s272_s19  ;;  %s287_s21 = int_to_ptr.vmem [resolvable:$true] %s286_s21 }
  0x35   : > { %s4329_s22 = scalar_lea.vmem %s273_s19, 2048  ;;  %p4337_p7 = scmp.lt.s32.totalorder %s273_s19, %s273_s19 }
  0x36   : > { %p4330_p0 = scmp.ne.s32.totalorder %s273_s19, %s4329_s22  ;;  %p4338_p8 = scmp.lt.s32.totalorder %s4329_s22, %s4329_s22 }
  0x38   : > { %p4332_p2 = pnand %p4330_p0, %p4568_p6  ;;  %p4339_p9 = por %p4338_p8, %p4337_p7 }
  0x3a   : > { %p4333_p4 = pneg %p4332_p2 }
  0x3c   : > { %p4340_p10 = pnand %p4339_p9, %p4333_p4 }
  0x3e   : > { %4343 = shalt.err (!%p4340_p10)
}
  0x3f   : > { %4131 = dma.hbm_to_vmem [thread:$0]  (!%p4560_p5), %s6041_s5, 2048, %s273_s19, [#allocation9], %s4465_s11, %s4465_s11, %s4466_s12  }
  0x40   : > { %s4355_s16 = scalar_lea.vmem %s287_s21, 16  ;;  %s4362_s10 = scalar_lea.vmem %s287_s21, 32 }
  0x41   : > { %p4356_p11 = scmp.ne.s32.totalorder %s287_s21, %s4355_s16  ;;  %p4363_p3 = scmp.lt.s32.totalorder %s287_s21, %s287_s21 }
  0x42   : > { %p4364_p1 = scmp.lt.s32.totalorder %s4362_s10, %s4355_s16 }
  0x43   : > { %p4358_p12 = pnand %p4356_p11, %p4568_p6 }
  0x44   : > { %p4365_p0 = por %p4364_p1, %p4363_p3 }
  0x45   : > { %p4359_p13 = pneg %p4358_p12 }
  0x47   : > { %p4366_p2 = pnand %p4365_p0, %p4359_p13 }
  0x49   : > { %4369 = shalt.err (!%p4366_p2)
}
  0x4a   : > { %4134 = dma.hbm_to_vmem [thread:$0]  (!%p4560_p5), %s6042_s6, 16, %s287_s21, [#allocation12]  }
  0x4b   : > { %s32_s17 = sadd.s32 1, %s4456_s28  ;;  %s70_s14 = sadd.s32 1, %s4448_s26 }
  0x4c   : > { %p33_p6 = scmp.ge.s32.totalorder %s32_s17, 7  ;;  %p77_p4 = scmp.ne.s32.totalorder %s4448_s26, %s4444_s25 }
  0x4d   : > { %p78_p7 = scmp.eq.s32.totalorder %s4460_s29, 0  ;;  %p83_p9 = scmp.ne.s32.totalorder %s4444_s25, %s4440_s24 }
  0x4e   : > { %s6062_s17 = smov (%p33_p6, %s32_s17), 0  ;;  %p4144_p10 = scmp.lt.s32.totalorder %s4460_s29, 7 }
  0x4f   : > { %p79_p8 = por %p78_p7, %p77_p4  ;;  %s67_s11 = ssub.s32 %s4456_s28, %s6062_s17 }
  0x50   : > { %p68_p11 = scmp.eq.s32.totalorder %s67_s11, 0  ;;  %p6051_p12 = scmp.ne.s32.totalorder %s6047_s8, 0 }
  0x51   : > { %s310_s13 = sand.u32 1, %s4448_s26   ;;  %s3902_s19 = smul.u32 163840, %s4456_s28 }
  0x52   : > { %p4626_p13 = por %p6051_p12, %p83_p9  ;;  %s4095_s21 = smul.u32 10240, %s310_s13 }
  0x53   : > { %s4633_s20 = scalar_select %p68_p11, %s4448_s26, %s70_s14  }
  0x54   : > { %s321_s30 = scalar_lea.hbm %s6037_s1, %s3902_s19  ;;  %p4638_p5 = pnand %p4144_p10, %p79_p8 }
  0x55   : > { %s314_s24 = scalar_lea.vmem [#allocation3], %s4095_s21  ;;  %s311_s15 = scalar_lea.sflag [#allocation4], %s310_s13 }
  0x56   : > { %s322_s10 = sshll.u32 %s314_s24, 4  ;;  %p4372_p3 = pneg %p4638_p5  ;;  %s323_s10 = int_to_ptr.vmem [resolvable:$true] %s322_s10 }
  0x57   : > { %s4383_s18 = scalar_lea.vmem %s323_s10, 163840  ;;  %s4469_s14 = smov [#allocation3]  }
  0x58   : > { %p4384_p1 = scmp.ne.s32.totalorder %s323_s10, %s4383_s18  ;;  %s4388_s11 = sshll.u32 %s4469_s14, 4  ;;  %s4389_s11 = int_to_ptr.vmem [resolvable:$false] %s4388_s11 }
  0x59   : > { %s4390_s22 = scalar_lea.vmem %s4389_s11, 327680  ;;  %p4391_p6 = scmp.lt.s32.totalorder %s323_s10, %s4389_s11 }
  0x5a   : > { %p4386_p0 = pnand %p4384_p1, %p4372_p3  ;;  %p4392_p4 = scmp.lt.s32.totalorder %s4390_s22, %s4383_s18 }
  0x5c   : > { %p4387_p2 = pneg %p4386_p0  ;;  %p4393_p7 = por %p4392_p4, %p4391_p6 }
  0x5e   : > { %p4394_p8 = pnand %p4393_p7, %p4387_p2 }
  0x60   : > { %4397 = shalt.err (!%p4394_p8)
}
  0x61   : > { %s4470_s19 = smov 1024   ;;  %s4471_s21 = smov 64  }
  0x62   : > { %4138 = dma.hbm_to_vmem [thread:$0]  (!%p4638_p5), %s321_s30, 163840, %s323_s10, %s311_s15, %s4470_s19, %s4470_s19, %s4471_s21  }
  0x63   : > { %p6054_p9 = scmp.ne.s32.totalorder %s6048_s9, 0 }
  0x64   : > { %s336_s13 = sand.u32 (!%p6054_p9), 1, %s4444_s25  }
  0x65   : > { %334 = sbr.rel (%p6054_p9) target bundleno = 1456 (0x5b0), region = 48  ;;  %s337_s24 = scalar_lea.sflag (!%p6054_p9), [#allocation4], %s336_s13 }
  0x66   : > { %s4096_s23 = smul.u32 (!%p6054_p9), 10240, %s336_s13 }
  0x68   : > { %s4649_s14 = scalar_lea.vmem (!%p6054_p9), [#allocation3], %s4096_s23 }
  0x6a   : > { %4423 = dma.done.wait (%p4626_p13), %s337_s24, 163840  }
  0x6b   : > { %4425 = vsyncadd (%p4626_p13), %s337_s24, 4294803456  ;;  %p6055_p10 = scmp.ne.s32.totalorder %s6047_s8, 0 }
  0x6d   : > { %4427 = dma.done.wait (%p6055_p10), [#allocation6], 16512  }
  0x6e   : > { %4429 = vsyncadd (%p6055_p10), [#allocation6], 4294950784 }
  0x6f   : > { %4431 = dma.done.wait (%p6055_p10), [#allocation9], 2064  }
  0x70   : > { %4433 = vsyncadd (%p6055_p10), [#allocation9], 4294965232 }
  0x71   : > { %4435 = dma.done.wait (%p6055_p10), [#allocation12], 16  }
  0x72   : > { %4437 = vsyncadd (%p6055_p10), [#allocation12], 4294967280  ;;  %s399_s9 = smul.u32 10, %s4452_s27  ;;  %p3893_p12 = scmp.ne.s32.totalorder %s4452_s27, 0 }
  0x74   : > { %p402_p11 = scmp.lt.s32.totalorder %s399_s9, 69  ;;  %417 = sbr.rel (%p3893_p12) target bundleno = 126 (0x7e), region = 76 }
  0x76   : > { %s6064_s9 = smov (!%p402_p11, %s399_s9), 69 }
  0x77   : > { %s3892_s12 = sshll.u32 %s6064_s9, 3 }
  0x78   : > { %s4671_s10 = scalar_lea.vmem %s6036_s0, %s3892_s12 }
  0x79   : > { %v4472_v0 = vmov 0.0  }
  0x7a   : > { %418 = vst [vmem:[#allocation2 + $0x30] sm:$0xff] %v4472_v0  ;;  %419 = vst [vmem:[#allocation2] sm:$0xff] %v4472_v0 }
  0x7b   : > { %420 = vst [vmem:[#allocation2 + $0x18] sm:$0xff] %v4472_v0  ;;  %421 = vst [vmem:[#allocation2 + $0x10] sm:$0xff] %v4472_v0 }
  0x7c   : > { %422 = vst [vmem:[#allocation2 + $0x8] sm:$0xff] %v4472_v0  ;;  %423 = vst [vmem:[#allocation2 + $0x20] sm:$0xff] %v4472_v0 }
  0x7d   : > { %424 = vst [vmem:[#allocation2 + $0x28] sm:$0xff] %v4472_v0  ;;  %425 = vst [vmem:[#allocation2 + $0x38] sm:$0xff] %v4472_v0 }
  0x7e PF: > { %v565_v1 = vld [vmem:[%s4649_s14 + $0x3c8] sm:$0xff]  ;;  %v564_v3 = vld [vmem:[%s4649_s14 + $0x3c0] sm:$0xff]  ;;  %p3894_p13 = scmp.ne.s32.totalorder %s4452_s27, 6 }
  0x7f   : > { %v821_v2 = vld [vmem:[%s4649_s14 + $0xbc8] sm:$0xff]  ;;  %1724 = vmatprep.subr.mxu0 %v565_v1  ;;  %v820_v4 = vld [vmem:[%s4649_s14 + $0xbc0] sm:$0xff] }
  0x80   : > { %1795 = vmatprep.subr.mxu1 %v821_v2  ;;  %v557_v5 = vld [vmem:[%s4649_s14 + $0x388] sm:$0xff]  ;;  %1725 = vmatpush1.msra.mxu0 %v564_v3  ;;  %v556_v7 = vld [vmem:[%s4649_s14 + $0x380] sm:$0xff] }
  0x81   : > { %v813_v6 = vld [vmem:[%s4649_s14 + $0xb88] sm:$0xff]  ;;  %1796 = vmatpush1.msra.mxu1 %v820_v4  ;;  %v812_v8 = vld [vmem:[%s4649_s14 + $0xb80] sm:$0xff]  ;;  %1726 = vmatprep.subr.mxu0 %v557_v5 }
  0x82   : > { %v549_v9 = vld [vmem:[%s4649_s14 + $0x348] sm:$0xff]  ;;  %1797 = vmatprep.subr.mxu1 %v813_v6  ;;  %v548_v11 = vld [vmem:[%s4649_s14 + $0x340] sm:$0xff]  ;;  %1727 = vmatpush1.msra.mxu0 %v556_v7 }
  0x83   : > { %v805_v10 = vld [vmem:[%s4649_s14 + $0xb48] sm:$0xff]  ;;  %v804_v12 = vld [vmem:[%s4649_s14 + $0xb40] sm:$0xff]  ;;  %1798 = vmatpush1.msra.mxu1 %v812_v8  ;;  %1728 = vmatprep.subr.mxu0 %v549_v9 }
  0x84   : > { %v541_v13 = vld [vmem:[%s4649_s14 + $0x308] sm:$0xff]  ;;  %1799 = vmatprep.subr.mxu1 %v805_v10  ;;  %v540_v15 = vld [vmem:[%s4649_s14 + $0x300] sm:$0xff]  ;;  %1729 = vmatpush1.msra.mxu0 %v548_v11 }
  0x85   : > { %v797_v14 = vld [vmem:[%s4649_s14 + $0xb08] sm:$0xff]  ;;  %v796_v16 = vld [vmem:[%s4649_s14 + $0xb00] sm:$0xff]  ;;  %1800 = vmatpush1.msra.mxu1 %v804_v12  ;;  %1730 = vmatprep.subr.mxu0 %v541_v13 }
  0x86   : > { %v533_v17 = vld [vmem:[%s4649_s14 + $0x2c8] sm:$0xff]  ;;  %1801 = vmatprep.subr.mxu1 %v797_v14  ;;  %v532_v19 = vld [vmem:[%s4649_s14 + $0x2c0] sm:$0xff]  ;;  %1731 = vmatpush1.msra.mxu0 %v540_v15 }
  0x87   : > { %v789_v18 = vld [vmem:[%s4649_s14 + $0xac8] sm:$0xff]  ;;  %v788_v20 = vld [vmem:[%s4649_s14 + $0xac0] sm:$0xff]  ;;  %1802 = vmatpush1.msra.mxu1 %v796_v16  ;;  %1732 = vmatprep.subr.mxu0 %v533_v17 }
  0x88   : > { %v525_v21 = vld [vmem:[%s4649_s14 + $0x288] sm:$0xff]  ;;  %1803 = vmatprep.subr.mxu1 %v789_v18  ;;  %v524_v23 = vld [vmem:[%s4649_s14 + $0x280] sm:$0xff]  ;;  %1733 = vmatpush1.msra.mxu0 %v532_v19 }
  0x89   : > { %v781_v22 = vld [vmem:[%s4649_s14 + $0xa88] sm:$0xff]  ;;  %v780_v24 = vld [vmem:[%s4649_s14 + $0xa80] sm:$0xff]  ;;  %1804 = vmatpush1.msra.mxu1 %v788_v20  ;;  %1734 = vmatprep.subr.mxu0 %v525_v21 }
  0x8a   : > { %v517_v25 = vld [vmem:[%s4649_s14 + $0x248] sm:$0xff]  ;;  %1805 = vmatprep.subr.mxu1 %v781_v22  ;;  %v516_v27 = vld [vmem:[%s4649_s14 + $0x240] sm:$0xff]  ;;  %1735 = vmatpush1.msra.mxu0 %v524_v23 }
  0x8b   : > { %v773_v26 = vld [vmem:[%s4649_s14 + $0xa48] sm:$0xff]  ;;  %v772_v28 = vld [vmem:[%s4649_s14 + $0xa40] sm:$0xff]  ;;  %1806 = vmatpush1.msra.mxu1 %v780_v24  ;;  %1736 = vmatprep.subr.mxu0 %v517_v25 }
  0x8c   : > { %v509_v29 = vld [vmem:[%s4649_s14 + $0x208] sm:$0xff]  ;;  %1807 = vmatprep.subr.mxu1 %v773_v26  ;;  %v508_v31 = vld [vmem:[%s4649_s14 + $0x200] sm:$0xff]  ;;  %1737 = vmatpush1.msra.mxu0 %v516_v27 }
  0x8d   : > { %v765_v30 = vld [vmem:[%s4649_s14 + $0xa08] sm:$0xff]  ;;  %v764_v32 = vld [vmem:[%s4649_s14 + $0xa00] sm:$0xff]  ;;  %1808 = vmatpush1.msra.mxu1 %v772_v28  ;;  %1738 = vmatprep.subr.mxu0 %v509_v29 }
  0x8e   : > { %v501_v33 = vld [vmem:[%s4649_s14 + $0x1c8] sm:$0xff]  ;;  %1809 = vmatprep.subr.mxu1 %v765_v30  ;;  %v500_v35 = vld [vmem:[%s4649_s14 + $0x1c0] sm:$0xff]  ;;  %1739 = vmatpush1.msra.mxu0 %v508_v31 }
  0x8f   : > { %v757_v34 = vld [vmem:[%s4649_s14 + $0x9c8] sm:$0xff]  ;;  %v756_v36 = vld [vmem:[%s4649_s14 + $0x9c0] sm:$0xff]  ;;  %1810 = vmatpush1.msra.mxu1 %v764_v32  ;;  %1740 = vmatprep.subr.mxu0 %v501_v33 }
  0x90   : > { %v493_v37 = vld [vmem:[%s4649_s14 + $0x188] sm:$0xff]  ;;  %1811 = vmatprep.subr.mxu1 %v757_v34  ;;  %v492_v39 = vld [vmem:[%s4649_s14 + $0x180] sm:$0xff]  ;;  %1741 = vmatpush1.msra.mxu0 %v500_v35 }
  0x91   : > { %v749_v38 = vld [vmem:[%s4649_s14 + $0x988] sm:$0xff]  ;;  %v748_v40 = vld [vmem:[%s4649_s14 + $0x980] sm:$0xff]  ;;  %1812 = vmatpush1.msra.mxu1 %v756_v36  ;;  %1742 = vmatprep.subr.mxu0 %v493_v37 }
  0x92   : > { %v485_v41 = vld [vmem:[%s4649_s14 + $0x148] sm:$0xff]  ;;  %1813 = vmatprep.subr.mxu1 %v749_v38  ;;  %v484_v43 = vld [vmem:[%s4649_s14 + $0x140] sm:$0xff]  ;;  %1743 = vmatpush1.msra.mxu0 %v492_v39 }
  0x93   : > { %v741_v42 = vld [vmem:[%s4649_s14 + $0x948] sm:$0xff]  ;;  %v740_v44 = vld [vmem:[%s4649_s14 + $0x940] sm:$0xff]  ;;  %1814 = vmatpush1.msra.mxu1 %v748_v40  ;;  %1744 = vmatprep.subr.mxu0 %v485_v41 }
  0x94   : > { %v477_v45 = vld [vmem:[%s4649_s14 + $0x108] sm:$0xff]  ;;  %1815 = vmatprep.subr.mxu1 %v741_v42  ;;  %v476_v47 = vld [vmem:[%s4649_s14 + $0x100] sm:$0xff]  ;;  %1745 = vmatpush1.msra.mxu0 %v484_v43 }
  0x95   : > { %v733_v46 = vld [vmem:[%s4649_s14 + $0x908] sm:$0xff]  ;;  %v732_v48 = vld [vmem:[%s4649_s14 + $0x900] sm:$0xff]  ;;  %1816 = vmatpush1.msra.mxu1 %v740_v44  ;;  %1746 = vmatprep.subr.mxu0 %v477_v45 }
  0x96   : > { %v469_v49 = vld [vmem:[%s4649_s14 + $0xc8] sm:$0xff]  ;;  %1817 = vmatprep.subr.mxu1 %v733_v46  ;;  %v468_v51 = vld [vmem:[%s4649_s14 + $0xc0] sm:$0xff]  ;;  %1747 = vmatpush1.msra.mxu0 %v476_v47 }
  0x97   : > { %v725_v50 = vld [vmem:[%s4649_s14 + $0x8c8] sm:$0xff]  ;;  %v724_v52 = vld [vmem:[%s4649_s14 + $0x8c0] sm:$0xff]  ;;  %1818 = vmatpush1.msra.mxu1 %v732_v48  ;;  %1748 = vmatprep.subr.mxu0 %v469_v49 }
  0x98   : > { %v461_v53 = vld [vmem:[%s4649_s14 + $0x88] sm:$0xff]  ;;  %1819 = vmatprep.subr.mxu1 %v725_v50  ;;  %v460_v55 = vld [vmem:[%s4649_s14 + $0x80] sm:$0xff]  ;;  %1749 = vmatpush1.msra.mxu0 %v468_v51 }
  0x99   : > { %v717_v54 = vld [vmem:[%s4649_s14 + $0x888] sm:$0xff]  ;;  %v716_v56 = vld [vmem:[%s4649_s14 + $0x880] sm:$0xff]  ;;  %1820 = vmatpush1.msra.mxu1 %v724_v52  ;;  %1750 = vmatprep.subr.mxu0 %v461_v53 }
  0x9a   : > { %v453_v57 = vld [vmem:[%s4649_s14 + $0x48] sm:$0xff]  ;;  %1821 = vmatprep.subr.mxu1 %v717_v54  ;;  %v452_v59 = vld [vmem:[%s4649_s14 + $0x40] sm:$0xff]  ;;  %1751 = vmatpush1.msra.mxu0 %v460_v55 }
  0x9b   : > { %v709_v58 = vld [vmem:[%s4649_s14 + $0x848] sm:$0xff]  ;;  %v708_v60 = vld [vmem:[%s4649_s14 + $0x840] sm:$0xff]  ;;  %1822 = vmatpush1.msra.mxu1 %v716_v56  ;;  %1752 = vmatprep.subr.mxu0 %v453_v57 }
  0x9c   : > { %v445_v61 = vld [vmem:[%s4649_s14 + $0x8] sm:$0xff]  ;;  %1823 = vmatprep.subr.mxu1 %v709_v58  ;;  %v444_v63 = vld [vmem:[%s4649_s14] sm:$0xff]  ;;  %1753 = vmatpush1.msra.mxu0 %v452_v59 }
  0x9d   : > { %v701_v62 = vld [vmem:[%s4649_s14 + $0x808] sm:$0xff]  ;;  %v700_v0 = vld [vmem:[%s4649_s14 + $0x800] sm:$0xff]  ;;  %1824 = vmatpush1.msra.mxu1 %v708_v60  ;;  %1754 = vmatprep.subr.mxu0 %v445_v61 }
  0x9e   : > { %v693_v1 = vld [vmem:[%s4649_s14 + $0x7c8] sm:$0xff]  ;;  %1825 = vmatprep.subr.mxu1 %v701_v62  ;;  %v692_v3 = vld [vmem:[%s4649_s14 + $0x7c0] sm:$0xff]  ;;  %1755 = vmatpush1.msra.mxu0 %v444_v63 }
  0x9f   : > { %v949_v2 = vld [vmem:[%s4649_s14 + $0xfc8] sm:$0xff]  ;;  %v948_v4 = vld [vmem:[%s4649_s14 + $0xfc0] sm:$0xff]  ;;  %1826 = vmatpush1.msra.mxu1 %v700_v0  ;;  %1756 = vmatprep.subr.mxu0 %v693_v1 }
  0xa0   : > { %v685_v5 = vld [vmem:[%s4649_s14 + $0x788] sm:$0xff]  ;;  %1827 = vmatprep.subr.mxu1 %v949_v2  ;;  %v684_v7 = vld [vmem:[%s4649_s14 + $0x780] sm:$0xff]  ;;  %1757 = vmatpush2.msra.mxu0 %v692_v3  ;;  %v437_v2 = vld [vmem:[%s4671_s10 + $0x18] sm:$0xff] }
  0xa1   : > { %v941_v6 = vld [vmem:[%s4649_s14 + $0xf88] sm:$0xff]  ;;  %v940_v8 = vld [vmem:[%s4649_s14 + $0xf80] sm:$0xff]  ;;  %1828 = vmatpush2.msra.mxu1 %v948_v4  ;;  %1758 = vmatprep.subr.mxu0 %v685_v5  ;;  %v436_v4 = vld [vmem:[%s4671_s10 + $0x10] sm:$0xff] }
  0xa2   : > { %v677_v9 = vld [vmem:[%s4649_s14 + $0x748] sm:$0xff]  ;;  %1829 = vmatprep.subr.mxu1 %v941_v6  ;;  %v676_v11 = vld [vmem:[%s4649_s14 + $0x740] sm:$0xff]  ;;  %1759 = vmatpush2.msra.mxu0 %v684_v7 }
  0xa3   : > { %v933_v10 = vld [vmem:[%s4649_s14 + $0xf48] sm:$0xff]  ;;  %v932_v12 = vld [vmem:[%s4649_s14 + $0xf40] sm:$0xff]  ;;  %1830 = vmatpush2.msra.mxu1 %v940_v8  ;;  %1760 = vmatprep.subr.mxu0 %v677_v9 }
  0xa4   : > { %v669_v13 = vld [vmem:[%s4649_s14 + $0x708] sm:$0xff]  ;;  %1831 = vmatprep.subr.mxu1 %v933_v10  ;;  %v668_v15 = vld [vmem:[%s4649_s14 + $0x700] sm:$0xff]  ;;  %1761 = vmatpush2.msra.mxu0 %v676_v11 }
  0xa5   : > { %v925_v14 = vld [vmem:[%s4649_s14 + $0xf08] sm:$0xff]  ;;  %v924_v16 = vld [vmem:[%s4649_s14 + $0xf00] sm:$0xff]  ;;  %1832 = vmatpush2.msra.mxu1 %v932_v12  ;;  %1762 = vmatprep.subr.mxu0 %v669_v13 }
  0xa6   : > { %v661_v17 = vld [vmem:[%s4649_s14 + $0x6c8] sm:$0xff]  ;;  %1833 = vmatprep.subr.mxu1 %v925_v14  ;;  %v660_v19 = vld [vmem:[%s4649_s14 + $0x6c0] sm:$0xff]  ;;  %1763 = vmatpush2.msra.mxu0 %v668_v15 }
  0xa7   : > { %v917_v18 = vld [vmem:[%s4649_s14 + $0xec8] sm:$0xff]  ;;  %v916_v20 = vld [vmem:[%s4649_s14 + $0xec0] sm:$0xff]  ;;  %1834 = vmatpush2.msra.mxu1 %v924_v16  ;;  %1764 = vmatprep.subr.mxu0 %v661_v17 }
  0xa8   : > { %v653_v21 = vld [vmem:[%s4649_s14 + $0x688] sm:$0xff]  ;;  %1835 = vmatprep.subr.mxu1 %v917_v18  ;;  %v652_v23 = vld [vmem:[%s4649_s14 + $0x680] sm:$0xff]  ;;  %1765 = vmatpush2.msra.mxu0 %v660_v19 }
  0xa9   : > { %v909_v22 = vld [vmem:[%s4649_s14 + $0xe88] sm:$0xff]  ;;  %v908_v24 = vld [vmem:[%s4649_s14 + $0xe80] sm:$0xff]  ;;  %1836 = vmatpush2.msra.mxu1 %v916_v20  ;;  %1766 = vmatprep.subr.mxu0 %v653_v21 }
  0xaa   : > { %v645_v25 = vld [vmem:[%s4649_s14 + $0x648] sm:$0xff]  ;;  %1837 = vmatprep.subr.mxu1 %v909_v22  ;;  %v644_v27 = vld [vmem:[%s4649_s14 + $0x640] sm:$0xff]  ;;  %1767 = vmatpush2.msra.mxu0 %v652_v23 }
  0xab   : > { %v901_v26 = vld [vmem:[%s4649_s14 + $0xe48] sm:$0xff]  ;;  %v900_v28 = vld [vmem:[%s4649_s14 + $0xe40] sm:$0xff]  ;;  %1838 = vmatpush2.msra.mxu1 %v908_v24  ;;  %1768 = vmatprep.subr.mxu0 %v645_v25 }
  0xac   : > { %v637_v29 = vld [vmem:[%s4649_s14 + $0x608] sm:$0xff]  ;;  %1839 = vmatprep.subr.mxu1 %v901_v26  ;;  %v636_v31 = vld [vmem:[%s4649_s14 + $0x600] sm:$0xff]  ;;  %1769 = vmatpush2.msra.mxu0 %v644_v27 }
  0xad   : > { %v893_v30 = vld [vmem:[%s4649_s14 + $0xe08] sm:$0xff]  ;;  %v892_v32 = vld [vmem:[%s4649_s14 + $0xe00] sm:$0xff]  ;;  %1840 = vmatpush2.msra.mxu1 %v900_v28  ;;  %1770 = vmatprep.subr.mxu0 %v637_v29 }
  0xae   : > { %v629_v33 = vld [vmem:[%s4649_s14 + $0x5c8] sm:$0xff]  ;;  %1841 = vmatprep.subr.mxu1 %v893_v30  ;;  %v628_v35 = vld [vmem:[%s4649_s14 + $0x5c0] sm:$0xff]  ;;  %1771 = vmatpush2.msra.mxu0 %v636_v31 }
  0xaf   : > { %v885_v34 = vld [vmem:[%s4649_s14 + $0xdc8] sm:$0xff]  ;;  %v884_v36 = vld [vmem:[%s4649_s14 + $0xdc0] sm:$0xff]  ;;  %1842 = vmatpush2.msra.mxu1 %v892_v32  ;;  %1772 = vmatprep.subr.mxu0 %v629_v33 }
  0xb0   : > { %v621_v37 = vld [vmem:[%s4649_s14 + $0x588] sm:$0xff]  ;;  %1843 = vmatprep.subr.mxu1 %v885_v34  ;;  %v620_v39 = vld [vmem:[%s4649_s14 + $0x580] sm:$0xff]  ;;  %1773 = vmatpush2.msra.mxu0 %v628_v35 }
  0xb1   : > { %v877_v38 = vld [vmem:[%s4649_s14 + $0xd88] sm:$0xff]  ;;  %v876_v40 = vld [vmem:[%s4649_s14 + $0xd80] sm:$0xff]  ;;  %1844 = vmatpush2.msra.mxu1 %v884_v36  ;;  %1774 = vmatprep.subr.mxu0 %v621_v37 }
  0xb2   : > { %v613_v41 = vld [vmem:[%s4649_s14 + $0x548] sm:$0xff]  ;;  %1845 = vmatprep.subr.mxu1 %v877_v38  ;;  %v612_v43 = vld [vmem:[%s4649_s14 + $0x540] sm:$0xff]  ;;  %1775 = vmatpush2.msra.mxu0 %v620_v39 }
  0xb3   : > { %v869_v42 = vld [vmem:[%s4649_s14 + $0xd48] sm:$0xff]  ;;  %v868_v44 = vld [vmem:[%s4649_s14 + $0xd40] sm:$0xff]  ;;  %1846 = vmatpush2.msra.mxu1 %v876_v40  ;;  %1776 = vmatprep.subr.mxu0 %v613_v41 }
  0xb4   : > { %v605_v45 = vld [vmem:[%s4649_s14 + $0x508] sm:$0xff]  ;;  %1847 = vmatprep.subr.mxu1 %v869_v42  ;;  %v604_v47 = vld [vmem:[%s4649_s14 + $0x500] sm:$0xff]  ;;  %1777 = vmatpush2.msra.mxu0 %v612_v43 }
  0xb5   : > { %v861_v46 = vld [vmem:[%s4649_s14 + $0xd08] sm:$0xff]  ;;  %v860_v48 = vld [vmem:[%s4649_s14 + $0xd00] sm:$0xff]  ;;  %1848 = vmatpush2.msra.mxu1 %v868_v44  ;;  %1778 = vmatprep.subr.mxu0 %v605_v45 }
  0xb6   : > { %v597_v49 = vld [vmem:[%s4649_s14 + $0x4c8] sm:$0xff]  ;;  %1849 = vmatprep.subr.mxu1 %v861_v46  ;;  %v596_v51 = vld [vmem:[%s4649_s14 + $0x4c0] sm:$0xff]  ;;  %1779 = vmatpush2.msra.mxu0 %v604_v47 }
  0xb7   : > { %v853_v50 = vld [vmem:[%s4649_s14 + $0xcc8] sm:$0xff]  ;;  %v852_v52 = vld [vmem:[%s4649_s14 + $0xcc0] sm:$0xff]  ;;  %1850 = vmatpush2.msra.mxu1 %v860_v48  ;;  %1780 = vmatprep.subr.mxu0 %v597_v49 }
  0xb8   : > { %v589_v53 = vld [vmem:[%s4649_s14 + $0x488] sm:$0xff]  ;;  %1851 = vmatprep.subr.mxu1 %v853_v50  ;;  %v588_v55 = vld [vmem:[%s4649_s14 + $0x480] sm:$0xff]  ;;  %1781 = vmatpush2.msra.mxu0 %v596_v51 }
  0xb9   : > { %v845_v54 = vld [vmem:[%s4649_s14 + $0xc88] sm:$0xff]  ;;  %v844_v56 = vld [vmem:[%s4649_s14 + $0xc80] sm:$0xff]  ;;  %1852 = vmatpush2.msra.mxu1 %v852_v52  ;;  %1782 = vmatprep.subr.mxu0 %v589_v53 }
  0xba   : > { %v581_v57 = vld [vmem:[%s4649_s14 + $0x448] sm:$0xff]  ;;  %1853 = vmatprep.subr.mxu1 %v845_v54  ;;  %v580_v59 = vld [vmem:[%s4649_s14 + $0x440] sm:$0xff]  ;;  %1783 = vmatpush2.msra.mxu0 %v588_v55 }
  0xbb   : > { %v837_v58 = vld [vmem:[%s4649_s14 + $0xc48] sm:$0xff]  ;;  %v836_v60 = vld [vmem:[%s4649_s14 + $0xc40] sm:$0xff]  ;;  %1854 = vmatpush2.msra.mxu1 %v844_v56  ;;  %1784 = vmatprep.subr.mxu0 %v581_v57 }
  0xbc   : > { %v573_v61 = vld [vmem:[%s4649_s14 + $0x408] sm:$0xff]  ;;  %1855 = vmatprep.subr.mxu1 %v837_v58  ;;  %v572_v63 = vld [vmem:[%s4649_s14 + $0x400] sm:$0xff]  ;;  %1785 = vmatpush2.msra.mxu0 %v580_v59 }
  0xbd   : > { %v829_v62 = vld [vmem:[%s4649_s14 + $0xc08] sm:$0xff]  ;;  %1856 = vmatpush2.msra.mxu1 %v836_v60  ;;  %v828_v1 = vld [vmem:[%s4649_s14 + $0xc00] sm:$0xff]  ;;  %1786 = vmatprep.subr.mxu0 %v573_v61 }
  0xbe   : > { %v435_v0 = vld [vmem:[%s4671_s10 + $0x8] sm:$0xff]  ;;  %1857 = vmatprep.subr.mxu1 %v829_v62  ;;  %v434_v3 = vld [vmem:[%s4671_s10] sm:$0xff]  ;;  %1787 = vmatpush2.msra.mxu0 %v572_v63 }
  0xbf   : > { %1788 = vmatprep.mubr.f32.mxu0 %v435_v0  ;;  %v1077_v5 = vld [vmem:[%s4649_s14 + $0x13c8] sm:$0xff]  ;;  %1858 = vmatpush2.msra.mxu1 %v828_v1  ;;  %v1076_v7 = vld [vmem:[%s4649_s14 + $0x13c0] sm:$0xff] }
  0xc0   : > { %v1333_v6 = vld [vmem:[%s4649_s14 + $0x1bc8] sm:$0xff]  ;;  %1859 = vmatprep.mubr.f32.mxu1 %v437_v2  ;;  %v1332_v8 = vld [vmem:[%s4649_s14 + $0x1bc0] sm:$0xff]  ;;  %1789 = vmatmul.mubr.f32.vlgmr.msra.gmra.mxu0 %v434_v3 }
  0xc1   : > { %1860 = vmatmul.mubr.f32.vlgmr.msra.gmra.mxu1 %v436_v4  ;;  %v1069_v9 = vld [vmem:[%s4649_s14 + $0x1388] sm:$0xff]  ;;  %1866 = vmatprep.subr.mxu0 %v1077_v5  ;;  %v1068_v11 = vld [vmem:[%s4649_s14 + $0x1380] sm:$0xff] }
  0xc2   : > { %v1325_v10 = vld [vmem:[%s4649_s14 + $0x1b88] sm:$0xff]  ;;  %1937 = vmatprep.subr.mxu1 %v1333_v6  ;;  %v1324_v12 = vld [vmem:[%s4649_s14 + $0x1b80] sm:$0xff]  ;;  %1867 = vmatpush1.msra.mxu0 %v1076_v7 }
  0xc3   : > { %1938 = vmatpush1.msra.mxu1 %v1332_v8  ;;  %v1061_v13 = vld [vmem:[%s4649_s14 + $0x1348] sm:$0xff]  ;;  %1868 = vmatprep.subr.mxu0 %v1069_v9  ;;  %v1060_v15 = vld [vmem:[%s4649_s14 + $0x1340] sm:$0xff] }
  0xc4   : > { %v1317_v14 = vld [vmem:[%s4649_s14 + $0x1b48] sm:$0xff]  ;;  %1939 = vmatprep.subr.mxu1 %v1325_v10  ;;  %v1316_v16 = vld [vmem:[%s4649_s14 + $0x1b40] sm:$0xff]  ;;  %1869 = vmatpush1.msra.mxu0 %v1068_v11 }
  0xc5   : > { %1940 = vmatpush1.msra.mxu1 %v1324_v12  ;;  %v1053_v17 = vld [vmem:[%s4649_s14 + $0x1308] sm:$0xff]  ;;  %1870 = vmatprep.subr.mxu0 %v1061_v13  ;;  %v1052_v19 = vld [vmem:[%s4649_s14 + $0x1300] sm:$0xff] }
  0xc6   : > { %v1309_v18 = vld [vmem:[%s4649_s14 + $0x1b08] sm:$0xff]  ;;  %1941 = vmatprep.subr.mxu1 %v1317_v14  ;;  %v1308_v20 = vld [vmem:[%s4649_s14 + $0x1b00] sm:$0xff]  ;;  %1871 = vmatpush1.msra.mxu0 %v1060_v15 }
  0xc7   : > { %1942 = vmatpush1.msra.mxu1 %v1316_v16  ;;  %v1045_v21 = vld [vmem:[%s4649_s14 + $0x12c8] sm:$0xff]  ;;  %1872 = vmatprep.subr.mxu0 %v1053_v17  ;;  %v1044_v23 = vld [vmem:[%s4649_s14 + $0x12c0] sm:$0xff] }
  0xc8   : > { %v1301_v22 = vld [vmem:[%s4649_s14 + $0x1ac8] sm:$0xff]  ;;  %1943 = vmatprep.subr.mxu1 %v1309_v18  ;;  %v1300_v24 = vld [vmem:[%s4649_s14 + $0x1ac0] sm:$0xff]  ;;  %1873 = vmatpush1.msra.mxu0 %v1052_v19 }
  0xc9   : > { %1944 = vmatpush1.msra.mxu1 %v1308_v20  ;;  %v1037_v25 = vld [vmem:[%s4649_s14 + $0x1288] sm:$0xff]  ;;  %1874 = vmatprep.subr.mxu0 %v1045_v21  ;;  %v1036_v27 = vld [vmem:[%s4649_s14 + $0x1280] sm:$0xff] }
  0xca   : > { %v1293_v26 = vld [vmem:[%s4649_s14 + $0x1a88] sm:$0xff]  ;;  %1945 = vmatprep.subr.mxu1 %v1301_v22  ;;  %v1292_v28 = vld [vmem:[%s4649_s14 + $0x1a80] sm:$0xff]  ;;  %1875 = vmatpush1.msra.mxu0 %v1044_v23 }
  0xcb   : > { %1946 = vmatpush1.msra.mxu1 %v1300_v24  ;;  %v1029_v29 = vld [vmem:[%s4649_s14 + $0x1248] sm:$0xff]  ;;  %1876 = vmatprep.subr.mxu0 %v1037_v25  ;;  %v1028_v31 = vld [vmem:[%s4649_s14 + $0x1240] sm:$0xff] }
  0xcc   : > { %v1285_v30 = vld [vmem:[%s4649_s14 + $0x1a48] sm:$0xff]  ;;  %1947 = vmatprep.subr.mxu1 %v1293_v26  ;;  %v1284_v32 = vld [vmem:[%s4649_s14 + $0x1a40] sm:$0xff]  ;;  %1877 = vmatpush1.msra.mxu0 %v1036_v27 }
  0xcd   : > { %1948 = vmatpush1.msra.mxu1 %v1292_v28  ;;  %v1021_v33 = vld [vmem:[%s4649_s14 + $0x1208] sm:$0xff]  ;;  %1878 = vmatprep.subr.mxu0 %v1029_v29  ;;  %v1020_v35 = vld [vmem:[%s4649_s14 + $0x1200] sm:$0xff] }
  0xce   : > { %v1277_v34 = vld [vmem:[%s4649_s14 + $0x1a08] sm:$0xff]  ;;  %1949 = vmatprep.subr.mxu1 %v1285_v30  ;;  %v1276_v36 = vld [vmem:[%s4649_s14 + $0x1a00] sm:$0xff]  ;;  %1879 = vmatpush1.msra.mxu0 %v1028_v31 }
  0xcf   : > { %1950 = vmatpush1.msra.mxu1 %v1284_v32  ;;  %v1013_v37 = vld [vmem:[%s4649_s14 + $0x11c8] sm:$0xff]  ;;  %1880 = vmatprep.subr.mxu0 %v1021_v33  ;;  %v1012_v39 = vld [vmem:[%s4649_s14 + $0x11c0] sm:$0xff] }
  0xd0   : > { %v1269_v38 = vld [vmem:[%s4649_s14 + $0x19c8] sm:$0xff]  ;;  %1951 = vmatprep.subr.mxu1 %v1277_v34  ;;  %v1268_v40 = vld [vmem:[%s4649_s14 + $0x19c0] sm:$0xff]  ;;  %1881 = vmatpush1.msra.mxu0 %v1020_v35 }
  0xd1   : > { %1952 = vmatpush1.msra.mxu1 %v1276_v36  ;;  %v1005_v41 = vld [vmem:[%s4649_s14 + $0x1188] sm:$0xff]  ;;  %1882 = vmatprep.subr.mxu0 %v1013_v37  ;;  %v1004_v43 = vld [vmem:[%s4649_s14 + $0x1180] sm:$0xff] }
  0xd2   : > { %v1261_v42 = vld [vmem:[%s4649_s14 + $0x1988] sm:$0xff]  ;;  %1953 = vmatprep.subr.mxu1 %v1269_v38  ;;  %v1260_v44 = vld [vmem:[%s4649_s14 + $0x1980] sm:$0xff]  ;;  %1883 = vmatpush1.msra.mxu0 %v1012_v39 }
  0xd3   : > { %1954 = vmatpush1.msra.mxu1 %v1268_v40  ;;  %v997_v45 = vld [vmem:[%s4649_s14 + $0x1148] sm:$0xff]  ;;  %1884 = vmatprep.subr.mxu0 %v1005_v41  ;;  %v996_v47 = vld [vmem:[%s4649_s14 + $0x1140] sm:$0xff] }
  0xd4   : > { %v1253_v46 = vld [vmem:[%s4649_s14 + $0x1948] sm:$0xff]  ;;  %1955 = vmatprep.subr.mxu1 %v1261_v42  ;;  %v1252_v48 = vld [vmem:[%s4649_s14 + $0x1940] sm:$0xff]  ;;  %1885 = vmatpush1.msra.mxu0 %v1004_v43 }
  0xd5   : > { %1956 = vmatpush1.msra.mxu1 %v1260_v44  ;;  %v989_v49 = vld [vmem:[%s4649_s14 + $0x1108] sm:$0xff]  ;;  %1886 = vmatprep.subr.mxu0 %v997_v45  ;;  %v988_v51 = vld [vmem:[%s4649_s14 + $0x1100] sm:$0xff] }
  0xd6   : > { %v1245_v50 = vld [vmem:[%s4649_s14 + $0x1908] sm:$0xff]  ;;  %1957 = vmatprep.subr.mxu1 %v1253_v46  ;;  %v1244_v52 = vld [vmem:[%s4649_s14 + $0x1900] sm:$0xff]  ;;  %1887 = vmatpush1.msra.mxu0 %v996_v47 }
  0xd7   : > { %1958 = vmatpush1.msra.mxu1 %v1252_v48  ;;  %v981_v53 = vld [vmem:[%s4649_s14 + $0x10c8] sm:$0xff]  ;;  %1888 = vmatprep.subr.mxu0 %v989_v49  ;;  %v980_v55 = vld [vmem:[%s4649_s14 + $0x10c0] sm:$0xff] }
  0xd8   : > { %v1237_v54 = vld [vmem:[%s4649_s14 + $0x18c8] sm:$0xff]  ;;  %1959 = vmatprep.subr.mxu1 %v1245_v50  ;;  %v1236_v56 = vld [vmem:[%s4649_s14 + $0x18c0] sm:$0xff]  ;;  %1889 = vmatpush1.msra.mxu0 %v988_v51 }
  0xd9   : > { %1960 = vmatpush1.msra.mxu1 %v1244_v52  ;;  %v973_v57 = vld [vmem:[%s4649_s14 + $0x1088] sm:$0xff]  ;;  %1890 = vmatprep.subr.mxu0 %v981_v53  ;;  %v972_v59 = vld [vmem:[%s4649_s14 + $0x1080] sm:$0xff] }
  0xda   : > { %v1229_v58 = vld [vmem:[%s4649_s14 + $0x1888] sm:$0xff]  ;;  %1961 = vmatprep.subr.mxu1 %v1237_v54  ;;  %v1228_v60 = vld [vmem:[%s4649_s14 + $0x1880] sm:$0xff]  ;;  %1891 = vmatpush1.msra.mxu0 %v980_v55 }
  0xdb   : > { %1962 = vmatpush1.msra.mxu1 %v1236_v56  ;;  %v965_v61 = vld [vmem:[%s4649_s14 + $0x1048] sm:$0xff]  ;;  %1892 = vmatprep.subr.mxu0 %v973_v57  ;;  %v964_v63 = vld [vmem:[%s4649_s14 + $0x1040] sm:$0xff] }
  0xdc   : > { %v1221_v62 = vld [vmem:[%s4649_s14 + $0x1848] sm:$0xff]  ;;  %1963 = vmatprep.subr.mxu1 %v1229_v58  ;;  %v1220_v0 = vld [vmem:[%s4649_s14 + $0x1840] sm:$0xff]  ;;  %1893 = vmatpush1.msra.mxu0 %v972_v59 }
  0xdd   : > { %1964 = vmatpush1.msra.mxu1 %v1228_v60  ;;  %v957_v1 = vld [vmem:[%s4649_s14 + $0x1008] sm:$0xff]  ;;  %1894 = vmatprep.subr.mxu0 %v965_v61  ;;  %v956_v3 = vld [vmem:[%s4649_s14 + $0x1000] sm:$0xff] }
  0xde   : > { %v1213_v2 = vld [vmem:[%s4649_s14 + $0x1808] sm:$0xff]  ;;  %1965 = vmatprep.subr.mxu1 %v1221_v62  ;;  %v1212_v4 = vld [vmem:[%s4649_s14 + $0x1800] sm:$0xff]  ;;  %1895 = vmatpush1.msra.mxu0 %v964_v63 }
  0xdf   : > { %1966 = vmatpush1.msra.mxu1 %v1220_v0  ;;  %v1205_v5 = vld [vmem:[%s4649_s14 + $0x17c8] sm:$0xff]  ;;  %1896 = vmatprep.subr.mxu0 %v957_v1  ;;  %v1204_v7 = vld [vmem:[%s4649_s14 + $0x17c0] sm:$0xff] }
  0xe0   : > { %v1461_v6 = vld [vmem:[%s4649_s14 + $0x1fc8] sm:$0xff]  ;;  %1967 = vmatprep.subr.mxu1 %v1213_v2  ;;  %v1460_v8 = vld [vmem:[%s4649_s14 + $0x1fc0] sm:$0xff]  ;;  %1897 = vmatpush1.msra.mxu0 %v956_v3 }
  0xe1   : > { %1968 = vmatpush1.msra.mxu1 %v1212_v4  ;;  %v1197_v9 = vld [vmem:[%s4649_s14 + $0x1788] sm:$0xff]  ;;  %1898 = vmatprep.subr.mxu0 %v1205_v5  ;;  %v1196_v11 = vld [vmem:[%s4649_s14 + $0x1780] sm:$0xff] }
  0xe2   : > { %v1453_v10 = vld [vmem:[%s4649_s14 + $0x1f88] sm:$0xff]  ;;  %1969 = vmatprep.subr.mxu1 %v1461_v6  ;;  %v1452_v12 = vld [vmem:[%s4649_s14 + $0x1f80] sm:$0xff]  ;;  %1899 = vmatpush2.msra.mxu0 %v1204_v7  ;;  %v441_v7 = vld [vmem:[%s4671_s10 + $0x38] sm:$0xff] }
  0xe3   : > { %1970 = vmatpush2.msra.mxu1 %v1460_v8  ;;  %v1189_v13 = vld [vmem:[%s4649_s14 + $0x1748] sm:$0xff]  ;;  %1900 = vmatprep.subr.mxu0 %v1197_v9  ;;  %v1188_v15 = vld [vmem:[%s4649_s14 + $0x1740] sm:$0xff]  ;;  %v567_v9 = vld [vmem:[%s4649_s14 + $0x3d8] sm:$0xff] }
  0xe4   : > { %v1445_v14 = vld [vmem:[%s4649_s14 + $0x1f48] sm:$0xff]  ;;  %1971 = vmatprep.subr.mxu1 %v1453_v10  ;;  %v1444_v16 = vld [vmem:[%s4649_s14 + $0x1f40] sm:$0xff]  ;;  %1901 = vmatpush2.msra.mxu0 %v1196_v11  ;;  %v440_v10 = vld [vmem:[%s4671_s10 + $0x30] sm:$0xff] }
  0xe5   : > { %1972 = vmatpush2.msra.mxu1 %v1452_v12  ;;  %v1181_v17 = vld [vmem:[%s4649_s14 + $0x1708] sm:$0xff]  ;;  %1902 = vmatprep.subr.mxu0 %v1189_v13  ;;  %v1180_v19 = vld [vmem:[%s4649_s14 + $0x1700] sm:$0xff]  ;;  %v566_v12 = vld [vmem:[%s4649_s14 + $0x3d0] sm:$0xff] }
  0xe6   : > { %v1437_v18 = vld [vmem:[%s4649_s14 + $0x1f08] sm:$0xff]  ;;  %1973 = vmatprep.subr.mxu1 %v1445_v14  ;;  %v1436_v20 = vld [vmem:[%s4649_s14 + $0x1f00] sm:$0xff]  ;;  %1903 = vmatpush2.msra.mxu0 %v1188_v15  ;;  %v559_v14 = vld [vmem:[%s4649_s14 + $0x398] sm:$0xff] }
  0xe7   : > { %1974 = vmatpush2.msra.mxu1 %v1444_v16  ;;  %v1173_v21 = vld [vmem:[%s4649_s14 + $0x16c8] sm:$0xff]  ;;  %1904 = vmatprep.subr.mxu0 %v1181_v17  ;;  %v1172_v23 = vld [vmem:[%s4649_s14 + $0x16c0] sm:$0xff]  ;;  %v558_v16 = vld [vmem:[%s4649_s14 + $0x390] sm:$0xff] }
  0xe8   : > { %v1429_v22 = vld [vmem:[%s4649_s14 + $0x1ec8] sm:$0xff]  ;;  %1975 = vmatprep.subr.mxu1 %v1437_v18  ;;  %v1428_v24 = vld [vmem:[%s4649_s14 + $0x1ec0] sm:$0xff]  ;;  %1905 = vmatpush2.msra.mxu0 %v1180_v19  ;;  %v551_v18 = vld [vmem:[%s4649_s14 + $0x358] sm:$0xff] }
  0xe9   : > { %1976 = vmatpush2.msra.mxu1 %v1436_v20  ;;  %v1165_v25 = vld [vmem:[%s4649_s14 + $0x1688] sm:$0xff]  ;;  %1906 = vmatprep.subr.mxu0 %v1173_v21  ;;  %v1164_v27 = vld [vmem:[%s4649_s14 + $0x1680] sm:$0xff]  ;;  %v550_v20 = vld [vmem:[%s4649_s14 + $0x350] sm:$0xff] }
  0xea   : > { %v1421_v26 = vld [vmem:[%s4649_s14 + $0x1e88] sm:$0xff]  ;;  %1977 = vmatprep.subr.mxu1 %v1429_v22  ;;  %v1420_v28 = vld [vmem:[%s4649_s14 + $0x1e80] sm:$0xff]  ;;  %1907 = vmatpush2.msra.mxu0 %v1172_v23  ;;  %v543_v22 = vld [vmem:[%s4649_s14 + $0x318] sm:$0xff] }
  0xeb   : > { %1978 = vmatpush2.msra.mxu1 %v1428_v24  ;;  %v1157_v29 = vld [vmem:[%s4649_s14 + $0x1648] sm:$0xff]  ;;  %1908 = vmatprep.subr.mxu0 %v1165_v25  ;;  %v1156_v31 = vld [vmem:[%s4649_s14 + $0x1640] sm:$0xff]  ;;  %v542_v24 = vld [vmem:[%s4649_s14 + $0x310] sm:$0xff] }
  0xec   : > { %v1413_v30 = vld [vmem:[%s4649_s14 + $0x1e48] sm:$0xff]  ;;  %1979 = vmatprep.subr.mxu1 %v1421_v26  ;;  %v1412_v32 = vld [vmem:[%s4649_s14 + $0x1e40] sm:$0xff]  ;;  %1909 = vmatpush2.msra.mxu0 %v1164_v27  ;;  %v535_v26 = vld [vmem:[%s4649_s14 + $0x2d8] sm:$0xff] }
  0xed   : > { %1980 = vmatpush2.msra.mxu1 %v1420_v28  ;;  %v1149_v33 = vld [vmem:[%s4649_s14 + $0x1608] sm:$0xff]  ;;  %1910 = vmatprep.subr.mxu0 %v1157_v29  ;;  %v1148_v35 = vld [vmem:[%s4649_s14 + $0x1600] sm:$0xff]  ;;  %v534_v28 = vld [vmem:[%s4649_s14 + $0x2d0] sm:$0xff] }
  0xee   : > { %v1405_v34 = vld [vmem:[%s4649_s14 + $0x1e08] sm:$0xff]  ;;  %1981 = vmatprep.subr.mxu1 %v1413_v30  ;;  %v1404_v36 = vld [vmem:[%s4649_s14 + $0x1e00] sm:$0xff]  ;;  %1911 = vmatpush2.msra.mxu0 %v1156_v31  ;;  %v527_v30 = vld [vmem:[%s4649_s14 + $0x298] sm:$0xff] }
  0xef   : > { %1982 = vmatpush2.msra.mxu1 %v1412_v32  ;;  %v1141_v37 = vld [vmem:[%s4649_s14 + $0x15c8] sm:$0xff]  ;;  %1912 = vmatprep.subr.mxu0 %v1149_v33  ;;  %v1140_v39 = vld [vmem:[%s4649_s14 + $0x15c0] sm:$0xff]  ;;  %v526_v32 = vld [vmem:[%s4649_s14 + $0x290] sm:$0xff] }
  0xf0   : > { %v1397_v38 = vld [vmem:[%s4649_s14 + $0x1dc8] sm:$0xff]  ;;  %1983 = vmatprep.subr.mxu1 %v1405_v34  ;;  %v1396_v40 = vld [vmem:[%s4649_s14 + $0x1dc0] sm:$0xff]  ;;  %1913 = vmatpush2.msra.mxu0 %v1148_v35  ;;  %v519_v34 = vld [vmem:[%s4649_s14 + $0x258] sm:$0xff] }
  0xf1   : > { %1984 = vmatpush2.msra.mxu1 %v1404_v36  ;;  %v1133_v41 = vld [vmem:[%s4649_s14 + $0x1588] sm:$0xff]  ;;  %1914 = vmatprep.subr.mxu0 %v1141_v37  ;;  %v1132_v43 = vld [vmem:[%s4649_s14 + $0x1580] sm:$0xff]  ;;  %v518_v36 = vld [vmem:[%s4649_s14 + $0x250] sm:$0xff] }
  0xf2   : > { %v1389_v42 = vld [vmem:[%s4649_s14 + $0x1d88] sm:$0xff]  ;;  %1985 = vmatprep.subr.mxu1 %v1397_v38  ;;  %v1388_v44 = vld [vmem:[%s4649_s14 + $0x1d80] sm:$0xff]  ;;  %1915 = vmatpush2.msra.mxu0 %v1140_v39  ;;  %v511_v38 = vld [vmem:[%s4649_s14 + $0x218] sm:$0xff] }
  0xf3   : > { %1986 = vmatpush2.msra.mxu1 %v1396_v40  ;;  %v1125_v45 = vld [vmem:[%s4649_s14 + $0x1548] sm:$0xff]  ;;  %1916 = vmatprep.subr.mxu0 %v1133_v41  ;;  %v1124_v47 = vld [vmem:[%s4649_s14 + $0x1540] sm:$0xff]  ;;  %v510_v40 = vld [vmem:[%s4649_s14 + $0x210] sm:$0xff] }
  0xf4   : > { %v1381_v46 = vld [vmem:[%s4649_s14 + $0x1d48] sm:$0xff]  ;;  %1987 = vmatprep.subr.mxu1 %v1389_v42  ;;  %v1380_v48 = vld [vmem:[%s4649_s14 + $0x1d40] sm:$0xff]  ;;  %1917 = vmatpush2.msra.mxu0 %v1132_v43  ;;  %v503_v42 = vld [vmem:[%s4649_s14 + $0x1d8] sm:$0xff] }
  0xf5   : > { %1988 = vmatpush2.msra.mxu1 %v1388_v44  ;;  %v1117_v49 = vld [vmem:[%s4649_s14 + $0x1508] sm:$0xff]  ;;  %1918 = vmatprep.subr.mxu0 %v1125_v45  ;;  %v1116_v51 = vld [vmem:[%s4649_s14 + $0x1500] sm:$0xff]  ;;  %v502_v44 = vld [vmem:[%s4649_s14 + $0x1d0] sm:$0xff] }
  0xf6   : > { %v1373_v50 = vld [vmem:[%s4649_s14 + $0x1d08] sm:$0xff]  ;;  %1989 = vmatprep.subr.mxu1 %v1381_v46  ;;  %v1372_v52 = vld [vmem:[%s4649_s14 + $0x1d00] sm:$0xff]  ;;  %1919 = vmatpush2.msra.mxu0 %v1124_v47  ;;  %v495_v46 = vld [vmem:[%s4649_s14 + $0x198] sm:$0xff] }
  0xf7   : > { %1990 = vmatpush2.msra.mxu1 %v1380_v48  ;;  %v1109_v53 = vld [vmem:[%s4649_s14 + $0x14c8] sm:$0xff]  ;;  %1920 = vmatprep.subr.mxu0 %v1117_v49  ;;  %v1108_v55 = vld [vmem:[%s4649_s14 + $0x14c0] sm:$0xff]  ;;  %v494_v48 = vld [vmem:[%s4649_s14 + $0x190] sm:$0xff] }
  0xf8   : > { %v1365_v54 = vld [vmem:[%s4649_s14 + $0x1cc8] sm:$0xff]  ;;  %1991 = vmatprep.subr.mxu1 %v1373_v50  ;;  %v1364_v56 = vld [vmem:[%s4649_s14 + $0x1cc0] sm:$0xff]  ;;  %1921 = vmatpush2.msra.mxu0 %v1116_v51  ;;  %v487_v50 = vld [vmem:[%s4649_s14 + $0x158] sm:$0xff] }
  0xf9   : > { %1992 = vmatpush2.msra.mxu1 %v1372_v52  ;;  %v1101_v57 = vld [vmem:[%s4649_s14 + $0x1488] sm:$0xff]  ;;  %1922 = vmatprep.subr.mxu0 %v1109_v53  ;;  %v1100_v59 = vld [vmem:[%s4649_s14 + $0x1480] sm:$0xff]  ;;  %v486_v52 = vld [vmem:[%s4649_s14 + $0x150] sm:$0xff] }
  0xfa   : > { %v1357_v58 = vld [vmem:[%s4649_s14 + $0x1c88] sm:$0xff]  ;;  %1993 = vmatprep.subr.mxu1 %v1365_v54  ;;  %v1356_v60 = vld [vmem:[%s4649_s14 + $0x1c80] sm:$0xff]  ;;  %1923 = vmatpush2.msra.mxu0 %v1108_v55  ;;  %v479_v54 = vld [vmem:[%s4649_s14 + $0x118] sm:$0xff] }
  0xfb   : > { %1994 = vmatpush2.msra.mxu1 %v1364_v56  ;;  %v1093_v61 = vld [vmem:[%s4649_s14 + $0x1448] sm:$0xff]  ;;  %1924 = vmatprep.subr.mxu0 %v1101_v57  ;;  %v1092_v63 = vld [vmem:[%s4649_s14 + $0x1440] sm:$0xff]  ;;  %v478_v56 = vld [vmem:[%s4649_s14 + $0x110] sm:$0xff] }
  0xfc   : > { %v1349_v62 = vld [vmem:[%s4649_s14 + $0x1c48] sm:$0xff]  ;;  %1995 = vmatprep.subr.mxu1 %v1357_v58  ;;  %v1348_v0 = vld [vmem:[%s4649_s14 + $0x1c40] sm:$0xff]  ;;  %1925 = vmatpush2.msra.mxu0 %v1100_v59  ;;  %v471_v58 = vld [vmem:[%s4649_s14 + $0xd8] sm:$0xff] }
  0xfd   : > { %1996 = vmatpush2.msra.mxu1 %v1356_v60  ;;  %v1085_v1 = vld [vmem:[%s4649_s14 + $0x1408] sm:$0xff]  ;;  %1926 = vmatprep.subr.mxu0 %v1093_v61  ;;  %v1084_v3 = vld [vmem:[%s4649_s14 + $0x1400] sm:$0xff]  ;;  %v470_v60 = vld [vmem:[%s4649_s14 + $0xd0] sm:$0xff] }
  0xfe   : > { %v1341_v2 = vld [vmem:[%s4649_s14 + $0x1c08] sm:$0xff]  ;;  %1997 = vmatprep.subr.mxu1 %v1349_v62  ;;  %1927 = vmatpush2.msra.mxu0 %v1092_v63  ;;  %v1340_v5 = vld [vmem:[%s4649_s14 + $0x1c00] sm:$0xff]  ;;  %v463_v62 = vld [vmem:[%s4649_s14 + $0x98] sm:$0xff] }
  0xff   : > { %v439_v4 = vld [vmem:[%s4671_s10 + $0x28] sm:$0xff]  ;;  %1998 = vmatpush2.msra.mxu1 %v1348_v0  ;;  %v438_v6 = vld [vmem:[%s4671_s10 + $0x20] sm:$0xff]  ;;  %1928 = vmatprep.subr.mxu0 %v1085_v1  ;;  %v462_v0 = vld [vmem:[%s4649_s14 + $0x90] sm:$0xff] }
 0x100   : > { %1999 = vmatprep.subr.mxu1 %v1341_v2  ;;  %v1589_v8 = vld [vmem:[%s4649_s14 + $0x23c8] sm:$0xff]  ;;  %1929 = vmatpush2.msra.mxu0 %v1084_v3  ;;  %v1588_v11 = vld [vmem:[%s4649_s14 + $0x23c0] sm:$0xff]  ;;  %v455_v2 = vld [vmem:[%s4649_s14 + $0x58] sm:$0xff] }
 0x101   : > { %1930 = vmatprep.mubr.f32.mxu0 %v439_v4  ;;  %2000 = vmatpush2.msra.mxu1 %v1340_v5  ;;  %v1581_v13 = vld [vmem:[%s4649_s14 + $0x2388] sm:$0xff]  ;;  %v1580_v15 = vld [vmem:[%s4649_s14 + $0x2380] sm:$0xff]  ;;  %v454_v4 = vld [vmem:[%s4649_s14 + $0x50] sm:$0xff] }
 0x102   : > { %1931 = vmatmul.mubr.f32.vlgmr.msra.gmra.mxu0 %v438_v6  ;;  %2001 = vmatprep.mubr.f32.mxu1 %v441_v7  ;;  %v1573_v17 = vld [vmem:[%s4649_s14 + $0x2348] sm:$0xff]  ;;  %v1572_v19 = vld [vmem:[%s4649_s14 + $0x2340] sm:$0xff]  ;;  %v447_v6 = vld [vmem:[%s4649_s14 + $0x18] sm:$0xff] }
 0x103   : > { %2008 = vmatprep.subr.mxu0 %v1589_v8  ;;  %2079 = vmatprep.subr.mxu1 %v567_v9  ;;  %v1565_v21 = vld [vmem:[%s4649_s14 + $0x2308] sm:$0xff]  ;;  %v1564_v23 = vld [vmem:[%s4649_s14 + $0x2300] sm:$0xff]  ;;  %v446_v8 = vld [vmem:[%s4649_s14 + $0x10] sm:$0xff] }
 0x104   : > { %2002 = vmatmul.mubr.f32.vlgmr.msra.gmra.mxu1 %v440_v10  ;;  %2009 = vmatpush1.msra.mxu0 %v1588_v11  ;;  %v1557_v25 = vld [vmem:[%s4649_s14 + $0x22c8] sm:$0xff]  ;;  %v1556_v27 = vld [vmem:[%s4649_s14 + $0x22c0] sm:$0xff]  ;;  %v695_v10 = vld [vmem:[%s4649_s14 + $0x7d8] sm:$0xff] }
 0x105   : > { %2080 = vmatpush1.msra.mxu1 %v566_v12  ;;  %2010 = vmatprep.subr.mxu0 %v1581_v13  ;;  %v1549_v29 = vld [vmem:[%s4649_s14 + $0x2288] sm:$0xff]  ;;  %v1548_v31 = vld [vmem:[%s4649_s14 + $0x2280] sm:$0xff]  ;;  %v694_v12 = vld [vmem:[%s4649_s14 + $0x7d0] sm:$0xff] }
 0x106   : > { %2081 = vmatprep.subr.mxu1 %v559_v14  ;;  %2011 = vmatpush1.msra.mxu0 %v1580_v15  ;;  %v1541_v33 = vld [vmem:[%s4649_s14 + $0x2248] sm:$0xff]  ;;  %v1540_v35 = vld [vmem:[%s4649_s14 + $0x2240] sm:$0xff]  ;;  %v687_v14 = vld [vmem:[%s4649_s14 + $0x798] sm:$0xff] }
 0x107   : > { %2082 = vmatpush1.msra.mxu1 %v558_v16  ;;  %2012 = vmatprep.subr.mxu0 %v1573_v17  ;;  %v1533_v37 = vld [vmem:[%s4649_s14 + $0x2208] sm:$0xff]  ;;  %v1532_v39 = vld [vmem:[%s4649_s14 + $0x2200] sm:$0xff]  ;;  %v686_v16 = vld [vmem:[%s4649_s14 + $0x790] sm:$0xff] }
 0x108   : > { %2083 = vmatprep.subr.mxu1 %v551_v18  ;;  %2013 = vmatpush1.msra.mxu0 %v1572_v19  ;;  %v1525_v41 = vld [vmem:[%s4649_s14 + $0x21c8] sm:$0xff]  ;;  %v1524_v43 = vld [vmem:[%s4649_s14 + $0x21c0] sm:$0xff]  ;;  %v679_v18 = vld [vmem:[%s4649_s14 + $0x758] sm:$0xff] }
 0x109   : > { %2084 = vmatpush1.msra.mxu1 %v550_v20  ;;  %2014 = vmatprep.subr.mxu0 %v1565_v21  ;;  %v1517_v45 = vld [vmem:[%s4649_s14 + $0x2188] sm:$0xff]  ;;  %v1516_v47 = vld [vmem:[%s4649_s14 + $0x2180] sm:$0xff]  ;;  %v678_v20 = vld [vmem:[%s4649_s14 + $0x750] sm:$0xff] }
 0x10a   : > { %2085 = vmatprep.subr.mxu1 %v543_v22  ;;  %2015 = vmatpush1.msra.mxu0 %v1564_v23  ;;  %v1509_v49 = vld [vmem:[%s4649_s14 + $0x2148] sm:$0xff]  ;;  %v1508_v51 = vld [vmem:[%s4649_s14 + $0x2140] sm:$0xff]  ;;  %v671_v22 = vld [vmem:[%s4649_s14 + $0x718] sm:$0xff] }
 0x10b   : > { %2086 = vmatpush1.msra.mxu1 %v542_v24  ;;  %2016 = vmatprep.subr.mxu0 %v1557_v25  ;;  %v1501_v53 = vld [vmem:[%s4649_s14 + $0x2108] sm:$0xff]  ;;  %v1500_v55 = vld [vmem:[%s4649_s14 + $0x2100] sm:$0xff]  ;;  %v670_v24 = vld [vmem:[%s4649_s14 + $0x710] sm:$0xff] }
 0x10c   : > { %2087 = vmatprep.subr.mxu1 %v535_v26  ;;  %2017 = vmatpush1.msra.mxu0 %v1556_v27  ;;  %v1493_v57 = vld [vmem:[%s4649_s14 + $0x20c8] sm:$0xff]  ;;  %v1492_v59 = vld [vmem:[%s4649_s14 + $0x20c0] sm:$0xff]  ;;  %v663_v26 = vld [vmem:[%s4649_s14 + $0x6d8] sm:$0xff] }
 0x10d   : > { %2088 = vmatpush1.msra.mxu1 %v534_v28  ;;  %2018 = vmatprep.subr.mxu0 %v1549_v29  ;;  %v1485_v61 = vld [vmem:[%s4649_s14 + $0x2088] sm:$0xff]  ;;  %v1484_v63 = vld [vmem:[%s4649_s14 + $0x2080] sm:$0xff]  ;;  %v662_v28 = vld [vmem:[%s4649_s14 + $0x6d0] sm:$0xff] }
 0x10e   : > { %2089 = vmatprep.subr.mxu1 %v527_v30  ;;  %2019 = vmatpush1.msra.mxu0 %v1548_v31  ;;  %v1477_v1 = vld [vmem:[%s4649_s14 + $0x2048] sm:$0xff]  ;;  %v1476_v3 = vld [vmem:[%s4649_s14 + $0x2040] sm:$0xff]  ;;  %v655_v30 = vld [vmem:[%s4649_s14 + $0x698] sm:$0xff] }
 0x10f   : > { %2090 = vmatpush1.msra.mxu1 %v526_v32  ;;  %2020 = vmatprep.subr.mxu0 %v1541_v33  ;;  %v1469_v5 = vld [vmem:[%s4649_s14 + $0x2008] sm:$0xff]  ;;  %v1468_v7 = vld [vmem:[%s4649_s14 + $0x2000] sm:$0xff]  ;;  %v654_v32 = vld [vmem:[%s4649_s14 + $0x690] sm:$0xff] }
 0x110   : > { %2091 = vmatprep.subr.mxu1 %v519_v34  ;;  %2021 = vmatpush1.msra.mxu0 %v1540_v35  ;;  %v1717_v9 = vld [vmem:[%s4649_s14 + $0x27c8] sm:$0xff]  ;;  %v1716_v11 = vld [vmem:[%s4649_s14 + $0x27c0] sm:$0xff]  ;;  %v647_v34 = vld [vmem:[%s4649_s14 + $0x658] sm:$0xff] }
 0x111   : > { %2092 = vmatpush1.msra.mxu1 %v518_v36  ;;  %2022 = vmatprep.subr.mxu0 %v1533_v37  ;;  %v1709_v13 = vld [vmem:[%s4649_s14 + $0x2788] sm:$0xff]  ;;  %v1708_v15 = vld [vmem:[%s4649_s14 + $0x2780] sm:$0xff]  ;;  %v646_v36 = vld [vmem:[%s4649_s14 + $0x650] sm:$0xff] }
 0x112   : > { %2093 = vmatprep.subr.mxu1 %v511_v38  ;;  %2023 = vmatpush1.msra.mxu0 %v1532_v39  ;;  %v1701_v17 = vld [vmem:[%s4649_s14 + $0x2748] sm:$0xff]  ;;  %v1700_v19 = vld [vmem:[%s4649_s14 + $0x2740] sm:$0xff]  ;;  %v639_v38 = vld [vmem:[%s4649_s14 + $0x618] sm:$0xff] }
 0x113   : > { %2094 = vmatpush1.msra.mxu1 %v510_v40  ;;  %2024 = vmatprep.subr.mxu0 %v1525_v41  ;;  %v1693_v21 = vld [vmem:[%s4649_s14 + $0x2708] sm:$0xff]  ;;  %v1692_v23 = vld [vmem:[%s4649_s14 + $0x2700] sm:$0xff]  ;;  %v638_v40 = vld [vmem:[%s4649_s14 + $0x610] sm:$0xff] }
 0x114   : > { %2095 = vmatprep.subr.mxu1 %v503_v42  ;;  %2025 = vmatpush1.msra.mxu0 %v1524_v43  ;;  %v1685_v25 = vld [vmem:[%s4649_s14 + $0x26c8] sm:$0xff]  ;;  %v1684_v27 = vld [vmem:[%s4649_s14 + $0x26c0] sm:$0xff]  ;;  %v631_v42 = vld [vmem:[%s4649_s14 + $0x5d8] sm:$0xff] }
 0x115   : > { %2096 = vmatpush1.msra.mxu1 %v502_v44  ;;  %2026 = vmatprep.subr.mxu0 %v1517_v45  ;;  %v1677_v29 = vld [vmem:[%s4649_s14 + $0x2688] sm:$0xff]  ;;  %v1676_v31 = vld [vmem:[%s4649_s14 + $0x2680] sm:$0xff]  ;;  %v630_v44 = vld [vmem:[%s4649_s14 + $0x5d0] sm:$0xff] }
 0x116   : > { %2097 = vmatprep.subr.mxu1 %v495_v46  ;;  %2027 = vmatpush1.msra.mxu0 %v1516_v47  ;;  %v1669_v33 = vld [vmem:[%s4649_s14 + $0x2648] sm:$0xff]  ;;  %v1668_v35 = vld [vmem:[%s4649_s14 + $0x2640] sm:$0xff]  ;;  %v623_v46 = vld [vmem:[%s4649_s14 + $0x598] sm:$0xff] }
 0x117   : > { %2098 = vmatpush1.msra.mxu1 %v494_v48  ;;  %2028 = vmatprep.subr.mxu0 %v1509_v49  ;;  %v1661_v37 = vld [vmem:[%s4649_s14 + $0x2608] sm:$0xff]  ;;  %v1660_v39 = vld [vmem:[%s4649_s14 + $0x2600] sm:$0xff]  ;;  %v622_v48 = vld [vmem:[%s4649_s14 + $0x590] sm:$0xff] }
 0x118   : > { %2099 = vmatprep.subr.mxu1 %v487_v50  ;;  %2029 = vmatpush1.msra.mxu0 %v1508_v51  ;;  %v1653_v41 = vld [vmem:[%s4649_s14 + $0x25c8] sm:$0xff]  ;;  %v1652_v43 = vld [vmem:[%s4649_s14 + $0x25c0] sm:$0xff]  ;;  %v615_v50 = vld [vmem:[%s4649_s14 + $0x558] sm:$0xff] }
 0x119   : > { %2100 = vmatpush1.msra.mxu1 %v486_v52  ;;  %2030 = vmatprep.subr.mxu0 %v1501_v53  ;;  %v1645_v45 = vld [vmem:[%s4649_s14 + $0x2588] sm:$0xff]  ;;  %v1644_v47 = vld [vmem:[%s4649_s14 + $0x2580] sm:$0xff]  ;;  %v614_v52 = vld [vmem:[%s4649_s14 + $0x550] sm:$0xff] }
 0x11a   : > { %2101 = vmatprep.subr.mxu1 %v479_v54  ;;  %2031 = vmatpush1.msra.mxu0 %v1500_v55  ;;  %v1637_v49 = vld [vmem:[%s4649_s14 + $0x2548] sm:$0xff]  ;;  %v1636_v51 = vld [vmem:[%s4649_s14 + $0x2540] sm:$0xff]  ;;  %v607_v54 = vld [vmem:[%s4649_s14 + $0x518] sm:$0xff] }
 0x11b   : > { %2102 = vmatpush1.msra.mxu1 %v478_v56  ;;  %2032 = vmatprep.subr.mxu0 %v1493_v57  ;;  %v1629_v53 = vld [vmem:[%s4649_s14 + $0x2508] sm:$0xff]  ;;  %v1628_v55 = vld [vmem:[%s4649_s14 + $0x2500] sm:$0xff]  ;;  %v606_v56 = vld [vmem:[%s4649_s14 + $0x510] sm:$0xff] }
 0x11c   : > { %2103 = vmatprep.subr.mxu1 %v471_v58  ;;  %2033 = vmatpush1.msra.mxu0 %v1492_v59  ;;  %v1621_v57 = vld [vmem:[%s4649_s14 + $0x24c8] sm:$0xff]  ;;  %v599_v58 = vld [vmem:[%s4649_s14 + $0x4d8] sm:$0xff]  ;;  %v1620_v59 = vld [vmem:[%s4649_s14 + $0x24c0] sm:$0xff] }
 0x11d   : > { %2104 = vmatpush1.msra.mxu1 %v470_v60  ;;  %2034 = vmatprep.subr.mxu0 %v1485_v61  ;;  %v598_v60 = vld [vmem:[%s4649_s14 + $0x4d0] sm:$0xff]  ;;  %v1613_v61 = vld [vmem:[%s4649_s14 + $0x2488] sm:$0xff] }
 0x11e   : > { %2105 = vmatprep.subr.mxu1 %v463_v62  ;;  %2035 = vmatpush1.msra.mxu0 %v1484_v63  ;;  %v591_v62 = vld [vmem:[%s4649_s14 + $0x498] sm:$0xff]  ;;  %v1612_v63 = vld [vmem:[%s4649_s14 + $0x2480] sm:$0xff] }
 0x11f   : > { %2106 = vmatpush1.msra.mxu1 %v462_v0  ;;  %2036 = vmatprep.subr.mxu0 %v1477_v1  ;;  %v590_v0 = vld [vmem:[%s4649_s14 + $0x490] sm:$0xff]  ;;  %v1605_v1 = vld [vmem:[%s4649_s14 + $0x2448] sm:$0xff] }
 0x120   : > { %2107 = vmatprep.subr.mxu1 %v455_v2  ;;  %2037 = vmatpush1.msra.mxu0 %v1476_v3  ;;  %v583_v2 = vld [vmem:[%s4649_s14 + $0x458] sm:$0xff]  ;;  %v1604_v3 = vld [vmem:[%s4649_s14 + $0x2440] sm:$0xff] }
 0x121   : > { %2108 = vmatpush1.msra.mxu1 %v454_v4  ;;  %2038 = vmatprep.subr.mxu0 %v1469_v5  ;;  %v582_v4 = vld [vmem:[%s4649_s14 + $0x450] sm:$0xff]  ;;  %v1597_v5 = vld [vmem:[%s4649_s14 + $0x2408] sm:$0xff] }
 0x122   : > { %2109 = vmatprep.subr.mxu1 %v447_v6  ;;  %2039 = vmatpush1.msra.mxu0 %v1468_v7  ;;  %v575_v6 = vld [vmem:[%s4649_s14 + $0x418] sm:$0xff]  ;;  %v1596_v7 = vld [vmem:[%s4649_s14 + $0x2400] sm:$0xff] }
 0x123   : > { %2110 = vmatpush1.msra.mxu1 %v446_v8  ;;  %2040 = vmatprep.subr.mxu0 %v1717_v9  ;;  %v443_v8 = vld [vmem:[%s4671_s10 + $0x48] sm:$0xff]  ;;  %v574_v9 = vld [vmem:[%s4649_s14 + $0x410] sm:$0xff] }
 0x124   : > { %2111 = vmatprep.subr.mxu1 %v695_v10  ;;  %2041 = vmatpush2.msra.mxu0 %v1716_v11  ;;  %v442_v10 = vld [vmem:[%s4671_s10 + $0x40] sm:$0xff]  ;;  %v823_v11 = vld [vmem:[%s4649_s14 + $0xbd8] sm:$0xff] }
 0x125   : > { %2112 = vmatpush2.msra.mxu1 %v694_v12  ;;  %2042 = vmatprep.subr.mxu0 %v1709_v13  ;;  %v1079_v12 = vld [vmem:[%s4649_s14 + $0x13d8] sm:$0xff]  ;;  %v822_v13 = vld [vmem:[%s4649_s14 + $0xbd0] sm:$0xff] }
 0x126   : > { %2113 = vmatprep.subr.mxu1 %v687_v14  ;;  %2043 = vmatpush2.msra.mxu0 %v1708_v15  ;;  %v1078_v14 = vld [vmem:[%s4649_s14 + $0x13d0] sm:$0xff]  ;;  %v4210_v15 = vld [vmem:[%s4671_s10 + $0x8] sm:$0xff] }
 0x127   : > { %2114 = vmatpush2.msra.mxu1 %v686_v16  ;;  %2044 = vmatprep.subr.mxu0 %v1701_v17  ;;  %v815_v16 = vld [vmem:[%s4649_s14 + $0xb98] sm:$0xff] }
 0x128   : > { %2115 = vmatprep.subr.mxu1 %v679_v18  ;;  %2045 = vmatpush2.msra.mxu0 %v1700_v19  ;;  %v1071_v17 = vld [vmem:[%s4649_s14 + $0x1398] sm:$0xff]  ;;  %v4211_v18 = vld [vmem:[%s4671_s10] sm:$0xff]  ;;  %v814_v19 = vld [vmem:[%s4649_s14 + $0xb90] sm:$0xff] }
 0x129   : > { %2116 = vmatpush2.msra.mxu1 %v678_v20  ;;  %2046 = vmatprep.subr.mxu0 %v1693_v21  ;;  %v1070_v20 = vld [vmem:[%s4649_s14 + $0x1390] sm:$0xff]  ;;  %v807_v21 = vld [vmem:[%s4649_s14 + $0xb58] sm:$0xff] }
 0x12a   : > { %2117 = vmatprep.subr.mxu1 %v671_v22  ;;  %2047 = vmatpush2.msra.mxu0 %v1692_v23  ;;  %v1063_v22 = vld [vmem:[%s4649_s14 + $0x1358] sm:$0xff]  ;;  %v806_v23 = vld [vmem:[%s4649_s14 + $0xb50] sm:$0xff] }
 0x12b   : > { %2118 = vmatpush2.msra.mxu1 %v670_v24  ;;  %2048 = vmatprep.subr.mxu0 %v1685_v25  ;;  %v1062_v24 = vld [vmem:[%s4649_s14 + $0x1350] sm:$0xff]  ;;  %v799_v25 = vld [vmem:[%s4649_s14 + $0xb18] sm:$0xff] }
 0x12c   : > { %2119 = vmatprep.subr.mxu1 %v663_v26  ;;  %2049 = vmatpush2.msra.mxu0 %v1684_v27  ;;  %v1055_v26 = vld [vmem:[%s4649_s14 + $0x1318] sm:$0xff]  ;;  %v798_v27 = vld [vmem:[%s4649_s14 + $0xb10] sm:$0xff] }
 0x12d   : > { %2120 = vmatpush2.msra.mxu1 %v662_v28  ;;  %2050 = vmatprep.subr.mxu0 %v1677_v29  ;;  %v1054_v28 = vld [vmem:[%s4649_s14 + $0x1310] sm:$0xff]  ;;  %v791_v29 = vld [vmem:[%s4649_s14 + $0xad8] sm:$0xff] }
 0x12e   : > { %2121 = vmatprep.subr.mxu1 %v655_v30  ;;  %2051 = vmatpush2.msra.mxu0 %v1676_v31  ;;  %v1047_v30 = vld [vmem:[%s4649_s14 + $0x12d8] sm:$0xff]  ;;  %v790_v31 = vld [vmem:[%s4649_s14 + $0xad0] sm:$0xff] }
 0x12f   : > { %2122 = vmatpush2.msra.mxu1 %v654_v32  ;;  %2052 = vmatprep.subr.mxu0 %v1669_v33  ;;  %v1046_v32 = vld [vmem:[%s4649_s14 + $0x12d0] sm:$0xff]  ;;  %v783_v33 = vld [vmem:[%s4649_s14 + $0xa98] sm:$0xff] }
 0x130   : > { %2123 = vmatprep.subr.mxu1 %v647_v34  ;;  %2053 = vmatpush2.msra.mxu0 %v1668_v35  ;;  %v1039_v34 = vld [vmem:[%s4649_s14 + $0x1298] sm:$0xff]  ;;  %v782_v35 = vld [vmem:[%s4649_s14 + $0xa90] sm:$0xff] }
 0x131   : > { %2124 = vmatpush2.msra.mxu1 %v646_v36  ;;  %2054 = vmatprep.subr.mxu0 %v1661_v37  ;;  %v1038_v36 = vld [vmem:[%s4649_s14 + $0x1290] sm:$0xff]  ;;  %v775_v37 = vld [vmem:[%s4649_s14 + $0xa58] sm:$0xff] }
 0x132   : > { %2125 = vmatprep.subr.mxu1 %v639_v38  ;;  %2055 = vmatpush2.msra.mxu0 %v1660_v39  ;;  %v1031_v38 = vld [vmem:[%s4649_s14 + $0x1258] sm:$0xff]  ;;  %v774_v39 = vld [vmem:[%s4649_s14 + $0xa50] sm:$0xff] }
 0x133   : > { %2126 = vmatpush2.msra.mxu1 %v638_v40  ;;  %2056 = vmatprep.subr.mxu0 %v1653_v41  ;;  %v1030_v40 = vld [vmem:[%s4649_s14 + $0x1250] sm:$0xff]  ;;  %v767_v41 = vld [vmem:[%s4649_s14 + $0xa18] sm:$0xff] }
 0x134   : > { %2127 = vmatprep.subr.mxu1 %v631_v42  ;;  %2057 = vmatpush2.msra.mxu0 %v1652_v43  ;;  %v1023_v42 = vld [vmem:[%s4649_s14 + $0x1218] sm:$0xff]  ;;  %v766_v43 = vld [vmem:[%s4649_s14 + $0xa10] sm:$0xff] }
 0x135   : > { %2128 = vmatpush2.msra.mxu1 %v630_v44  ;;  %2058 = vmatprep.subr.mxu0 %v1645_v45  ;;  %v1022_v44 = vld [vmem:[%s4649_s14 + $0x1210] sm:$0xff]  ;;  %v759_v45 = vld [vmem:[%s4649_s14 + $0x9d8] sm:$0xff] }
 0x136   : > { %2129 = vmatprep.subr.mxu1 %v623_v46  ;;  %2059 = vmatpush2.msra.mxu0 %v1644_v47  ;;  %v1015_v46 = vld [vmem:[%s4649_s14 + $0x11d8] sm:$0xff]  ;;  %v758_v47 = vld [vmem:[%s4649_s14 + $0x9d0] sm:$0xff] }
 0x137   : > { %2130 = vmatpush2.msra.mxu1 %v622_v48  ;;  %2060 = vmatprep.subr.mxu0 %v1637_v49  ;;  %v1014_v48 = vld [vmem:[%s4649_s14 + $0x11d0] sm:$0xff]  ;;  %v751_v49 = vld [vmem:[%s4649_s14 + $0x998] sm:$0xff] }
 0x138   : > { %2131 = vmatprep.subr.mxu1 %v615_v50  ;;  %2061 = vmatpush2.msra.mxu0 %v1636_v51  ;;  %v1007_v50 = vld [vmem:[%s4649_s14 + $0x1198] sm:$0xff]  ;;  %v750_v51 = vld [vmem:[%s4649_s14 + $0x990] sm:$0xff] }
 0x139   : > { %2132 = vmatpush2.msra.mxu1 %v614_v52  ;;  %2062 = vmatprep.subr.mxu0 %v1629_v53  ;;  %v1006_v52 = vld [vmem:[%s4649_s14 + $0x1190] sm:$0xff]  ;;  %v743_v53 = vld [vmem:[%s4649_s14 + $0x958] sm:$0xff] }
 0x13a   : > { %2133 = vmatprep.subr.mxu1 %v607_v54  ;;  %2063 = vmatpush2.msra.mxu0 %v1628_v55  ;;  %v999_v54 = vld [vmem:[%s4649_s14 + $0x1158] sm:$0xff]  ;;  %v742_v55 = vld [vmem:[%s4649_s14 + $0x950] sm:$0xff] }
 0x13b   : > { %2134 = vmatpush2.msra.mxu1 %v606_v56  ;;  %2064 = vmatprep.subr.mxu0 %v1621_v57  ;;  %v998_v56 = vld [vmem:[%s4649_s14 + $0x1150] sm:$0xff]  ;;  %v735_v57 = vld [vmem:[%s4649_s14 + $0x918] sm:$0xff] }
 0x13c   : > { %2135 = vmatprep.subr.mxu1 %v599_v58  ;;  %2065 = vmatpush2.msra.mxu0 %v1620_v59  ;;  %v991_v58 = vld [vmem:[%s4649_s14 + $0x1118] sm:$0xff]  ;;  %v734_v59 = vld [vmem:[%s4649_s14 + $0x910] sm:$0xff] }
 0x13d   : > { %2136 = vmatpush2.msra.mxu1 %v598_v60  ;;  %2066 = vmatprep.subr.mxu0 %v1613_v61  ;;  %v990_v60 = vld [vmem:[%s4649_s14 + $0x1110] sm:$0xff]  ;;  %v727_v61 = vld [vmem:[%s4649_s14 + $0x8d8] sm:$0xff] }
 0x13e   : > { %2137 = vmatprep.subr.mxu1 %v591_v62  ;;  %2067 = vmatpush2.msra.mxu0 %v1612_v63  ;;  %v983_v62 = vld [vmem:[%s4649_s14 + $0x10d8] sm:$0xff]  ;;  %v726_v63 = vld [vmem:[%s4649_s14 + $0x8d0] sm:$0xff] }
 0x13f   : > { %2138 = vmatpush2.msra.mxu1 %v590_v0  ;;  %2068 = vmatprep.subr.mxu0 %v1605_v1  ;;  %v982_v0 = vld [vmem:[%s4649_s14 + $0x10d0] sm:$0xff]  ;;  %v719_v1 = vld [vmem:[%s4649_s14 + $0x898] sm:$0xff] }
 0x140   : > { %2139 = vmatprep.subr.mxu1 %v583_v2  ;;  %2069 = vmatpush2.msra.mxu0 %v1604_v3  ;;  %v975_v2 = vld [vmem:[%s4649_s14 + $0x1098] sm:$0xff]  ;;  %v718_v3 = vld [vmem:[%s4649_s14 + $0x890] sm:$0xff] }
 0x141   : > { %2140 = vmatpush2.msra.mxu1 %v582_v4  ;;  %2070 = vmatprep.subr.mxu0 %v1597_v5  ;;  %v974_v4 = vld [vmem:[%s4649_s14 + $0x1090] sm:$0xff]  ;;  %v711_v5 = vld [vmem:[%s4649_s14 + $0x858] sm:$0xff] }
 0x142   : > { %2141 = vmatprep.subr.mxu1 %v575_v6  ;;  %2071 = vmatpush2.msra.mxu0 %v1596_v7  ;;  %v967_v6 = vld [vmem:[%s4649_s14 + $0x1058] sm:$0xff]  ;;  %v710_v7 = vld [vmem:[%s4649_s14 + $0x850] sm:$0xff] }
 0x143   : > { %2072 = vmatprep.mubr.f32.mxu0 %v443_v8  ;;  %2142 = vmatpush2.msra.mxu1 %v574_v9  ;;  %v966_v8 = vld [vmem:[%s4649_s14 + $0x1050] sm:$0xff]  ;;  %v703_v9 = vld [vmem:[%s4649_s14 + $0x818] sm:$0xff] }
 0x144   : > { %2073 = vmatmul.mubr.f32.vlgmr.msra.gmra.mxu0 %v442_v10  ;;  %2143 = vmatprep.mubr.f32.mxu1 %v4210_v15  ;;  %v959_v10 = vld [vmem:[%s4649_s14 + $0x1018] sm:$0xff]  ;;  %v950_v15 = vld [vmem:[%s4649_s14 + $0xfd0] sm:$0xff] }
 0x145   : > { %2150 = vmatprep.subr.mxu0 %v823_v11  ;;  %2221 = vmatprep.subr.mxu1 %v1079_v12  ;;  %v702_v11 = vld [vmem:[%s4649_s14 + $0x810] sm:$0xff] }
 0x146   : > { %2144 = vmatmul.mubr.f32.vlgmr.msra.gmra.mxu1 %v4211_v18  ;;  %2151 = vmatpush1.msra.mxu0 %v822_v13  ;;  %v958_v12 = vld [vmem:[%s4649_s14 + $0x1010] sm:$0xff]  ;;  %v951_v13 = vld [vmem:[%s4649_s14 + $0xfd8] sm:$0xff] }
 0x147   : > { %2222 = vmatpush1.msra.mxu1 %v1078_v14  ;;  %2152 = vmatprep.subr.mxu0 %v815_v16  ;;  %v1207_v14 = vld [vmem:[%s4649_s14 + $0x17d8] sm:$0xff]  ;;  %v1206_v16 = vld [vmem:[%s4649_s14 + $0x17d0] sm:$0xff] }
 0x148   : > { %2223 = vmatprep.subr.mxu1 %v1071_v17  ;;  %2153 = vmatpush1.msra.mxu0 %v814_v19  ;;  %v943_v17 = vld [vmem:[%s4649_s14 + $0xf98] sm:$0xff]  ;;  %v942_v19 = vld [vmem:[%s4649_s14 + $0xf90] sm:$0xff] }
 0x149   : > { %2224 = vmatpush1.msra.mxu1 %v1070_v20  ;;  %2154 = vmatprep.subr.mxu0 %v807_v21  ;;  %v1199_v18 = vld [vmem:[%s4649_s14 + $0x1798] sm:$0xff]  ;;  %v1198_v20 = vld [vmem:[%s4649_s14 + $0x1790] sm:$0xff] }
 0x14a   : > { %2225 = vmatprep.subr.mxu1 %v1063_v22  ;;  %2155 = vmatpush1.msra.mxu0 %v806_v23  ;;  %v935_v21 = vld [vmem:[%s4649_s14 + $0xf58] sm:$0xff]  ;;  %v934_v23 = vld [vmem:[%s4649_s14 + $0xf50] sm:$0xff] }
 0x14b   : > { %2226 = vmatpush1.msra.mxu1 %v1062_v24  ;;  %2156 = vmatprep.subr.mxu0 %v799_v25  ;;  %v1191_v22 = vld [vmem:[%s4649_s14 + $0x1758] sm:$0xff]  ;;  %v1190_v24 = vld [vmem:[%s4649_s14 + $0x1750] sm:$0xff] }
 0x14c   : > { %2227 = vmatprep.subr.mxu1 %v1055_v26  ;;  %2157 = vmatpush1.msra.mxu0 %v798_v27  ;;  %v927_v25 = vld [vmem:[%s4649_s14 + $0xf18] sm:$0xff]  ;;  %v926_v27 = vld [vmem:[%s4649_s14 + $0xf10] sm:$0xff] }
 0x14d   : > { %2228 = vmatpush1.msra.mxu1 %v1054_v28  ;;  %2158 = vmatprep.subr.mxu0 %v791_v29  ;;  %v1183_v26 = vld [vmem:[%s4649_s14 + $0x1718] sm:$0xff]  ;;  %v1182_v28 = vld [vmem:[%s4649_s14 + $0x1710] sm:$0xff] }
 0x14e   : > { %2229 = vmatprep.subr.mxu1 %v1047_v30  ;;  %2159 = vmatpush1.msra.mxu0 %v790_v31  ;;  %v919_v29 = vld [vmem:[%s4649_s14 + $0xed8] sm:$0xff]  ;;  %v918_v31 = vld [vmem:[%s4649_s14 + $0xed0] sm:$0xff] }
 0x14f   : > { %2230 = vmatpush1.msra.mxu1 %v1046_v32  ;;  %2160 = vmatprep.subr.mxu0 %v783_v33  ;;  %v1175_v30 = vld [vmem:[%s4649_s14 + $0x16d8] sm:$0xff]  ;;  %v1174_v32 = vld [vmem:[%s4649_s14 + $0x16d0] sm:$0xff] }
 0x150   : > { %2231 = vmatprep.subr.mxu1 %v1039_v34  ;;  %2161 = vmatpush1.msra.mxu0 %v782_v35  ;;  %v911_v33 = vld [vmem:[%s4649_s14 + $0xe98] sm:$0xff]  ;;  %v910_v35 = vld [vmem:[%s4649_s14 + $0xe90] sm:$0xff] }
 0x151   : > { %2232 = vmatpush1.msra.mxu1 %v1038_v36  ;;  %2162 = vmatprep.subr.mxu0 %v775_v37  ;;  %v1167_v34 = vld [vmem:[%s4649_s14 + $0x1698] sm:$0xff]  ;;  %v1166_v36 = vld [vmem:[%s4649_s14 + $0x1690] sm:$0xff] }
 0x152   : > { %2233 = vmatprep.subr.mxu1 %v1031_v38  ;;  %2163 = vmatpush1.msra.mxu0 %v774_v39  ;;  %v903_v37 = vld [vmem:[%s4649_s14 + $0xe58] sm:$0xff]  ;;  %v902_v39 = vld [vmem:[%s4649_s14 + $0xe50] sm:$0xff] }
 0x153   : > { %2234 = vmatpush1.msra.mxu1 %v1030_v40  ;;  %2164 = vmatprep.subr.mxu0 %v767_v41  ;;  %v1159_v38 = vld [vmem:[%s4649_s14 + $0x1658] sm:$0xff]  ;;  %v1158_v40 = vld [vmem:[%s4649_s14 + $0x1650] sm:$0xff] }
 0x154   : > { %2235 = vmatprep.subr.mxu1 %v1023_v42  ;;  %2165 = vmatpush1.msra.mxu0 %v766_v43  ;;  %v895_v41 = vld [vmem:[%s4649_s14 + $0xe18] sm:$0xff]  ;;  %v894_v43 = vld [vmem:[%s4649_s14 + $0xe10] sm:$0xff] }
 0x155   : > { %2236 = vmatpush1.msra.mxu1 %v1022_v44  ;;  %2166 = vmatprep.subr.mxu0 %v759_v45  ;;  %v1151_v42 = vld [vmem:[%s4649_s14 + $0x1618] sm:$0xff]  ;;  %v1150_v44 = vld [vmem:[%s4649_s14 + $0x1610] sm:$0xff] }
 0x156   : > { %2237 = vmatprep.subr.mxu1 %v1015_v46  ;;  %2167 = vmatpush1.msra.mxu0 %v758_v47  ;;  %v887_v45 = vld [vmem:[%s4649_s14 + $0xdd8] sm:$0xff]  ;;  %v886_v47 = vld [vmem:[%s4649_s14 + $0xdd0] sm:$0xff] }
 0x157   : > { %2238 = vmatpush1.msra.mxu1 %v1014_v48  ;;  %2168 = vmatprep.subr.mxu0 %v751_v49  ;;  %v1143_v46 = vld [vmem:[%s4649_s14 + $0x15d8] sm:$0xff]  ;;  %v1142_v48 = vld [vmem:[%s4649_s14 + $0x15d0] sm:$0xff] }
 0x158   : > { %2239 = vmatprep.subr.mxu1 %v1007_v50  ;;  %2169 = vmatpush1.msra.mxu0 %v750_v51  ;;  %v879_v49 = vld [vmem:[%s4649_s14 + $0xd98] sm:$0xff]  ;;  %v878_v51 = vld [vmem:[%s4649_s14 + $0xd90] sm:$0xff] }
 0x159   : > { %2240 = vmatpush1.msra.mxu1 %v1006_v52  ;;  %2170 = vmatprep.subr.mxu0 %v743_v53  ;;  %v1135_v50 = vld [vmem:[%s4649_s14 + $0x1598] sm:$0xff]  ;;  %v1134_v52 = vld [vmem:[%s4649_s14 + $0x1590] sm:$0xff] }
 0x15a   : > { %2241 = vmatprep.subr.mxu1 %v999_v54  ;;  %2171 = vmatpush1.msra.mxu0 %v742_v55  ;;  %v871_v53 = vld [vmem:[%s4649_s14 + $0xd58] sm:$0xff]  ;;  %v870_v55 = vld [vmem:[%s4649_s14 + $0xd50] sm:$0xff] }
 0x15b   : > { %2242 = vmatpush1.msra.mxu1 %v998_v56  ;;  %2172 = vmatprep.subr.mxu0 %v735_v57  ;;  %v1127_v54 = vld [vmem:[%s4649_s14 + $0x1558] sm:$0xff]  ;;  %v1126_v56 = vld [vmem:[%s4649_s14 + $0x1550] sm:$0xff] }
 0x15c   : > { %2243 = vmatprep.subr.mxu1 %v991_v58  ;;  %2173 = vmatpush1.msra.mxu0 %v734_v59  ;;  %v863_v57 = vld [vmem:[%s4649_s14 + $0xd18] sm:$0xff]  ;;  %v862_v59 = vld [vmem:[%s4649_s14 + $0xd10] sm:$0xff] }
 0x15d   : > { %2244 = vmatpush1.msra.mxu1 %v990_v60  ;;  %2174 = vmatprep.subr.mxu0 %v727_v61  ;;  %v1119_v58 = vld [vmem:[%s4649_s14 + $0x1518] sm:$0xff]  ;;  %v1118_v60 = vld [vmem:[%s4649_s14 + $0x1510] sm:$0xff] }
 0x15e   : > { %2245 = vmatprep.subr.mxu1 %v983_v62  ;;  %2175 = vmatpush1.msra.mxu0 %v726_v63  ;;  %v855_v61 = vld [vmem:[%s4649_s14 + $0xcd8] sm:$0xff]  ;;  %v854_v63 = vld [vmem:[%s4649_s14 + $0xcd0] sm:$0xff] }
 0x15f   : > { %2246 = vmatpush1.msra.mxu1 %v982_v0  ;;  %2176 = vmatprep.subr.mxu0 %v719_v1  ;;  %v1111_v62 = vld [vmem:[%s4649_s14 + $0x14d8] sm:$0xff]  ;;  %v1110_v0 = vld [vmem:[%s4649_s14 + $0x14d0] sm:$0xff] }
 0x160   : > { %2247 = vmatprep.subr.mxu1 %v975_v2  ;;  %2177 = vmatpush1.msra.mxu0 %v718_v3  ;;  %v847_v1 = vld [vmem:[%s4649_s14 + $0xc98] sm:$0xff]  ;;  %v846_v3 = vld [vmem:[%s4649_s14 + $0xc90] sm:$0xff] }
 0x161   : > { %2248 = vmatpush1.msra.mxu1 %v974_v4  ;;  %2178 = vmatprep.subr.mxu0 %v711_v5  ;;  %v1103_v2 = vld [vmem:[%s4649_s14 + $0x1498] sm:$0xff]  ;;  %v1102_v4 = vld [vmem:[%s4649_s14 + $0x1490] sm:$0xff] }
 0x162   : > { %2249 = vmatprep.subr.mxu1 %v967_v6  ;;  %2179 = vmatpush1.msra.mxu0 %v710_v7  ;;  %v839_v5 = vld [vmem:[%s4649_s14 + $0xc58] sm:$0xff]  ;;  %v838_v7 = vld [vmem:[%s4649_s14 + $0xc50] sm:$0xff] }
 0x163   : > { %2250 = vmatpush1.msra.mxu1 %v966_v8  ;;  %2180 = vmatprep.subr.mxu0 %v703_v9  ;;  %v1095_v6 = vld [vmem:[%s4649_s14 + $0x1458] sm:$0xff]  ;;  %v1094_v8 = vld [vmem:[%s4649_s14 + $0x1450] sm:$0xff] }
 0x164   : > { %2251 = vmatprep.subr.mxu1 %v959_v10  ;;  %2181 = vmatpush1.msra.mxu0 %v702_v11  ;;  %v831_v9 = vld [vmem:[%s4649_s14 + $0xc18] sm:$0xff]  ;;  %v830_v11 = vld [vmem:[%s4649_s14 + $0xc10] sm:$0xff] }
 0x165   : > { %2252 = vmatpush1.msra.mxu1 %v958_v12  ;;  %2182 = vmatprep.subr.mxu0 %v951_v13  ;;  %v1087_v10 = vld [vmem:[%s4649_s14 + $0x1418] sm:$0xff]  ;;  %v1086_v12 = vld [vmem:[%s4649_s14 + $0x1410] sm:$0xff] }
 0x166   : > { %2253 = vmatprep.subr.mxu1 %v1207_v14  ;;  %2183 = vmatpush2.msra.mxu0 %v950_v15  ;;  %v1335_v13 = vld [vmem:[%s4649_s14 + $0x1bd8] sm:$0xff] }
 0x167   : > { %2254 = vmatpush2.msra.mxu1 %v1206_v16  ;;  %2184 = vmatprep.subr.mxu0 %v943_v17  ;;  %v4212_v14 = vld [vmem:[%s4671_s10 + $0x18] sm:$0xff]  ;;  %v4213_v16 = vld [vmem:[%s4671_s10 + $0x10] sm:$0xff] }
 0x168   : > { %2255 = vmatprep.subr.mxu1 %v1199_v18  ;;  %2185 = vmatpush2.msra.mxu0 %v942_v19  ;;  %v1591_v15 = vld [vmem:[%s4649_s14 + $0x23d8] sm:$0xff]  ;;  %v1334_v17 = vld [vmem:[%s4649_s14 + $0x1bd0] sm:$0xff]  ;;  %v4214_v19 = vld [vmem:[%s4671_s10 + $0x28] sm:$0xff] }
 0x169   : > { %2256 = vmatpush2.msra.mxu1 %v1198_v20  ;;  %2186 = vmatprep.subr.mxu0 %v935_v21  ;;  %v1590_v18 = vld [vmem:[%s4649_s14 + $0x23d0] sm:$0xff]  ;;  %v1327_v20 = vld [vmem:[%s4649_s14 + $0x1b98] sm:$0xff] }
 0x16a   : > { %2257 = vmatprep.subr.mxu1 %v1191_v22  ;;  %2187 = vmatpush2.msra.mxu0 %v934_v23  ;;  %v1583_v21 = vld [vmem:[%s4649_s14 + $0x2398] sm:$0xff]  ;;  %v4215_v22 = vld [vmem:[%s4671_s10 + $0x20] sm:$0xff]  ;;  %v1326_v23 = vld [vmem:[%s4649_s14 + $0x1b90] sm:$0xff] }
 0x16b   : > { %2258 = vmatpush2.msra.mxu1 %v1190_v24  ;;  %2188 = vmatprep.subr.mxu0 %v927_v25  ;;  %v1582_v24 = vld [vmem:[%s4649_s14 + $0x2390] sm:$0xff]  ;;  %v1319_v25 = vld [vmem:[%s4649_s14 + $0x1b58] sm:$0xff] }
 0x16c   : > { %2259 = vmatprep.subr.mxu1 %v1183_v26  ;;  %2189 = vmatpush2.msra.mxu0 %v926_v27  ;;  %v1575_v26 = vld [vmem:[%s4649_s14 + $0x2358] sm:$0xff]  ;;  %v1318_v27 = vld [vmem:[%s4649_s14 + $0x1b50] sm:$0xff] }
 0x16d   : > { %2260 = vmatpush2.msra.mxu1 %v1182_v28  ;;  %2190 = vmatprep.subr.mxu0 %v919_v29  ;;  %v1574_v28 = vld [vmem:[%s4649_s14 + $0x2350] sm:$0xff]  ;;  %v1311_v29 = vld [vmem:[%s4649_s14 + $0x1b18] sm:$0xff] }
 0x16e   : > { %2261 = vmatprep.subr.mxu1 %v1175_v30  ;;  %2191 = vmatpush2.msra.mxu0 %v918_v31  ;;  %v1567_v30 = vld [vmem:[%s4649_s14 + $0x2318] sm:$0xff]  ;;  %v1310_v31 = vld [vmem:[%s4649_s14 + $0x1b10] sm:$0xff] }
 0x16f   : > { %2262 = vmatpush2.msra.mxu1 %v1174_v32  ;;  %2192 = vmatprep.subr.mxu0 %v911_v33  ;;  %v1566_v32 = vld [vmem:[%s4649_s14 + $0x2310] sm:$0xff]  ;;  %v1303_v33 = vld [vmem:[%s4649_s14 + $0x1ad8] sm:$0xff] }
 0x170   : > { %2263 = vmatprep.subr.mxu1 %v1167_v34  ;;  %2193 = vmatpush2.msra.mxu0 %v910_v35  ;;  %v1559_v34 = vld [vmem:[%s4649_s14 + $0x22d8] sm:$0xff]  ;;  %v1302_v35 = vld [vmem:[%s4649_s14 + $0x1ad0] sm:$0xff] }
 0x171   : > { %2264 = vmatpush2.msra.mxu1 %v1166_v36  ;;  %2194 = vmatprep.subr.mxu0 %v903_v37  ;;  %v1558_v36 = vld [vmem:[%s4649_s14 + $0x22d0] sm:$0xff]  ;;  %v1295_v37 = vld [vmem:[%s4649_s14 + $0x1a98] sm:$0xff] }
 0x172   : > { %2265 = vmatprep.subr.mxu1 %v1159_v38  ;;  %2195 = vmatpush2.msra.mxu0 %v902_v39  ;;  %v1551_v38 = vld [vmem:[%s4649_s14 + $0x2298] sm:$0xff]  ;;  %v1294_v39 = vld [vmem:[%s4649_s14 + $0x1a90] sm:$0xff] }
 0x173   : > { %2266 = vmatpush2.msra.mxu1 %v1158_v40  ;;  %2196 = vmatprep.subr.mxu0 %v895_v41  ;;  %v1550_v40 = vld [vmem:[%s4649_s14 + $0x2290] sm:$0xff]  ;;  %v1287_v41 = vld [vmem:[%s4649_s14 + $0x1a58] sm:$0xff] }
 0x174   : > { %2267 = vmatprep.subr.mxu1 %v1151_v42  ;;  %2197 = vmatpush2.msra.mxu0 %v894_v43  ;;  %v1543_v42 = vld [vmem:[%s4649_s14 + $0x2258] sm:$0xff]  ;;  %v1286_v43 = vld [vmem:[%s4649_s14 + $0x1a50] sm:$0xff] }
 0x175   : > { %2268 = vmatpush2.msra.mxu1 %v1150_v44  ;;  %2198 = vmatprep.subr.mxu0 %v887_v45  ;;  %v1542_v44 = vld [vmem:[%s4649_s14 + $0x2250] sm:$0xff]  ;;  %v1279_v45 = vld [vmem:[%s4649_s14 + $0x1a18] sm:$0xff] }
 0x176   : > { %2269 = vmatprep.subr.mxu1 %v1143_v46  ;;  %2199 = vmatpush2.msra.mxu0 %v886_v47  ;;  %v1535_v46 = vld [vmem:[%s4649_s14 + $0x2218] sm:$0xff]  ;;  %v1278_v47 = vld [vmem:[%s4649_s14 + $0x1a10] sm:$0xff] }
 0x177   : > { %2270 = vmatpush2.msra.mxu1 %v1142_v48  ;;  %2200 = vmatprep.subr.mxu0 %v879_v49  ;;  %v1534_v48 = vld [vmem:[%s4649_s14 + $0x2210] sm:$0xff]  ;;  %v1271_v49 = vld [vmem:[%s4649_s14 + $0x19d8] sm:$0xff] }
 0x178   : > { %2271 = vmatprep.subr.mxu1 %v1135_v50  ;;  %2201 = vmatpush2.msra.mxu0 %v878_v51  ;;  %v1527_v50 = vld [vmem:[%s4649_s14 + $0x21d8] sm:$0xff]  ;;  %v1270_v51 = vld [vmem:[%s4649_s14 + $0x19d0] sm:$0xff] }
 0x179   : > { %2272 = vmatpush2.msra.mxu1 %v1134_v52  ;;  %2202 = vmatprep.subr.mxu0 %v871_v53  ;;  %v1526_v52 = vld [vmem:[%s4649_s14 + $0x21d0] sm:$0xff]  ;;  %v1263_v53 = vld [vmem:[%s4649_s14 + $0x1998] sm:$0xff] }
 0x17a   : > { %2273 = vmatprep.subr.mxu1 %v1127_v54  ;;  %2203 = vmatpush2.msra.mxu0 %v870_v55  ;;  %v1519_v54 = vld [vmem:[%s4649_s14 + $0x2198] sm:$0xff]  ;;  %v1262_v55 = vld [vmem:[%s4649_s14 + $0x1990] sm:$0xff] }
 0x17b   : > { %2274 = vmatpush2.msra.mxu1 %v1126_v56  ;;  %2204 = vmatprep.subr.mxu0 %v863_v57  ;;  %v1518_v56 = vld [vmem:[%s4649_s14 + $0x2190] sm:$0xff]  ;;  %v1255_v57 = vld [vmem:[%s4649_s14 + $0x1958] sm:$0xff] }
 0x17c   : > { %2275 = vmatprep.subr.mxu1 %v1119_v58  ;;  %2205 = vmatpush2.msra.mxu0 %v862_v59  ;;  %v1511_v58 = vld [vmem:[%s4649_s14 + $0x2158] sm:$0xff]  ;;  %v1254_v59 = vld [vmem:[%s4649_s14 + $0x1950] sm:$0xff] }
 0x17d   : > { %2276 = vmatpush2.msra.mxu1 %v1118_v60  ;;  %2206 = vmatprep.subr.mxu0 %v855_v61  ;;  %v1510_v60 = vld [vmem:[%s4649_s14 + $0x2150] sm:$0xff]  ;;  %v1247_v61 = vld [vmem:[%s4649_s14 + $0x1918] sm:$0xff] }
 0x17e   : > { %2277 = vmatprep.subr.mxu1 %v1111_v62  ;;  %2207 = vmatpush2.msra.mxu0 %v854_v63  ;;  %v1503_v62 = vld [vmem:[%s4649_s14 + $0x2118] sm:$0xff]  ;;  %v1246_v63 = vld [vmem:[%s4649_s14 + $0x1910] sm:$0xff] }
 0x17f   : > { %2278 = vmatpush2.msra.mxu1 %v1110_v0  ;;  %2208 = vmatprep.subr.mxu0 %v847_v1  ;;  %v1502_v0 = vld [vmem:[%s4649_s14 + $0x2110] sm:$0xff]  ;;  %v1239_v1 = vld [vmem:[%s4649_s14 + $0x18d8] sm:$0xff] }
 0x180   : > { %2279 = vmatprep.subr.mxu1 %v1103_v2  ;;  %2209 = vmatpush2.msra.mxu0 %v846_v3  ;;  %v1495_v2 = vld [vmem:[%s4649_s14 + $0x20d8] sm:$0xff]  ;;  %v1238_v3 = vld [vmem:[%s4649_s14 + $0x18d0] sm:$0xff] }
 0x181   : > { %2280 = vmatpush2.msra.mxu1 %v1102_v4  ;;  %2210 = vmatprep.subr.mxu0 %v839_v5  ;;  %v1494_v4 = vld [vmem:[%s4649_s14 + $0x20d0] sm:$0xff]  ;;  %v1231_v5 = vld [vmem:[%s4649_s14 + $0x1898] sm:$0xff] }
 0x182   : > { %2281 = vmatprep.subr.mxu1 %v1095_v6  ;;  %2211 = vmatpush2.msra.mxu0 %v838_v7  ;;  %v1487_v6 = vld [vmem:[%s4649_s14 + $0x2098] sm:$0xff]  ;;  %v1230_v7 = vld [vmem:[%s4649_s14 + $0x1890] sm:$0xff] }
 0x183   : > { %2282 = vmatpush2.msra.mxu1 %v1094_v8  ;;  %2212 = vmatprep.subr.mxu0 %v831_v9  ;;  %v1486_v8 = vld [vmem:[%s4649_s14 + $0x2090] sm:$0xff]  ;;  %v1223_v9 = vld [vmem:[%s4649_s14 + $0x1858] sm:$0xff] }
 0x184   : > { %2283 = vmatprep.subr.mxu1 %v1087_v10  ;;  %2213 = vmatpush2.msra.mxu0 %v830_v11  ;;  %v1479_v10 = vld [vmem:[%s4649_s14 + $0x2058] sm:$0xff]  ;;  %v1222_v11 = vld [vmem:[%s4649_s14 + $0x1850] sm:$0xff] }
 0x185   : > { %2214 = vmatprep.mubr.f32.mxu0 %v4212_v14  ;;  %2284 = vmatpush2.msra.mxu1 %v1086_v12  ;;  %v1478_v12 = vld [vmem:[%s4649_s14 + $0x2050] sm:$0xff]  ;;  %v1471_v14 = vld [vmem:[%s4649_s14 + $0x2018] sm:$0xff] }
 0x186   : > { %2215 = vmatmul.mubr.f32.vlgmr.msra.gmra.mxu0 %v4213_v16  ;;  %2285 = vmatprep.mubr.f32.mxu1 %v4214_v19  ;;  %v1470_v16 = vld [vmem:[%s4649_s14 + $0x2010] sm:$0xff] }
 0x187   : > { %2292 = vmatprep.subr.mxu0 %v1335_v13  ;;  %2363 = vmatprep.subr.mxu1 %v1591_v15  ;;  %v1215_v13 = vld [vmem:[%s4649_s14 + $0x1818] sm:$0xff]  ;;  %v1214_v15 = vld [vmem:[%s4649_s14 + $0x1810] sm:$0xff] }
 0x188   : > { %2286 = vmatmul.mubr.f32.vlgmr.msra.gmra.mxu1 %v4215_v22  ;;  %2293 = vmatpush1.msra.mxu0 %v1334_v17  ;;  %v1463_v17 = vld [vmem:[%s4649_s14 + $0x1fd8] sm:$0xff]  ;;  %v1462_v19 = vld [vmem:[%s4649_s14 + $0x1fd0] sm:$0xff] }
 0x189   : > { %2364 = vmatpush1.msra.mxu1 %v1590_v18  ;;  %2294 = vmatprep.subr.mxu0 %v1327_v20  ;;  %v1719_v18 = vld [vmem:[%s4649_s14 + $0x27d8] sm:$0xff]  ;;  %v1718_v20 = vld [vmem:[%s4649_s14 + $0x27d0] sm:$0xff] }
 0x18a   : > { %2365 = vmatprep.subr.mxu1 %v1583_v21  ;;  %2295 = vmatpush1.msra.mxu0 %v1326_v23  ;;  %v1455_v21 = vld [vmem:[%s4649_s14 + $0x1f98] sm:$0xff]  ;;  %v1454_v23 = vld [vmem:[%s4649_s14 + $0x1f90] sm:$0xff] }
 0x18b   : > { %2366 = vmatpush1.msra.mxu1 %v1582_v24  ;;  %2296 = vmatprep.subr.mxu0 %v1319_v25  ;;  %v1711_v22 = vld [vmem:[%s4649_s14 + $0x2798] sm:$0xff]  ;;  %v1710_v24 = vld [vmem:[%s4649_s14 + $0x2790] sm:$0xff] }
 0x18c   : > { %2367 = vmatprep.subr.mxu1 %v1575_v26  ;;  %2297 = vmatpush1.msra.mxu0 %v1318_v27  ;;  %v1447_v25 = vld [vmem:[%s4649_s14 + $0x1f58] sm:$0xff]  ;;  %v1446_v27 = vld [vmem:[%s4649_s14 + $0x1f50] sm:$0xff] }
 0x18d   : > { %2368 = vmatpush1.msra.mxu1 %v1574_v28  ;;  %2298 = vmatprep.subr.mxu0 %v1311_v29  ;;  %v1703_v26 = vld [vmem:[%s4649_s14 + $0x2758] sm:$0xff]  ;;  %v1702_v28 = vld [vmem:[%s4649_s14 + $0x2750] sm:$0xff] }
 0x18e   : > { %2369 = vmatprep.subr.mxu1 %v1567_v30  ;;  %2299 = vmatpush1.msra.mxu0 %v1310_v31  ;;  %v1439_v29 = vld [vmem:[%s4649_s14 + $0x1f18] sm:$0xff]  ;;  %v1438_v31 = vld [vmem:[%s4649_s14 + $0x1f10] sm:$0xff] }
 0x18f   : > { %2370 = vmatpush1.msra.mxu1 %v1566_v32  ;;  %2300 = vmatprep.subr.mxu0 %v1303_v33  ;;  %v1695_v30 = vld [vmem:[%s4649_s14 + $0x2718] sm:$0xff]  ;;  %v1694_v32 = vld [vmem:[%s4649_s14 + $0x2710] sm:$0xff] }
 0x190   : > { %2371 = vmatprep.subr.mxu1 %v1559_v34  ;;  %2301 = vmatpush1.msra.mxu0 %v1302_v35  ;;  %v1431_v33 = vld [vmem:[%s4649_s14 + $0x1ed8] sm:$0xff]  ;;  %v1430_v35 = vld [vmem:[%s4649_s14 + $0x1ed0] sm:$0xff] }
 0x191   : > { %2372 = vmatpush1.msra.mxu1 %v1558_v36  ;;  %2302 = vmatprep.subr.mxu0 %v1295_v37  ;;  %v1687_v34 = vld [vmem:[%s4649_s14 + $0x26d8] sm:$0xff]  ;;  %v1686_v36 = vld [vmem:[%s4649_s14 + $0x26d0] sm:$0xff] }
 0x192   : > { %2373 = vmatprep.subr.mxu1 %v1551_v38  ;;  %2303 = vmatpush1.msra.mxu0 %v1294_v39  ;;  %v1423_v37 = vld [vmem:[%s4649_s14 + $0x1e98] sm:$0xff]  ;;  %v1422_v39 = vld [vmem:[%s4649_s14 + $0x1e90] sm:$0xff] }
 0x193   : > { %2374 = vmatpush1.msra.mxu1 %v1550_v40  ;;  %2304 = vmatprep.subr.mxu0 %v1287_v41  ;;  %v1679_v38 = vld [vmem:[%s4649_s14 + $0x2698] sm:$0xff]  ;;  %v1678_v40 = vld [vmem:[%s4649_s14 + $0x2690] sm:$0xff] }
 0x194   : > { %2375 = vmatprep.subr.mxu1 %v1543_v42  ;;  %2305 = vmatpush1.msra.mxu0 %v1286_v43  ;;  %v1415_v41 = vld [vmem:[%s4649_s14 + $0x1e58] sm:$0xff]  ;;  %v1414_v43 = vld [vmem:[%s4649_s14 + $0x1e50] sm:$0xff] }
 0x195   : > { %2376 = vmatpush1.msra.mxu1 %v1542_v44  ;;  %2306 = vmatprep.subr.mxu0 %v1279_v45  ;;  %v1671_v42 = vld [vmem:[%s4649_s14 + $0x2658] sm:$0xff]  ;;  %v1670_v44 = vld [vmem:[%s4649_s14 + $0x2650] sm:$0xff] }
 0x196   : > { %2377 = vmatprep.subr.mxu1 %v1535_v46  ;;  %2307 = vmatpush1.msra.mxu0 %v1278_v47  ;;  %v1407_v45 = vld [vmem:[%s4649_s14 + $0x1e18] sm:$0xff]  ;;  %v1406_v47 = vld [vmem:[%s4649_s14 + $0x1e10] sm:$0xff] }
 0x197   : > { %2378 = vmatpush1.msra.mxu1 %v1534_v48  ;;  %2308 = vmatprep.subr.mxu0 %v1271_v49  ;;  %v1663_v46 = vld [vmem:[%s4649_s14 + $0x2618] sm:$0xff]  ;;  %v1662_v48 = vld [vmem:[%s4649_s14 + $0x2610] sm:$0xff] }
 0x198   : > { %2379 = vmatprep.subr.mxu1 %v1527_v50  ;;  %2309 = vmatpush1.msra.mxu0 %v1270_v51  ;;  %v1399_v49 = vld [vmem:[%s4649_s14 + $0x1dd8] sm:$0xff]  ;;  %v1398_v51 = vld [vmem:[%s4649_s14 + $0x1dd0] sm:$0xff] }
 0x199   : > { %2380 = vmatpush1.msra.mxu1 %v1526_v52  ;;  %2310 = vmatprep.subr.mxu0 %v1263_v53  ;;  %v1655_v50 = vld [vmem:[%s4649_s14 + $0x25d8] sm:$0xff]  ;;  %v1654_v52 = vld [vmem:[%s4649_s14 + $0x25d0] sm:$0xff] }
 0x19a   : > { %2381 = vmatprep.subr.mxu1 %v1519_v54  ;;  %2311 = vmatpush1.msra.mxu0 %v1262_v55  ;;  %v1391_v53 = vld [vmem:[%s4649_s14 + $0x1d98] sm:$0xff]  ;;  %v1390_v55 = vld [vmem:[%s4649_s14 + $0x1d90] sm:$0xff] }
 0x19b   : > { %2382 = vmatpush1.msra.mxu1 %v1518_v56  ;;  %2312 = vmatprep.subr.mxu0 %v1255_v57  ;;  %v1647_v54 = vld [vmem:[%s4649_s14 + $0x2598] sm:$0xff]  ;;  %v1646_v56 = vld [vmem:[%s4649_s14 + $0x2590] sm:$0xff] }
 0x19c   : > { %2383 = vmatprep.subr.mxu1 %v1511_v58  ;;  %2313 = vmatpush1.msra.mxu0 %v1254_v59  ;;  %v1383_v57 = vld [vmem:[%s4649_s14 + $0x1d58] sm:$0xff]  ;;  %v1382_v59 = vld [vmem:[%s4649_s14 + $0x1d50] sm:$0xff] }
 0x19d   : > { %2384 = vmatpush1.msra.mxu1 %v1510_v60  ;;  %2314 = vmatprep.subr.mxu0 %v1247_v61  ;;  %v1639_v58 = vld [vmem:[%s4649_s14 + $0x2558] sm:$0xff]  ;;  %v1638_v60 = vld [vmem:[%s4649_s14 + $0x2550] sm:$0xff] }
 0x19e   : > { %2385 = vmatprep.subr.mxu1 %v1503_v62  ;;  %2315 = vmatpush1.msra.mxu0 %v1246_v63  ;;  %v1375_v61 = vld [vmem:[%s4649_s14 + $0x1d18] sm:$0xff]  ;;  %v1374_v63 = vld [vmem:[%s4649_s14 + $0x1d10] sm:$0xff] }
 0x19f   : > { %2386 = vmatpush1.msra.mxu1 %v1502_v0  ;;  %2316 = vmatprep.subr.mxu0 %v1239_v1  ;;  %v1631_v62 = vld [vmem:[%s4649_s14 + $0x2518] sm:$0xff]  ;;  %v1630_v0 = vld [vmem:[%s4649_s14 + $0x2510] sm:$0xff] }
 0x1a0   : > { %2387 = vmatprep.subr.mxu1 %v1495_v2  ;;  %2317 = vmatpush1.msra.mxu0 %v1238_v3  ;;  %v1367_v1 = vld [vmem:[%s4649_s14 + $0x1cd8] sm:$0xff]  ;;  %v1366_v3 = vld [vmem:[%s4649_s14 + $0x1cd0] sm:$0xff] }
 0x1a1   : > { %2388 = vmatpush1.msra.mxu1 %v1494_v4  ;;  %2318 = vmatprep.subr.mxu0 %v1231_v5  ;;  %v1623_v2 = vld [vmem:[%s4649_s14 + $0x24d8] sm:$0xff]  ;;  %v1622_v4 = vld [vmem:[%s4649_s14 + $0x24d0] sm:$0xff] }
 0x1a2   : > { %2389 = vmatprep.subr.mxu1 %v1487_v6  ;;  %2319 = vmatpush1.msra.mxu0 %v1230_v7  ;;  %v1359_v5 = vld [vmem:[%s4649_s14 + $0x1c98] sm:$0xff]  ;;  %v1358_v7 = vld [vmem:[%s4649_s14 + $0x1c90] sm:$0xff] }
 0x1a3   : > { %2390 = vmatpush1.msra.mxu1 %v1486_v8  ;;  %2320 = vmatprep.subr.mxu0 %v1223_v9  ;;  %v1615_v6 = vld [vmem:[%s4649_s14 + $0x2498] sm:$0xff]  ;;  %v1614_v8 = vld [vmem:[%s4649_s14 + $0x2490] sm:$0xff] }
 0x1a4   : > { %2391 = vmatprep.subr.mxu1 %v1479_v10  ;;  %2321 = vmatpush1.msra.mxu0 %v1222_v11  ;;  %v1351_v9 = vld [vmem:[%s4649_s14 + $0x1c58] sm:$0xff]  ;;  %v1350_v11 = vld [vmem:[%s4649_s14 + $0x1c50] sm:$0xff] }
 0x1a5   : > { %2392 = vmatpush1.msra.mxu1 %v1478_v12  ;;  %2322 = vmatprep.subr.mxu0 %v1215_v13  ;;  %v1607_v10 = vld [vmem:[%s4649_s14 + $0x2458] sm:$0xff]  ;;  %v1606_v12 = vld [vmem:[%s4649_s14 + $0x2450] sm:$0xff] }
 0x1a6   : > { %2393 = vmatprep.subr.mxu1 %v1471_v14  ;;  %2323 = vmatpush1.msra.mxu0 %v1214_v15  ;;  %v1343_v13 = vld [vmem:[%s4649_s14 + $0x1c18] sm:$0xff]  ;;  %v1342_v15 = vld [vmem:[%s4649_s14 + $0x1c10] sm:$0xff] }
 0x1a7   : > { %2394 = vmatpush1.msra.mxu1 %v1470_v16  ;;  %2324 = vmatprep.subr.mxu0 %v1463_v17  ;;  %v1599_v14 = vld [vmem:[%s4649_s14 + $0x2418] sm:$0xff]  ;;  %v1598_v16 = vld [vmem:[%s4649_s14 + $0x2410] sm:$0xff]  ;;  %v569_v17 = vld [vmem:[%s4649_s14 + $0x3e8] sm:$0xff] }
 0x1a8   : > { %2395 = vmatprep.subr.mxu1 %v1719_v18  ;;  %2325 = vmatpush2.msra.mxu0 %v1462_v19  ;;  %v4216_v18 = vld [vmem:[%s4671_s10 + $0x38] sm:$0xff]  ;;  %v825_v19 = vld [vmem:[%s4649_s14 + $0xbe8] sm:$0xff] }
 0x1a9   : > { %2396 = vmatpush2.msra.mxu1 %v1718_v20  ;;  %2326 = vmatprep.subr.mxu0 %v1455_v21  ;;  %v4217_v20 = vld [vmem:[%s4671_s10 + $0x30] sm:$0xff]  ;;  %v568_v21 = vld [vmem:[%s4649_s14 + $0x3e0] sm:$0xff] }
 0x1aa   : > { %2397 = vmatprep.subr.mxu1 %v1711_v22  ;;  %2327 = vmatpush2.msra.mxu0 %v1454_v23  ;;  %v824_v22 = vld [vmem:[%s4649_s14 + $0xbe0] sm:$0xff]  ;;  %v4218_v23 = vld [vmem:[%s4671_s10 + $0x48] sm:$0xff] }
 0x1ab   : > { %2398 = vmatpush2.msra.mxu1 %v1710_v24  ;;  %2328 = vmatprep.subr.mxu0 %v1447_v25  ;;  %v561_v24 = vld [vmem:[%s4649_s14 + $0x3a8] sm:$0xff] }
 0x1ac   : > { %2399 = vmatprep.subr.mxu1 %v1703_v26  ;;  %2329 = vmatpush2.msra.mxu0 %v1446_v27  ;;  %v817_v25 = vld [vmem:[%s4649_s14 + $0xba8] sm:$0xff]  ;;  %v4219_v26 = vld [vmem:[%s4671_s10 + $0x40] sm:$0xff] }
 0x1ad   : > { %2400 = vmatpush2.msra.mxu1 %v1702_v28  ;;  %2330 = vmatprep.subr.mxu0 %v1439_v29  ;;  %v560_v27 = vld [vmem:[%s4649_s14 + $0x3a0] sm:$0xff]  ;;  %v553_v29 = vld [vmem:[%s4649_s14 + $0x368] sm:$0xff] }
 0x1ae   : > { %2401 = vmatprep.subr.mxu1 %v1695_v30  ;;  %2331 = vmatpush2.msra.mxu0 %v1438_v31  ;;  %v816_v28 = vld [vmem:[%s4649_s14 + $0xba0] sm:$0xff]  ;;  %v809_v30 = vld [vmem:[%s4649_s14 + $0xb68] sm:$0xff] }
 0x1af   : > { %2402 = vmatpush2.msra.mxu1 %v1694_v32  ;;  %2332 = vmatprep.subr.mxu0 %v1431_v33  ;;  %v552_v31 = vld [vmem:[%s4649_s14 + $0x360] sm:$0xff]  ;;  %v545_v33 = vld [vmem:[%s4649_s14 + $0x328] sm:$0xff] }
 0x1b0   : > { %2403 = vmatprep.subr.mxu1 %v1687_v34  ;;  %2333 = vmatpush2.msra.mxu0 %v1430_v35  ;;  %v808_v32 = vld [vmem:[%s4649_s14 + $0xb60] sm:$0xff]  ;;  %v801_v34 = vld [vmem:[%s4649_s14 + $0xb28] sm:$0xff] }
 0x1b1   : > { %2404 = vmatpush2.msra.mxu1 %v1686_v36  ;;  %2334 = vmatprep.subr.mxu0 %v1423_v37  ;;  %v544_v35 = vld [vmem:[%s4649_s14 + $0x320] sm:$0xff]  ;;  %v537_v37 = vld [vmem:[%s4649_s14 + $0x2e8] sm:$0xff] }
 0x1b2   : > { %2405 = vmatprep.subr.mxu1 %v1679_v38  ;;  %2335 = vmatpush2.msra.mxu0 %v1422_v39  ;;  %v800_v36 = vld [vmem:[%s4649_s14 + $0xb20] sm:$0xff]  ;;  %v793_v38 = vld [vmem:[%s4649_s14 + $0xae8] sm:$0xff] }
 0x1b3   : > { %2406 = vmatpush2.msra.mxu1 %v1678_v40  ;;  %2336 = vmatprep.subr.mxu0 %v1415_v41  ;;  %v536_v39 = vld [vmem:[%s4649_s14 + $0x2e0] sm:$0xff]  ;;  %v529_v41 = vld [vmem:[%s4649_s14 + $0x2a8] sm:$0xff] }
 0x1b4   : > { %2407 = vmatprep.subr.mxu1 %v1671_v42  ;;  %2337 = vmatpush2.msra.mxu0 %v1414_v43  ;;  %v792_v40 = vld [vmem:[%s4649_s14 + $0xae0] sm:$0xff]  ;;  %v785_v42 = vld [vmem:[%s4649_s14 + $0xaa8] sm:$0xff] }
 0x1b5   : > { %2408 = vmatpush2.msra.mxu1 %v1670_v44  ;;  %2338 = vmatprep.subr.mxu0 %v1407_v45  ;;  %v528_v43 = vld [vmem:[%s4649_s14 + $0x2a0] sm:$0xff]  ;;  %v521_v45 = vld [vmem:[%s4649_s14 + $0x268] sm:$0xff] }
 0x1b6   : > { %2409 = vmatprep.subr.mxu1 %v1663_v46  ;;  %2339 = vmatpush2.msra.mxu0 %v1406_v47  ;;  %v784_v44 = vld [vmem:[%s4649_s14 + $0xaa0] sm:$0xff]  ;;  %v777_v46 = vld [vmem:[%s4649_s14 + $0xa68] sm:$0xff] }
 0x1b7   : > { %2410 = vmatpush2.msra.mxu1 %v1662_v48  ;;  %2340 = vmatprep.subr.mxu0 %v1399_v49  ;;  %v520_v47 = vld [vmem:[%s4649_s14 + $0x260] sm:$0xff]  ;;  %v513_v49 = vld [vmem:[%s4649_s14 + $0x228] sm:$0xff] }
 0x1b8   : > { %2411 = vmatprep.subr.mxu1 %v1655_v50  ;;  %2341 = vmatpush2.msra.mxu0 %v1398_v51  ;;  %v776_v48 = vld [vmem:[%s4649_s14 + $0xa60] sm:$0xff]  ;;  %v769_v50 = vld [vmem:[%s4649_s14 + $0xa28] sm:$0xff] }
 0x1b9   : > { %2412 = vmatpush2.msra.mxu1 %v1654_v52  ;;  %2342 = vmatprep.subr.mxu0 %v1391_v53  ;;  %v512_v51 = vld [vmem:[%s4649_s14 + $0x220] sm:$0xff]  ;;  %v505_v53 = vld [vmem:[%s4649_s14 + $0x1e8] sm:$0xff] }
 0x1ba   : > { %2413 = vmatprep.subr.mxu1 %v1647_v54  ;;  %2343 = vmatpush2.msra.mxu0 %v1390_v55  ;;  %v768_v52 = vld [vmem:[%s4649_s14 + $0xa20] sm:$0xff]  ;;  %v761_v54 = vld [vmem:[%s4649_s14 + $0x9e8] sm:$0xff] }
 0x1bb   : > { %2414 = vmatpush2.msra.mxu1 %v1646_v56  ;;  %2344 = vmatprep.subr.mxu0 %v1383_v57  ;;  %v504_v55 = vld [vmem:[%s4649_s14 + $0x1e0] sm:$0xff]  ;;  %v497_v57 = vld [vmem:[%s4649_s14 + $0x1a8] sm:$0xff] }
 0x1bc   : > { %2415 = vmatprep.subr.mxu1 %v1639_v58  ;;  %2345 = vmatpush2.msra.mxu0 %v1382_v59  ;;  %v760_v56 = vld [vmem:[%s4649_s14 + $0x9e0] sm:$0xff]  ;;  %v753_v58 = vld [vmem:[%s4649_s14 + $0x9a8] sm:$0xff] }
 0x1bd   : > { %2416 = vmatpush2.msra.mxu1 %v1638_v60  ;;  %2346 = vmatprep.subr.mxu0 %v1375_v61  ;;  %v496_v59 = vld [vmem:[%s4649_s14 + $0x1a0] sm:$0xff]  ;;  %v489_v61 = vld [vmem:[%s4649_s14 + $0x168] sm:$0xff] }
 0x1be   : > { %2417 = vmatprep.subr.mxu1 %v1631_v62  ;;  %2347 = vmatpush2.msra.mxu0 %v1374_v63  ;;  %v752_v60 = vld [vmem:[%s4649_s14 + $0x9a0] sm:$0xff]  ;;  %v745_v62 = vld [vmem:[%s4649_s14 + $0x968] sm:$0xff] }
 0x1bf   : > { %2418 = vmatpush2.msra.mxu1 %v1630_v0  ;;  %2348 = vmatprep.subr.mxu0 %v1367_v1  ;;  %v488_v63 = vld [vmem:[%s4649_s14 + $0x160] sm:$0xff]  ;;  %v481_v1 = vld [vmem:[%s4649_s14 + $0x128] sm:$0xff] }
 0x1c0   : > { %2419 = vmatprep.subr.mxu1 %v1623_v2  ;;  %2349 = vmatpush2.msra.mxu0 %v1366_v3  ;;  %v744_v0 = vld [vmem:[%s4649_s14 + $0x960] sm:$0xff]  ;;  %v737_v2 = vld [vmem:[%s4649_s14 + $0x928] sm:$0xff] }
 0x1c1   : > { %2420 = vmatpush2.msra.mxu1 %v1622_v4  ;;  %2350 = vmatprep.subr.mxu0 %v1359_v5  ;;  %v480_v3 = vld [vmem:[%s4649_s14 + $0x120] sm:$0xff]  ;;  %v473_v5 = vld [vmem:[%s4649_s14 + $0xe8] sm:$0xff] }
 0x1c2   : > { %2421 = vmatprep.subr.mxu1 %v1615_v6  ;;  %2351 = vmatpush2.msra.mxu0 %v1358_v7  ;;  %v736_v4 = vld [vmem:[%s4649_s14 + $0x920] sm:$0xff]  ;;  %v729_v6 = vld [vmem:[%s4649_s14 + $0x8e8] sm:$0xff] }
 0x1c3   : > { %2422 = vmatpush2.msra.mxu1 %v1614_v8  ;;  %2352 = vmatprep.subr.mxu0 %v1351_v9  ;;  %v472_v7 = vld [vmem:[%s4649_s14 + $0xe0] sm:$0xff]  ;;  %v465_v9 = vld [vmem:[%s4649_s14 + $0xa8] sm:$0xff] }
 0x1c4   : > { %2423 = vmatprep.subr.mxu1 %v1607_v10  ;;  %2353 = vmatpush2.msra.mxu0 %v1350_v11  ;;  %v728_v8 = vld [vmem:[%s4649_s14 + $0x8e0] sm:$0xff]  ;;  %v721_v10 = vld [vmem:[%s4649_s14 + $0x8a8] sm:$0xff] }
 0x1c5   : > { %2424 = vmatpush2.msra.mxu1 %v1606_v12  ;;  %2354 = vmatprep.subr.mxu0 %v1343_v13  ;;  %v464_v11 = vld [vmem:[%s4649_s14 + $0xa0] sm:$0xff]  ;;  %v457_v13 = vld [vmem:[%s4649_s14 + $0x68] sm:$0xff] }
 0x1c6   : > { %2425 = vmatprep.subr.mxu1 %v1599_v14  ;;  %2355 = vmatpush2.msra.mxu0 %v1342_v15  ;;  %v720_v12 = vld [vmem:[%s4649_s14 + $0x8a0] sm:$0xff]  ;;  %v713_v14 = vld [vmem:[%s4649_s14 + $0x868] sm:$0xff] }
 0x1c7   : > { %2356 = vmatprep.mubr.f32.mxu0 %v4216_v18  ;;  %2426 = vmatpush2.msra.mxu1 %v1598_v16  ;;  %v456_v15 = vld [vmem:[%s4649_s14 + $0x60] sm:$0xff]  ;;  %v705_v18 = vld [vmem:[%s4649_s14 + $0x828] sm:$0xff] }
 0x1c8   : > { %2357 = vmatmul.mubr.f32.vlgmr.msra.gmra.mxu0 %v4217_v20  ;;  %2427 = vmatprep.mubr.f32.mxu1 %v4218_v23  ;;  %v712_v16 = vld [vmem:[%s4649_s14 + $0x860] sm:$0xff] }
 0x1c9   : > { %2434 = vmatprep.subr.mxu0 %v569_v17  ;;  %2505 = vmatprep.subr.mxu1 %v825_v19  ;;  %v449_v17 = vld [vmem:[%s4649_s14 + $0x28] sm:$0xff]  ;;  %v448_v19 = vld [vmem:[%s4649_s14 + $0x20] sm:$0xff] }
 0x1ca   : > { %2428 = vmatmul.mubr.f32.vlgmr.msra.gmra.mxu1 %v4219_v26  ;;  %2435 = vmatpush1.msra.mxu0 %v568_v21  ;;  %v704_v20 = vld [vmem:[%s4649_s14 + $0x820] sm:$0xff]  ;;  %v697_v21 = vld [vmem:[%s4649_s14 + $0x7e8] sm:$0xff] }
 0x1cb   : > { %2506 = vmatpush1.msra.mxu1 %v824_v22  ;;  %2436 = vmatprep.subr.mxu0 %v561_v24  ;;  %v953_v22 = vld [vmem:[%s4649_s14 + $0xfe8] sm:$0xff]  ;;  %v696_v23 = vld [vmem:[%s4649_s14 + $0x7e0] sm:$0xff] }
 0x1cc   : > { %2507 = vmatprep.subr.mxu1 %v817_v25  ;;  %2437 = vmatpush1.msra.mxu0 %v560_v27  ;;  %v952_v24 = vld [vmem:[%s4649_s14 + $0xfe0] sm:$0xff]  ;;  %v689_v25 = vld [vmem:[%s4649_s14 + $0x7a8] sm:$0xff] }
 0x1cd   : > { %2508 = vmatpush1.msra.mxu1 %v816_v28  ;;  %2438 = vmatprep.subr.mxu0 %v553_v29  ;;  %v945_v26 = vld [vmem:[%s4649_s14 + $0xfa8] sm:$0xff]  ;;  %v688_v27 = vld [vmem:[%s4649_s14 + $0x7a0] sm:$0xff] }
 0x1ce   : > { %2509 = vmatprep.subr.mxu1 %v809_v30  ;;  %2439 = vmatpush1.msra.mxu0 %v552_v31  ;;  %v944_v28 = vld [vmem:[%s4649_s14 + $0xfa0] sm:$0xff]  ;;  %v681_v29 = vld [vmem:[%s4649_s14 + $0x768] sm:$0xff] }
 0x1cf   : > { %2510 = vmatpush1.msra.mxu1 %v808_v32  ;;  %2440 = vmatprep.subr.mxu0 %v545_v33  ;;  %v937_v30 = vld [vmem:[%s4649_s14 + $0xf68] sm:$0xff]  ;;  %v680_v31 = vld [vmem:[%s4649_s14 + $0x760] sm:$0xff] }
 0x1d0   : > { %2511 = vmatprep.subr.mxu1 %v801_v34  ;;  %2441 = vmatpush1.msra.mxu0 %v544_v35  ;;  %v936_v32 = vld [vmem:[%s4649_s14 + $0xf60] sm:$0xff]  ;;  %v673_v33 = vld [vmem:[%s4649_s14 + $0x728] sm:$0xff] }
 0x1d1   : > { %2512 = vmatpush1.msra.mxu1 %v800_v36  ;;  %2442 = vmatprep.subr.mxu0 %v537_v37  ;;  %v929_v34 = vld [vmem:[%s4649_s14 + $0xf28] sm:$0xff]  ;;  %v672_v35 = vld [vmem:[%s4649_s14 + $0x720] sm:$0xff] }
 0x1d2   : > { %2513 = vmatprep.subr.mxu1 %v793_v38  ;;  %2443 = vmatpush1.msra.mxu0 %v536_v39  ;;  %v928_v36 = vld [vmem:[%s4649_s14 + $0xf20] sm:$0xff]  ;;  %v665_v37 = vld [vmem:[%s4649_s14 + $0x6e8] sm:$0xff] }
 0x1d3   : > { %2514 = vmatpush1.msra.mxu1 %v792_v40  ;;  %2444 = vmatprep.subr.mxu0 %v529_v41  ;;  %v921_v38 = vld [vmem:[%s4649_s14 + $0xee8] sm:$0xff]  ;;  %v664_v39 = vld [vmem:[%s4649_s14 + $0x6e0] sm:$0xff] }
 0x1d4   : > { %2515 = vmatprep.subr.mxu1 %v785_v42  ;;  %2445 = vmatpush1.msra.mxu0 %v528_v43  ;;  %v920_v40 = vld [vmem:[%s4649_s14 + $0xee0] sm:$0xff]  ;;  %v657_v41 = vld [vmem:[%s4649_s14 + $0x6a8] sm:$0xff] }
 0x1d5   : > { %2516 = vmatpush1.msra.mxu1 %v784_v44  ;;  %2446 = vmatprep.subr.mxu0 %v521_v45  ;;  %v913_v42 = vld [vmem:[%s4649_s14 + $0xea8] sm:$0xff]  ;;  %v656_v43 = vld [vmem:[%s4649_s14 + $0x6a0] sm:$0xff] }
 0x1d6   : > { %2517 = vmatprep.subr.mxu1 %v777_v46  ;;  %2447 = vmatpush1.msra.mxu0 %v520_v47  ;;  %v912_v44 = vld [vmem:[%s4649_s14 + $0xea0] sm:$0xff]  ;;  %v649_v45 = vld [vmem:[%s4649_s14 + $0x668] sm:$0xff]  ;;  %v1790_v47 = vpop.f32.mrf.mxu0 }
 0x1d7   : > { %2518 = vmatpush1.msra.mxu1 %v776_v48  ;;  %2448 = vmatprep.subr.mxu0 %v513_v49  ;;  %v905_v46 = vld [vmem:[%s4649_s14 + $0xe68] sm:$0xff]  ;;  %v648_v48 = vld [vmem:[%s4649_s14 + $0x660] sm:$0xff] }
 0x1d8   : > { %2519 = vmatprep.subr.mxu1 %v769_v50  ;;  %2449 = vmatpush1.msra.mxu0 %v512_v51  ;;  %v904_v49 = vld [vmem:[%s4649_s14 + $0xe60] sm:$0xff]  ;;  %v641_v50 = vld [vmem:[%s4649_s14 + $0x628] sm:$0xff] }
 0x1d9   : > { %2520 = vmatpush1.msra.mxu1 %v768_v52  ;;  %2450 = vmatprep.subr.mxu0 %v505_v53  ;;  %v897_v51 = vld [vmem:[%s4649_s14 + $0xe28] sm:$0xff]  ;;  %v640_v52 = vld [vmem:[%s4649_s14 + $0x620] sm:$0xff] }
 0x1da   : > { %2521 = vmatprep.subr.mxu1 %v761_v54  ;;  %2451 = vmatpush1.msra.mxu0 %v504_v55  ;;  %v896_v53 = vld [vmem:[%s4649_s14 + $0xe20] sm:$0xff]  ;;  %v633_v54 = vld [vmem:[%s4649_s14 + $0x5e8] sm:$0xff] }
 0x1db   : > { %2522 = vmatpush1.msra.mxu1 %v760_v56  ;;  %2452 = vmatprep.subr.mxu0 %v497_v57  ;;  %v889_v55 = vld [vmem:[%s4649_s14 + $0xde8] sm:$0xff]  ;;  %v1861_v56 = vpop.f32.mrf.mxu1  ;;  %v1792_v57 = vpop.f32.mrf.mxu0 }
 0x1dc   : > { %2523 = vmatprep.subr.mxu1 %v753_v58  ;;  %2453 = vmatpush1.msra.mxu0 %v496_v59  ;;  %v632_v58 = vld [vmem:[%s4649_s14 + $0x5e0] sm:$0xff] }
 0x1dd   : > { %2524 = vmatpush1.msra.mxu1 %v752_v60  ;;  %2454 = vmatprep.subr.mxu0 %v489_v61  ;;  %v888_v59 = vld [vmem:[%s4649_s14 + $0xde0] sm:$0xff]  ;;  %v625_v60 = vld [vmem:[%s4649_s14 + $0x5a8] sm:$0xff] }
 0x1de   : > { %2525 = vmatprep.subr.mxu1 %v745_v62  ;;  %2455 = vmatpush1.msra.mxu0 %v488_v63  ;;  %v881_v61 = vld [vmem:[%s4649_s14 + $0xda8] sm:$0xff]  ;;  %v1932_v62 = vpop.f32.mrf.mxu0  ;;  %v624_v63 = vld [vmem:[%s4649_s14 + $0x5a0] sm:$0xff] }
 0x1df   : > { %2526 = vmatpush1.msra.mxu1 %v744_v0  ;;  %2456 = vmatprep.subr.mxu0 %v481_v1  ;;  %v880_v0 = vld [vmem:[%s4649_s14 + $0xda0] sm:$0xff]  ;;  %v617_v1 = vld [vmem:[%s4649_s14 + $0x568] sm:$0xff] }
 0x1e0   : > { %2527 = vmatprep.subr.mxu1 %v737_v2  ;;  %2457 = vmatpush1.msra.mxu0 %v480_v3  ;;  %v873_v2 = vld [vmem:[%s4649_s14 + $0xd68] sm:$0xff]  ;;  %v1863_v3 = vpop.f32.mrf.mxu1 }
 0x1e1   : > { %2528 = vmatpush1.msra.mxu1 %v736_v4  ;;  %2458 = vmatprep.subr.mxu0 %v473_v5  ;;  %v616_v4 = vld [vmem:[%s4649_s14 + $0x560] sm:$0xff] }
 0x1e2   : > { %2529 = vmatprep.subr.mxu1 %v729_v6  ;;  %2459 = vmatpush1.msra.mxu0 %v472_v7  ;;  %v872_v5 = vld [vmem:[%s4649_s14 + $0xd60] sm:$0xff]  ;;  %v1862_v6 = vadd.f32 %v1861_v56, %v1790_v47  ;;  %v609_v7 = vld [vmem:[%s4649_s14 + $0x528] sm:$0xff] }
 0x1e3   : > { %2530 = vmatpush1.msra.mxu1 %v728_v8  ;;  %2460 = vmatprep.subr.mxu0 %v465_v9  ;;  %v865_v8 = vld [vmem:[%s4649_s14 + $0xd28] sm:$0xff]  ;;  %v2003_v9 = vpop.f32.mrf.mxu1  ;;  %v1080_v47 = vld [vmem:[%s4649_s14 + $0x13e0] sm:$0xff] }
 0x1e4   : > { %2531 = vmatprep.subr.mxu1 %v721_v10  ;;  %2461 = vmatpush1.msra.mxu0 %v464_v11  ;;  %v1934_v10 = vpop.f32.mrf.mxu0  ;;  %v608_v11 = vld [vmem:[%s4649_s14 + $0x520] sm:$0xff]  ;;  %v1321_v56 = vld [vmem:[%s4649_s14 + $0x1b68] sm:$0xff] }
 0x1e5   : > { %2532 = vmatpush1.msra.mxu1 %v720_v12  ;;  %2462 = vmatprep.subr.mxu0 %v457_v13  ;;  %v864_v12 = vld [vmem:[%s4649_s14 + $0xd20] sm:$0xff]  ;;  %v1864_v13 = vadd.f32 %v1863_v3, %v1792_v57  ;;  %v1041_v3 = vld [vmem:[%s4649_s14 + $0x12a8] sm:$0xff] }
 0x1e6   : > { %2533 = vmatprep.subr.mxu1 %v713_v14  ;;  %2463 = vmatpush1.msra.mxu0 %v456_v15  ;;  %v1933_v14 = vadd.f32 %v1932_v62, %v1862_v6  ;;  %v601_v15 = vld [vmem:[%s4649_s14 + $0x4e8] sm:$0xff]  ;;  %v1064_v57 = vld [vmem:[%s4649_s14 + $0x1360] sm:$0xff] }
 0x1e7   : > { %2534 = vmatpush1.msra.mxu1 %v712_v16  ;;  %2464 = vmatprep.subr.mxu0 %v449_v17  ;;  %v857_v16 = vld [vmem:[%s4649_s14 + $0xce8] sm:$0xff]  ;;  %v600_v17 = vld [vmem:[%s4649_s14 + $0x4e0] sm:$0xff] }
 0x1e8   : > { %2535 = vmatprep.subr.mxu1 %v705_v18  ;;  %2465 = vmatpush1.msra.mxu0 %v448_v19  ;;  %v856_v18 = vld [vmem:[%s4649_s14 + $0xce0] sm:$0xff]  ;;  %v1935_v19 = vadd.f32 %v1934_v10, %v1864_v13 }
 0x1e9   : > { %2536 = vmatpush1.msra.mxu1 %v704_v20  ;;  %2466 = vmatprep.subr.mxu0 %v697_v21  ;;  %v593_v20 = vld [vmem:[%s4649_s14 + $0x4a8] sm:$0xff]  ;;  %v1312_v62 = vld [vmem:[%s4649_s14 + $0x1b20] sm:$0xff] }
 0x1ea   : > { %2537 = vmatprep.subr.mxu1 %v953_v22  ;;  %2467 = vmatpush2.msra.mxu0 %v696_v23  ;;  %v849_v21 = vld [vmem:[%s4649_s14 + $0xca8] sm:$0xff]  ;;  %v2005_v22 = vpop.f32.mrf.mxu1  ;;  %v592_v23 = vld [vmem:[%s4649_s14 + $0x4a0] sm:$0xff] }
 0x1eb   : > { %2538 = vmatpush2.msra.mxu1 %v952_v24  ;;  %2468 = vmatprep.subr.mxu0 %v689_v25  ;;  %v848_v24 = vld [vmem:[%s4649_s14 + $0xca0] sm:$0xff]  ;;  %v2004_v25 = vadd.f32 %v2003_v9, %v1933_v14 }
 0x1ec   : > { %2539 = vmatprep.subr.mxu1 %v945_v26  ;;  %2469 = vmatpush2.msra.mxu0 %v688_v27  ;;  %v585_v26 = vld [vmem:[%s4649_s14 + $0x468] sm:$0xff]  ;;  %v1296_v6 = vld [vmem:[%s4649_s14 + $0x1aa0] sm:$0xff] }
 0x1ed   : > { %2540 = vmatpush2.msra.mxu1 %v944_v28  ;;  %2470 = vmatprep.subr.mxu0 %v681_v29  ;;  %v841_v27 = vld [vmem:[%s4649_s14 + $0xc68] sm:$0xff]  ;;  %v584_v28 = vld [vmem:[%s4649_s14 + $0x460] sm:$0xff] }
 0x1ee   : > { %2541 = vmatprep.subr.mxu1 %v937_v30  ;;  %2471 = vmatpush2.msra.mxu0 %v680_v31  ;;  %v840_v29 = vld [vmem:[%s4649_s14 + $0xc60] sm:$0xff]  ;;  %v426_v30 = vld [vmem:[#allocation2 + $0x30] sm:$0xff] }
 0x1ef   : > { %2542 = vmatpush2.msra.mxu1 %v936_v32  ;;  %2472 = vmatprep.subr.mxu0 %v673_v33  ;;  %v2006_v32 = vadd.f32 %v2005_v22, %v1935_v19  ;;  %v577_v33 = vld [vmem:[%s4649_s14 + $0x428] sm:$0xff]  ;;  %v1032_v9 = vld [vmem:[%s4649_s14 + $0x1260] sm:$0xff] }
 0x1f0   : > { %2543 = vmatprep.subr.mxu1 %v929_v34  ;;  %2473 = vmatpush2.msra.mxu0 %v672_v35  ;;  %v833_v34 = vld [vmem:[%s4649_s14 + $0xc28] sm:$0xff]  ;;  %v1288_v10 = vld [vmem:[%s4649_s14 + $0x1a60] sm:$0xff] }
 0x1f1   : > { %2544 = vmatpush2.msra.mxu1 %v928_v36  ;;  %2474 = vmatprep.subr.mxu0 %v665_v37  ;;  %v576_v36 = vld [vmem:[%s4649_s14 + $0x420] sm:$0xff]  ;;  %v1009_v19 = vld [vmem:[%s4649_s14 + $0x11a8] sm:$0xff] }
 0x1f2   : > { %2545 = vmatprep.subr.mxu1 %v921_v38  ;;  %2475 = vmatpush2.msra.mxu0 %v664_v39  ;;  %v427_v37 = vld [vmem:[#allocation2] sm:$0xff] }
 0x1f3   : > { %2546 = vmatpush2.msra.mxu1 %v920_v40  ;;  %2476 = vmatprep.subr.mxu0 %v657_v41  ;;  %v832_v39 = vld [vmem:[%s4649_s14 + $0xc20] sm:$0xff] }
 0x1f4   : > { %2547 = vmatprep.subr.mxu1 %v913_v42  ;;  %2477 = vmatpush2.msra.mxu0 %v656_v43  ;;  %v4220_v42 = vld [vmem:[%s4671_s10 + $0x8] sm:$0xff]  ;;  %v1024_v13 = vld [vmem:[%s4649_s14 + $0x1220] sm:$0xff] }
 0x1f5   : > { %2548 = vmatpush2.msra.mxu1 %v912_v44  ;;  %2478 = vmatprep.subr.mxu0 %v649_v45  ;;  %v1081_v43 = vld [vmem:[%s4649_s14 + $0x13e8] sm:$0xff]  ;;  %v1280_v14 = vld [vmem:[%s4649_s14 + $0x1a20] sm:$0xff] }
 0x1f6   : > { %2549 = vmatprep.subr.mxu1 %v905_v46  ;;  %2479 = vmatpush2.msra.mxu0 %v648_v48  ;;  %v1337_v44 = vld [vmem:[%s4649_s14 + $0x1be8] sm:$0xff]  ;;  %v4221_v46 = vld [vmem:[%s4671_s10 + $0x18] sm:$0xff]  ;;  %v1336_v48 = vld [vmem:[%s4649_s14 + $0x1be0] sm:$0xff] }
 0x1f7   : > { %2550 = vmatpush2.msra.mxu1 %v904_v49  ;;  %2480 = vmatprep.subr.mxu0 %v641_v50  ;;  %v4222_v49 = vld [vmem:[%s4671_s10] sm:$0xff]  ;;  %v4223_v50 = vld [vmem:[%s4671_s10 + $0x10] sm:$0xff] }
 0x1f8   : > { %2551 = vmatprep.subr.mxu1 %v897_v51  ;;  %2481 = vmatpush2.msra.mxu0 %v640_v52  ;;  %v1073_v51 = vld [vmem:[%s4649_s14 + $0x13a8] sm:$0xff]  ;;  %v1264_v22 = vld [vmem:[%s4649_s14 + $0x19a0] sm:$0xff] }
 0x1f9   : > { %2552 = vmatpush2.msra.mxu1 %v896_v53  ;;  %2482 = vmatprep.subr.mxu0 %v633_v54  ;;  %v1329_v52 = vld [vmem:[%s4649_s14 + $0x1ba8] sm:$0xff]  ;;  %v1072_v53 = vld [vmem:[%s4649_s14 + $0x13a0] sm:$0xff] }
 0x1fa   : > { %2553 = vmatprep.subr.mxu1 %v889_v55  ;;  %2483 = vmatpush2.msra.mxu0 %v632_v58  ;;  %v1328_v54 = vld [vmem:[%s4649_s14 + $0x1ba0] sm:$0xff]  ;;  %v1065_v55 = vld [vmem:[%s4649_s14 + $0x1368] sm:$0xff] }
 0x1fb   : > { %2554 = vmatpush2.msra.mxu1 %v888_v59  ;;  %2484 = vmatprep.subr.mxu0 %v625_v60  ;;  %v1320_v58 = vld [vmem:[%s4649_s14 + $0x1b60] sm:$0xff]  ;;  %v1057_v59 = vld [vmem:[%s4649_s14 + $0x1328] sm:$0xff] }
 0x1fc   : > { %2555 = vmatprep.subr.mxu1 %v881_v61  ;;  %2485 = vmatpush2.msra.mxu0 %v624_v63  ;;  %v1313_v60 = vld [vmem:[%s4649_s14 + $0x1b28] sm:$0xff]  ;;  %v1056_v61 = vld [vmem:[%s4649_s14 + $0x1320] sm:$0xff] }
 0x1fd   : > { %2556 = vmatpush2.msra.mxu1 %v880_v0  ;;  %2486 = vmatprep.subr.mxu0 %v617_v1  ;;  %v1049_v63 = vld [vmem:[%s4649_s14 + $0x12e8] sm:$0xff]  ;;  %v1048_v1 = vld [vmem:[%s4649_s14 + $0x12e0] sm:$0xff] }
 0x1fe   : > { %2557 = vmatprep.subr.mxu1 %v873_v2  ;;  %2487 = vmatpush2.msra.mxu0 %v616_v4  ;;  %v1305_v0 = vld [vmem:[%s4649_s14 + $0x1ae8] sm:$0xff]  ;;  %v1304_v2 = vld [vmem:[%s4649_s14 + $0x1ae0] sm:$0xff] }
 0x1ff   : > { %2558 = vmatpush2.msra.mxu1 %v872_v5  ;;  %2488 = vmatprep.subr.mxu0 %v609_v7  ;;  %v1297_v4 = vld [vmem:[%s4649_s14 + $0x1aa8] sm:$0xff]  ;;  %v1040_v5 = vld [vmem:[%s4649_s14 + $0x12a0] sm:$0xff] }
 0x200   : > { %2559 = vmatprep.subr.mxu1 %v865_v8  ;;  %2489 = vmatpush2.msra.mxu0 %v608_v11  ;;  %v1033_v7 = vld [vmem:[%s4649_s14 + $0x1268] sm:$0xff] }
 0x201   : > { %2560 = vmatpush2.msra.mxu1 %v864_v12  ;;  %2490 = vmatprep.subr.mxu0 %v601_v15  ;;  %v1289_v8 = vld [vmem:[%s4649_s14 + $0x1a68] sm:$0xff] }
 0x202   : > { %2561 = vmatprep.subr.mxu1 %v857_v16  ;;  %2491 = vmatpush2.msra.mxu0 %v600_v17  ;;  %v1025_v11 = vld [vmem:[%s4649_s14 + $0x1228] sm:$0xff]  ;;  %v1016_v17 = vld [vmem:[%s4649_s14 + $0x11e0] sm:$0xff] }
 0x203   : > { %2562 = vmatpush2.msra.mxu1 %v856_v18  ;;  %2492 = vmatprep.subr.mxu0 %v593_v20  ;;  %v1281_v12 = vld [vmem:[%s4649_s14 + $0x1a28] sm:$0xff]  ;;  %v1272_v18 = vld [vmem:[%s4649_s14 + $0x19e0] sm:$0xff] }
 0x204   : > { %2563 = vmatprep.subr.mxu1 %v849_v21  ;;  %v2074_v31 = vpop.f32.mrf.mxu0  ;;  %2493 = vmatpush2.msra.mxu0 %v592_v23  ;;  %v1017_v15 = vld [vmem:[%s4649_s14 + $0x11e8] sm:$0xff]  ;;  %v1008_v21 = vld [vmem:[%s4649_s14 + $0x11a0] sm:$0xff] }
 0x205   : > { %2564 = vmatpush2.msra.mxu1 %v848_v24  ;;  %v2075_v35 = vadd.f32 %v2074_v31, %v2004_v25  ;;  %2494 = vmatprep.subr.mxu0 %v585_v26  ;;  %v1273_v16 = vld [vmem:[%s4649_s14 + $0x19e8] sm:$0xff]  ;;  %v1000_v25 = vld [vmem:[%s4649_s14 + $0x1160] sm:$0xff] }
 0x206   : > { %2565 = vmatprep.subr.mxu1 %v841_v27  ;;  %v2076_v38 = vpop.f32.mrf.mxu0  ;;  %2495 = vmatpush2.msra.mxu0 %v584_v28  ;;  %v1265_v20 = vld [vmem:[%s4649_s14 + $0x19a8] sm:$0xff]  ;;  %v1256_v26 = vld [vmem:[%s4649_s14 + $0x1960] sm:$0xff] }
 0x207   : > { %2566 = vmatpush2.msra.mxu1 %v840_v29  ;;  %v3144_v40 = vadd.f32 %v2075_v35, %v426_v30  ;;  %v2077_v41 = vadd.f32 %v2076_v38, %v2006_v32  ;;  %2496 = vmatprep.subr.mxu0 %v577_v33  ;;  %v1001_v23 = vld [vmem:[%s4649_s14 + $0x1168] sm:$0xff]  ;;  %v992_v29 = vld [vmem:[%s4649_s14 + $0x1120] sm:$0xff] }
 0x208   : > { %2567 = vmatprep.subr.mxu1 %v833_v34  ;;  %2497 = vmatpush2.msra.mxu0 %v576_v36  ;;  %v1257_v24 = vld [vmem:[%s4649_s14 + $0x1968] sm:$0xff]  ;;  %v1248_v30 = vld [vmem:[%s4649_s14 + $0x1920] sm:$0xff] }
 0x209   : > { %2498 = vmatprep.mubr.f32.mxu0 %v4220_v42  ;;  %3152 = vst [vmem:[#allocation2 + $0x30] sm:$0xff] %v3144_v40  ;;  %v3145_v45 = vadd.f32 %v2077_v41, %v427_v37  ;;  %2568 = vmatpush2.msra.mxu1 %v832_v39  ;;  %v993_v27 = vld [vmem:[%s4649_s14 + $0x1128] sm:$0xff]  ;;  %v984_v33 = vld [vmem:[%s4649_s14 + $0x10e0] sm:$0xff] }
 0x20a   : > { %2569 = vmatprep.mubr.f32.mxu1 %v4221_v46  ;;  %2499 = vmatmul.mubr.f32.vlgmr.msra.gmra.mxu0 %v4222_v49  ;;  %v1249_v28 = vld [vmem:[%s4649_s14 + $0x1928] sm:$0xff]  ;;  %v1240_v34 = vld [vmem:[%s4649_s14 + $0x18e0] sm:$0xff] }
 0x20b   : > { %2570 = vmatmul.mubr.f32.vlgmr.msra.gmra.mxu1 %v4223_v50  ;;  %3153 = vst [vmem:[#allocation2] sm:$0xff] %v3145_v45  ;;  %2576 = vmatprep.subr.mxu0 %v1081_v43  ;;  %v985_v31 = vld [vmem:[%s4649_s14 + $0x10e8] sm:$0xff]  ;;  %v976_v37 = vld [vmem:[%s4649_s14 + $0x10a0] sm:$0xff] }
 0x20c   : > { %2647 = vmatprep.subr.mxu1 %v1337_v44  ;;  %2577 = vmatpush1.msra.mxu0 %v1080_v47  ;;  %v1241_v32 = vld [vmem:[%s4649_s14 + $0x18e8] sm:$0xff]  ;;  %v1232_v38 = vld [vmem:[%s4649_s14 + $0x18a0] sm:$0xff] }
 0x20d   : > { %2648 = vmatpush1.msra.mxu1 %v1336_v48  ;;  %2578 = vmatprep.subr.mxu0 %v1073_v51  ;;  %v977_v35 = vld [vmem:[%s4649_s14 + $0x10a8] sm:$0xff]  ;;  %v968_v41 = vld [vmem:[%s4649_s14 + $0x1060] sm:$0xff] }
 0x20e   : > { %2649 = vmatprep.subr.mxu1 %v1329_v52  ;;  %2579 = vmatpush1.msra.mxu0 %v1072_v53  ;;  %v1233_v36 = vld [vmem:[%s4649_s14 + $0x18a8] sm:$0xff]  ;;  %v1224_v42 = vld [vmem:[%s4649_s14 + $0x1860] sm:$0xff] }
 0x20f   : > { %2650 = vmatpush1.msra.mxu1 %v1328_v54  ;;  %2580 = vmatprep.subr.mxu0 %v1065_v55  ;;  %v969_v39 = vld [vmem:[%s4649_s14 + $0x1068] sm:$0xff]  ;;  %v960_v45 = vld [vmem:[%s4649_s14 + $0x1020] sm:$0xff] }
 0x210   : > { %2651 = vmatprep.subr.mxu1 %v1321_v56  ;;  %2581 = vmatpush1.msra.mxu0 %v1064_v57  ;;  %v1225_v40 = vld [vmem:[%s4649_s14 + $0x1868] sm:$0xff]  ;;  %v1216_v46 = vld [vmem:[%s4649_s14 + $0x1820] sm:$0xff] }
 0x211   : > { %2652 = vmatpush1.msra.mxu1 %v1320_v58  ;;  %2582 = vmatprep.subr.mxu0 %v1057_v59  ;;  %v961_v43 = vld [vmem:[%s4649_s14 + $0x1028] sm:$0xff]  ;;  %v1208_v49 = vld [vmem:[%s4649_s14 + $0x17e0] sm:$0xff] }
 0x212   : > { %2653 = vmatprep.subr.mxu1 %v1313_v60  ;;  %2583 = vmatpush1.msra.mxu0 %v1056_v61  ;;  %v1217_v44 = vld [vmem:[%s4649_s14 + $0x1828] sm:$0xff]  ;;  %v1464_v50 = vld [vmem:[%s4649_s14 + $0x1fe0] sm:$0xff] }
 0x213   : > { %2654 = vmatpush1.msra.mxu1 %v1312_v62  ;;  %2584 = vmatprep.subr.mxu0 %v1049_v63  ;;  %v1209_v47 = vld [vmem:[%s4649_s14 + $0x17e8] sm:$0xff]  ;;  %v1200_v53 = vld [vmem:[%s4649_s14 + $0x17a0] sm:$0xff] }
 0x214   : > { %2655 = vmatprep.subr.mxu1 %v1305_v0  ;;  %2585 = vmatpush1.msra.mxu0 %v1048_v1  ;;  %v1465_v48 = vld [vmem:[%s4649_s14 + $0x1fe8] sm:$0xff]  ;;  %v1456_v54 = vld [vmem:[%s4649_s14 + $0x1fa0] sm:$0xff] }
 0x215   : > { %2656 = vmatpush1.msra.mxu1 %v1304_v2  ;;  %2586 = vmatprep.subr.mxu0 %v1041_v3  ;;  %v1201_v51 = vld [vmem:[%s4649_s14 + $0x17a8] sm:$0xff]  ;;  %v1192_v57 = vld [vmem:[%s4649_s14 + $0x1760] sm:$0xff] }
 0x216   : > { %2657 = vmatprep.subr.mxu1 %v1297_v4  ;;  %2587 = vmatpush1.msra.mxu0 %v1040_v5  ;;  %v1457_v52 = vld [vmem:[%s4649_s14 + $0x1fa8] sm:$0xff]  ;;  %v1448_v58 = vld [vmem:[%s4649_s14 + $0x1f60] sm:$0xff] }
 0x217   : > { %2658 = vmatpush1.msra.mxu1 %v1296_v6  ;;  %2588 = vmatprep.subr.mxu0 %v1033_v7  ;;  %v1193_v55 = vld [vmem:[%s4649_s14 + $0x1768] sm:$0xff]  ;;  %v1184_v61 = vld [vmem:[%s4649_s14 + $0x1720] sm:$0xff] }
 0x218   : > { %2659 = vmatprep.subr.mxu1 %v1289_v8  ;;  %2589 = vmatpush1.msra.mxu0 %v1032_v9  ;;  %v1449_v56 = vld [vmem:[%s4649_s14 + $0x1f68] sm:$0xff]  ;;  %v1440_v62 = vld [vmem:[%s4649_s14 + $0x1f20] sm:$0xff] }
 0x219   : > { %2660 = vmatpush1.msra.mxu1 %v1288_v10  ;;  %2590 = vmatprep.subr.mxu0 %v1025_v11  ;;  %v1185_v59 = vld [vmem:[%s4649_s14 + $0x1728] sm:$0xff]  ;;  %v1176_v1 = vld [vmem:[%s4649_s14 + $0x16e0] sm:$0xff] }
 0x21a   : > { %2661 = vmatprep.subr.mxu1 %v1281_v12  ;;  %2591 = vmatpush1.msra.mxu0 %v1024_v13  ;;  %v1441_v60 = vld [vmem:[%s4649_s14 + $0x1f28] sm:$0xff]  ;;  %v1432_v2 = vld [vmem:[%s4649_s14 + $0x1ee0] sm:$0xff] }
 0x21b   : > { %2662 = vmatpush1.msra.mxu1 %v1280_v14  ;;  %2592 = vmatprep.subr.mxu0 %v1017_v15  ;;  %v1177_v63 = vld [vmem:[%s4649_s14 + $0x16e8] sm:$0xff]  ;;  %v1168_v5 = vld [vmem:[%s4649_s14 + $0x16a0] sm:$0xff] }
 0x21c   : > { %2663 = vmatprep.subr.mxu1 %v1273_v16  ;;  %2593 = vmatpush1.msra.mxu0 %v1016_v17  ;;  %v1433_v0 = vld [vmem:[%s4649_s14 + $0x1ee8] sm:$0xff]  ;;  %v1424_v6 = vld [vmem:[%s4649_s14 + $0x1ea0] sm:$0xff] }
 0x21d   : > { %2664 = vmatpush1.msra.mxu1 %v1272_v18  ;;  %2594 = vmatprep.subr.mxu0 %v1009_v19  ;;  %v1169_v3 = vld [vmem:[%s4649_s14 + $0x16a8] sm:$0xff]  ;;  %v1160_v9 = vld [vmem:[%s4649_s14 + $0x1660] sm:$0xff] }
 0x21e   : > { %2665 = vmatprep.subr.mxu1 %v1265_v20  ;;  %2595 = vmatpush1.msra.mxu0 %v1008_v21  ;;  %v1425_v4 = vld [vmem:[%s4649_s14 + $0x1ea8] sm:$0xff]  ;;  %v1416_v10 = vld [vmem:[%s4649_s14 + $0x1e60] sm:$0xff] }
 0x21f   : > { %2666 = vmatpush1.msra.mxu1 %v1264_v22  ;;  %2596 = vmatprep.subr.mxu0 %v1001_v23  ;;  %v1161_v7 = vld [vmem:[%s4649_s14 + $0x1668] sm:$0xff]  ;;  %v1152_v13 = vld [vmem:[%s4649_s14 + $0x1620] sm:$0xff] }
 0x220   : > { %2667 = vmatprep.subr.mxu1 %v1257_v24  ;;  %2597 = vmatpush1.msra.mxu0 %v1000_v25  ;;  %v1417_v8 = vld [vmem:[%s4649_s14 + $0x1e68] sm:$0xff]  ;;  %v1408_v14 = vld [vmem:[%s4649_s14 + $0x1e20] sm:$0xff] }
 0x221   : > { %2668 = vmatpush1.msra.mxu1 %v1256_v26  ;;  %2598 = vmatprep.subr.mxu0 %v993_v27  ;;  %v1153_v11 = vld [vmem:[%s4649_s14 + $0x1628] sm:$0xff]  ;;  %v1144_v17 = vld [vmem:[%s4649_s14 + $0x15e0] sm:$0xff] }
 0x222   : > { %2669 = vmatprep.subr.mxu1 %v1249_v28  ;;  %2599 = vmatpush1.msra.mxu0 %v992_v29  ;;  %v1409_v12 = vld [vmem:[%s4649_s14 + $0x1e28] sm:$0xff]  ;;  %v1400_v18 = vld [vmem:[%s4649_s14 + $0x1de0] sm:$0xff] }
 0x223   : > { %2670 = vmatpush1.msra.mxu1 %v1248_v30  ;;  %2600 = vmatprep.subr.mxu0 %v985_v31  ;;  %v1145_v15 = vld [vmem:[%s4649_s14 + $0x15e8] sm:$0xff]  ;;  %v1136_v21 = vld [vmem:[%s4649_s14 + $0x15a0] sm:$0xff] }
 0x224   : > { %2671 = vmatprep.subr.mxu1 %v1241_v32  ;;  %2601 = vmatpush1.msra.mxu0 %v984_v33  ;;  %v1401_v16 = vld [vmem:[%s4649_s14 + $0x1de8] sm:$0xff]  ;;  %v1392_v22 = vld [vmem:[%s4649_s14 + $0x1da0] sm:$0xff] }
 0x225   : > { %2672 = vmatpush1.msra.mxu1 %v1240_v34  ;;  %2602 = vmatprep.subr.mxu0 %v977_v35  ;;  %v1137_v19 = vld [vmem:[%s4649_s14 + $0x15a8] sm:$0xff]  ;;  %v1128_v25 = vld [vmem:[%s4649_s14 + $0x1560] sm:$0xff] }
 0x226   : > { %2673 = vmatprep.subr.mxu1 %v1233_v36  ;;  %2603 = vmatpush1.msra.mxu0 %v976_v37  ;;  %v1393_v20 = vld [vmem:[%s4649_s14 + $0x1da8] sm:$0xff]  ;;  %v1384_v26 = vld [vmem:[%s4649_s14 + $0x1d60] sm:$0xff] }
 0x227   : > { %2674 = vmatpush1.msra.mxu1 %v1232_v38  ;;  %2604 = vmatprep.subr.mxu0 %v969_v39  ;;  %v1129_v23 = vld [vmem:[%s4649_s14 + $0x1568] sm:$0xff]  ;;  %v1120_v29 = vld [vmem:[%s4649_s14 + $0x1520] sm:$0xff] }
 0x228   : > { %2675 = vmatprep.subr.mxu1 %v1225_v40  ;;  %2605 = vmatpush1.msra.mxu0 %v968_v41  ;;  %v1385_v24 = vld [vmem:[%s4649_s14 + $0x1d68] sm:$0xff]  ;;  %v1376_v30 = vld [vmem:[%s4649_s14 + $0x1d20] sm:$0xff] }
 0x229   : > { %2676 = vmatpush1.msra.mxu1 %v1224_v42  ;;  %2606 = vmatprep.subr.mxu0 %v961_v43  ;;  %v1121_v27 = vld [vmem:[%s4649_s14 + $0x1528] sm:$0xff]  ;;  %v1112_v33 = vld [vmem:[%s4649_s14 + $0x14e0] sm:$0xff] }
 0x22a   : > { %2677 = vmatprep.subr.mxu1 %v1217_v44  ;;  %2607 = vmatpush1.msra.mxu0 %v960_v45  ;;  %v1377_v28 = vld [vmem:[%s4649_s14 + $0x1d28] sm:$0xff]  ;;  %v1368_v34 = vld [vmem:[%s4649_s14 + $0x1ce0] sm:$0xff] }
 0x22b   : > { %2678 = vmatpush1.msra.mxu1 %v1216_v46  ;;  %2608 = vmatprep.subr.mxu0 %v1209_v47  ;;  %v1113_v31 = vld [vmem:[%s4649_s14 + $0x14e8] sm:$0xff]  ;;  %v1104_v37 = vld [vmem:[%s4649_s14 + $0x14a0] sm:$0xff] }
 0x22c   : > { %2679 = vmatprep.subr.mxu1 %v1465_v48  ;;  %2609 = vmatpush2.msra.mxu0 %v1208_v49  ;;  %v1369_v32 = vld [vmem:[%s4649_s14 + $0x1ce8] sm:$0xff]  ;;  %v1360_v38 = vld [vmem:[%s4649_s14 + $0x1ca0] sm:$0xff]  ;;  %v571_v49 = vld [vmem:[%s4649_s14 + $0x3f8] sm:$0xff] }
 0x22d   : > { %2680 = vmatpush2.msra.mxu1 %v1464_v50  ;;  %2610 = vmatprep.subr.mxu0 %v1201_v51  ;;  %v1105_v35 = vld [vmem:[%s4649_s14 + $0x14a8] sm:$0xff]  ;;  %v1096_v41 = vld [vmem:[%s4649_s14 + $0x1460] sm:$0xff] }
 0x22e   : > { %2681 = vmatprep.subr.mxu1 %v1457_v52  ;;  %2611 = vmatpush2.msra.mxu0 %v1200_v53  ;;  %v1361_v36 = vld [vmem:[%s4649_s14 + $0x1ca8] sm:$0xff]  ;;  %v1352_v42 = vld [vmem:[%s4649_s14 + $0x1c60] sm:$0xff]  ;;  %v570_v52 = vld [vmem:[%s4649_s14 + $0x3f0] sm:$0xff] }
 0x22f   : > { %2682 = vmatpush2.msra.mxu1 %v1456_v54  ;;  %2612 = vmatprep.subr.mxu0 %v1193_v55  ;;  %v1097_v39 = vld [vmem:[%s4649_s14 + $0x1468] sm:$0xff]  ;;  %v1088_v45 = vld [vmem:[%s4649_s14 + $0x1420] sm:$0xff]  ;;  %v4226_v53 = vld [vmem:[%s4671_s10 + $0x38] sm:$0xff] }
 0x230   : > { %2683 = vmatprep.subr.mxu1 %v1449_v56  ;;  %2613 = vmatpush2.msra.mxu0 %v1192_v57  ;;  %v1353_v40 = vld [vmem:[%s4649_s14 + $0x1c68] sm:$0xff]  ;;  %v1344_v46 = vld [vmem:[%s4649_s14 + $0x1c20] sm:$0xff]  ;;  %v563_v55 = vld [vmem:[%s4649_s14 + $0x3b8] sm:$0xff] }
 0x231   : > { %2684 = vmatpush2.msra.mxu1 %v1448_v58  ;;  %2614 = vmatprep.subr.mxu0 %v1185_v59  ;;  %v1089_v43 = vld [vmem:[%s4649_s14 + $0x1428] sm:$0xff]  ;;  %v4225_v50 = vld [vmem:[%s4671_s10 + $0x20] sm:$0xff]  ;;  %v4227_v56 = vld [vmem:[%s4671_s10 + $0x30] sm:$0xff] }
 0x232   : > { %2685 = vmatprep.subr.mxu1 %v1441_v60  ;;  %2615 = vmatpush2.msra.mxu0 %v1184_v61  ;;  %v1345_v44 = vld [vmem:[%s4649_s14 + $0x1c28] sm:$0xff]  ;;  %v1592_v51 = vld [vmem:[%s4649_s14 + $0x23e0] sm:$0xff]  ;;  %v562_v58 = vld [vmem:[%s4649_s14 + $0x3b0] sm:$0xff] }
 0x233   : > { %2686 = vmatpush2.msra.mxu1 %v1440_v62  ;;  %2616 = vmatprep.subr.mxu0 %v1177_v63  ;;  %v1593_v47 = vld [vmem:[%s4649_s14 + $0x23e8] sm:$0xff]  ;;  %v1584_v57 = vld [vmem:[%s4649_s14 + $0x23a0] sm:$0xff]  ;;  %v555_v60 = vld [vmem:[%s4649_s14 + $0x378] sm:$0xff] }
 0x234   : > { %2687 = vmatprep.subr.mxu1 %v1433_v0  ;;  %2617 = vmatpush2.msra.mxu0 %v1176_v1  ;;  %v4224_v48 = vld [vmem:[%s4671_s10 + $0x28] sm:$0xff]  ;;  %v1576_v61 = vld [vmem:[%s4649_s14 + $0x2360] sm:$0xff]  ;;  %v554_v62 = vld [vmem:[%s4649_s14 + $0x370] sm:$0xff] }
 0x235   : > { %2688 = vmatpush2.msra.mxu1 %v1432_v2  ;;  %2618 = vmatprep.subr.mxu0 %v1169_v3  ;;  %v1585_v54 = vld [vmem:[%s4649_s14 + $0x23a8] sm:$0xff]  ;;  %v547_v0 = vld [vmem:[%s4649_s14 + $0x338] sm:$0xff]  ;;  %v1568_v1 = vld [vmem:[%s4649_s14 + $0x2320] sm:$0xff] }
 0x236   : > { %2689 = vmatprep.subr.mxu1 %v1425_v4  ;;  %2619 = vmatpush2.msra.mxu0 %v1168_v5  ;;  %v1577_v59 = vld [vmem:[%s4649_s14 + $0x2368] sm:$0xff]  ;;  %v546_v2 = vld [vmem:[%s4649_s14 + $0x330] sm:$0xff]  ;;  %v539_v4 = vld [vmem:[%s4649_s14 + $0x2f8] sm:$0xff] }
 0x237   : > { %2690 = vmatpush2.msra.mxu1 %v1424_v6  ;;  %2620 = vmatprep.subr.mxu0 %v1161_v7  ;;  %v1569_v63 = vld [vmem:[%s4649_s14 + $0x2328] sm:$0xff]  ;;  %v1560_v5 = vld [vmem:[%s4649_s14 + $0x22e0] sm:$0xff]  ;;  %v538_v6 = vld [vmem:[%s4649_s14 + $0x2f0] sm:$0xff] }
 0x238   : > { %2691 = vmatprep.subr.mxu1 %v1417_v8  ;;  %2621 = vmatpush2.msra.mxu0 %v1160_v9  ;;  %v1561_v3 = vld [vmem:[%s4649_s14 + $0x22e8] sm:$0xff]  ;;  %v531_v8 = vld [vmem:[%s4649_s14 + $0x2b8] sm:$0xff]  ;;  %v1552_v9 = vld [vmem:[%s4649_s14 + $0x22a0] sm:$0xff] }
 0x239   : > { %2692 = vmatpush2.msra.mxu1 %v1416_v10  ;;  %2622 = vmatprep.subr.mxu0 %v1153_v11  ;;  %v1553_v7 = vld [vmem:[%s4649_s14 + $0x22a8] sm:$0xff]  ;;  %v530_v10 = vld [vmem:[%s4649_s14 + $0x2b0] sm:$0xff] }
 0x23a   : > { %2693 = vmatprep.subr.mxu1 %v1409_v12  ;;  %2623 = vmatpush2.msra.mxu0 %v1152_v13  ;;  %v1545_v11 = vld [vmem:[%s4649_s14 + $0x2268] sm:$0xff]  ;;  %v523_v12 = vld [vmem:[%s4649_s14 + $0x278] sm:$0xff]  ;;  %v1544_v13 = vld [vmem:[%s4649_s14 + $0x2260] sm:$0xff] }
 0x23b   : > { %2694 = vmatpush2.msra.mxu1 %v1408_v14  ;;  %2624 = vmatprep.subr.mxu0 %v1145_v15  ;;  %v522_v14 = vld [vmem:[%s4649_s14 + $0x270] sm:$0xff]  ;;  %v1537_v15 = vld [vmem:[%s4649_s14 + $0x2228] sm:$0xff] }
 0x23c   : > { %2695 = vmatprep.subr.mxu1 %v1401_v16  ;;  %2625 = vmatpush2.msra.mxu0 %v1144_v17  ;;  %v515_v16 = vld [vmem:[%s4649_s14 + $0x238] sm:$0xff]  ;;  %v1536_v17 = vld [vmem:[%s4649_s14 + $0x2220] sm:$0xff] }
 0x23d   : > { %2696 = vmatpush2.msra.mxu1 %v1400_v18  ;;  %2626 = vmatprep.subr.mxu0 %v1137_v19  ;;  %v514_v18 = vld [vmem:[%s4649_s14 + $0x230] sm:$0xff]  ;;  %v1529_v19 = vld [vmem:[%s4649_s14 + $0x21e8] sm:$0xff] }
 0x23e   : > { %2697 = vmatprep.subr.mxu1 %v1393_v20  ;;  %2627 = vmatpush2.msra.mxu0 %v1136_v21  ;;  %v507_v20 = vld [vmem:[%s4649_s14 + $0x1f8] sm:$0xff]  ;;  %v1528_v21 = vld [vmem:[%s4649_s14 + $0x21e0] sm:$0xff] }
 0x23f   : > { %2698 = vmatpush2.msra.mxu1 %v1392_v22  ;;  %2628 = vmatprep.subr.mxu0 %v1129_v23  ;;  %v506_v22 = vld [vmem:[%s4649_s14 + $0x1f0] sm:$0xff]  ;;  %v1521_v23 = vld [vmem:[%s4649_s14 + $0x21a8] sm:$0xff] }
 0x240   : > { %2699 = vmatprep.subr.mxu1 %v1385_v24  ;;  %2629 = vmatpush2.msra.mxu0 %v1128_v25  ;;  %v499_v24 = vld [vmem:[%s4649_s14 + $0x1b8] sm:$0xff]  ;;  %v1520_v25 = vld [vmem:[%s4649_s14 + $0x21a0] sm:$0xff] }
 0x241   : > { %2700 = vmatpush2.msra.mxu1 %v1384_v26  ;;  %2630 = vmatprep.subr.mxu0 %v1121_v27  ;;  %v498_v26 = vld [vmem:[%s4649_s14 + $0x1b0] sm:$0xff]  ;;  %v1513_v27 = vld [vmem:[%s4649_s14 + $0x2168] sm:$0xff] }
 0x242   : > { %2701 = vmatprep.subr.mxu1 %v1377_v28  ;;  %2631 = vmatpush2.msra.mxu0 %v1120_v29  ;;  %v491_v28 = vld [vmem:[%s4649_s14 + $0x178] sm:$0xff]  ;;  %v1512_v29 = vld [vmem:[%s4649_s14 + $0x2160] sm:$0xff] }
 0x243   : > { %2702 = vmatpush2.msra.mxu1 %v1376_v30  ;;  %2632 = vmatprep.subr.mxu0 %v1113_v31  ;;  %v490_v30 = vld [vmem:[%s4649_s14 + $0x170] sm:$0xff]  ;;  %v1505_v31 = vld [vmem:[%s4649_s14 + $0x2128] sm:$0xff] }
 0x244   : > { %2703 = vmatprep.subr.mxu1 %v1369_v32  ;;  %2633 = vmatpush2.msra.mxu0 %v1112_v33  ;;  %v483_v32 = vld [vmem:[%s4649_s14 + $0x138] sm:$0xff]  ;;  %v1504_v33 = vld [vmem:[%s4649_s14 + $0x2120] sm:$0xff] }
 0x245   : > { %2704 = vmatpush2.msra.mxu1 %v1368_v34  ;;  %2634 = vmatprep.subr.mxu0 %v1105_v35  ;;  %v482_v34 = vld [vmem:[%s4649_s14 + $0x130] sm:$0xff]  ;;  %v1497_v35 = vld [vmem:[%s4649_s14 + $0x20e8] sm:$0xff] }
 0x246   : > { %2705 = vmatprep.subr.mxu1 %v1361_v36  ;;  %2635 = vmatpush2.msra.mxu0 %v1104_v37  ;;  %v475_v36 = vld [vmem:[%s4649_s14 + $0xf8] sm:$0xff]  ;;  %v1496_v37 = vld [vmem:[%s4649_s14 + $0x20e0] sm:$0xff] }
 0x247   : > { %2706 = vmatpush2.msra.mxu1 %v1360_v38  ;;  %2636 = vmatprep.subr.mxu0 %v1097_v39  ;;  %v474_v38 = vld [vmem:[%s4649_s14 + $0xf0] sm:$0xff]  ;;  %v1489_v39 = vld [vmem:[%s4649_s14 + $0x20a8] sm:$0xff] }
 0x248   : > { %2707 = vmatprep.subr.mxu1 %v1353_v40  ;;  %2637 = vmatpush2.msra.mxu0 %v1096_v41  ;;  %v467_v40 = vld [vmem:[%s4649_s14 + $0xb8] sm:$0xff]  ;;  %v1488_v41 = vld [vmem:[%s4649_s14 + $0x20a0] sm:$0xff] }
 0x249   : > { %2708 = vmatpush2.msra.mxu1 %v1352_v42  ;;  %2638 = vmatprep.subr.mxu0 %v1089_v43  ;;  %v466_v42 = vld [vmem:[%s4649_s14 + $0xb0] sm:$0xff]  ;;  %v1481_v43 = vld [vmem:[%s4649_s14 + $0x2068] sm:$0xff] }
 0x24a   : > { %2709 = vmatprep.subr.mxu1 %v1345_v44  ;;  %2639 = vmatpush2.msra.mxu0 %v1088_v45  ;;  %v459_v44 = vld [vmem:[%s4649_s14 + $0x78] sm:$0xff]  ;;  %v1480_v45 = vld [vmem:[%s4649_s14 + $0x2060] sm:$0xff] }
 0x24b   : > { %2640 = vmatprep.mubr.f32.mxu0 %v4224_v48  ;;  %2710 = vmatpush2.msra.mxu1 %v1344_v46  ;;  %v458_v46 = vld [vmem:[%s4649_s14 + $0x70] sm:$0xff]  ;;  %v451_v48 = vld [vmem:[%s4649_s14 + $0x38] sm:$0xff] }
 0x24c   : > { %2641 = vmatmul.mubr.f32.vlgmr.msra.gmra.mxu0 %v4225_v50  ;;  %2711 = vmatprep.mubr.f32.mxu1 %v4226_v53  ;;  %v450_v50 = vld [vmem:[%s4649_s14 + $0x30] sm:$0xff]  ;;  %v1720_v53 = vld [vmem:[%s4649_s14 + $0x27e0] sm:$0xff] }
 0x24d   : > { %2718 = vmatprep.subr.mxu0 %v1593_v47  ;;  %2789 = vmatprep.subr.mxu1 %v571_v49  ;;  %v1473_v47 = vld [vmem:[%s4649_s14 + $0x2028] sm:$0xff]  ;;  %v1472_v49 = vld [vmem:[%s4649_s14 + $0x2020] sm:$0xff] }
 0x24e   : > { %2712 = vmatmul.mubr.f32.vlgmr.msra.gmra.mxu1 %v4227_v56  ;;  %2719 = vmatpush1.msra.mxu0 %v1592_v51  ;;  %v1721_v51 = vld [vmem:[%s4649_s14 + $0x27e8] sm:$0xff]  ;;  %v691_v56 = vld [vmem:[%s4649_s14 + $0x7b8] sm:$0xff] }
 0x24f   : > { %2790 = vmatpush1.msra.mxu1 %v570_v52  ;;  %2720 = vmatprep.subr.mxu0 %v1585_v54  ;;  %v699_v52 = vld [vmem:[%s4649_s14 + $0x7f8] sm:$0xff]  ;;  %v698_v54 = vld [vmem:[%s4649_s14 + $0x7f0] sm:$0xff] }
 0x250   : > { %2791 = vmatprep.subr.mxu1 %v563_v55  ;;  %2721 = vmatpush1.msra.mxu0 %v1584_v57  ;;  %v1713_v55 = vld [vmem:[%s4649_s14 + $0x27a8] sm:$0xff]  ;;  %v1712_v57 = vld [vmem:[%s4649_s14 + $0x27a0] sm:$0xff] }
 0x251   : > { %2792 = vmatpush1.msra.mxu1 %v562_v58  ;;  %2722 = vmatprep.subr.mxu0 %v1577_v59  ;;  %v690_v58 = vld [vmem:[%s4649_s14 + $0x7b0] sm:$0xff]  ;;  %v1705_v59 = vld [vmem:[%s4649_s14 + $0x2768] sm:$0xff] }
 0x252   : > { %2793 = vmatprep.subr.mxu1 %v555_v60  ;;  %2723 = vmatpush1.msra.mxu0 %v1576_v61  ;;  %v683_v60 = vld [vmem:[%s4649_s14 + $0x778] sm:$0xff]  ;;  %v1704_v61 = vld [vmem:[%s4649_s14 + $0x2760] sm:$0xff] }
 0x253   : > { %2794 = vmatpush1.msra.mxu1 %v554_v62  ;;  %2724 = vmatprep.subr.mxu0 %v1569_v63  ;;  %v682_v62 = vld [vmem:[%s4649_s14 + $0x770] sm:$0xff]  ;;  %v1697_v63 = vld [vmem:[%s4649_s14 + $0x2728] sm:$0xff] }
 0x254   : > { %2795 = vmatprep.subr.mxu1 %v547_v0  ;;  %2725 = vmatpush1.msra.mxu0 %v1568_v1  ;;  %v675_v0 = vld [vmem:[%s4649_s14 + $0x738] sm:$0xff]  ;;  %v1696_v1 = vld [vmem:[%s4649_s14 + $0x2720] sm:$0xff] }
 0x255   : > { %2796 = vmatpush1.msra.mxu1 %v546_v2  ;;  %2726 = vmatprep.subr.mxu0 %v1561_v3  ;;  %v674_v2 = vld [vmem:[%s4649_s14 + $0x730] sm:$0xff]  ;;  %v1689_v3 = vld [vmem:[%s4649_s14 + $0x26e8] sm:$0xff] }
 0x256   : > { %2797 = vmatprep.subr.mxu1 %v539_v4  ;;  %2727 = vmatpush1.msra.mxu0 %v1560_v5  ;;  %v667_v4 = vld [vmem:[%s4649_s14 + $0x6f8] sm:$0xff]  ;;  %v1688_v5 = vld [vmem:[%s4649_s14 + $0x26e0] sm:$0xff] }
 0x257   : > { %2798 = vmatpush1.msra.mxu1 %v538_v6  ;;  %2728 = vmatprep.subr.mxu0 %v1553_v7  ;;  %v666_v6 = vld [vmem:[%s4649_s14 + $0x6f0] sm:$0xff]  ;;  %v1681_v7 = vld [vmem:[%s4649_s14 + $0x26a8] sm:$0xff] }
 0x258   : > { %2799 = vmatprep.subr.mxu1 %v531_v8  ;;  %2729 = vmatpush1.msra.mxu0 %v1552_v9  ;;  %v659_v8 = vld [vmem:[%s4649_s14 + $0x6b8] sm:$0xff]  ;;  %v1680_v9 = vld [vmem:[%s4649_s14 + $0x26a0] sm:$0xff] }
 0x259   : > { %2800 = vmatpush1.msra.mxu1 %v530_v10  ;;  %2730 = vmatprep.subr.mxu0 %v1545_v11  ;;  %v658_v10 = vld [vmem:[%s4649_s14 + $0x6b0] sm:$0xff]  ;;  %v1673_v11 = vld [vmem:[%s4649_s14 + $0x2668] sm:$0xff] }
 0x25a   : > { %2801 = vmatprep.subr.mxu1 %v523_v12  ;;  %2731 = vmatpush1.msra.mxu0 %v1544_v13  ;;  %v651_v12 = vld [vmem:[%s4649_s14 + $0x678] sm:$0xff]  ;;  %v1672_v13 = vld [vmem:[%s4649_s14 + $0x2660] sm:$0xff] }
 0x25b   : > { %2802 = vmatpush1.msra.mxu1 %v522_v14  ;;  %2732 = vmatprep.subr.mxu0 %v1537_v15  ;;  %v650_v14 = vld [vmem:[%s4649_s14 + $0x670] sm:$0xff]  ;;  %v1665_v15 = vld [vmem:[%s4649_s14 + $0x2628] sm:$0xff] }
 0x25c   : > { %2803 = vmatprep.subr.mxu1 %v515_v16  ;;  %2733 = vmatpush1.msra.mxu0 %v1536_v17  ;;  %v643_v16 = vld [vmem:[%s4649_s14 + $0x638] sm:$0xff]  ;;  %v1664_v17 = vld [vmem:[%s4649_s14 + $0x2620] sm:$0xff] }
 0x25d   : > { %2804 = vmatpush1.msra.mxu1 %v514_v18  ;;  %2734 = vmatprep.subr.mxu0 %v1529_v19  ;;  %v642_v18 = vld [vmem:[%s4649_s14 + $0x630] sm:$0xff]  ;;  %v1657_v19 = vld [vmem:[%s4649_s14 + $0x25e8] sm:$0xff] }
 0x25e   : > { %2805 = vmatprep.subr.mxu1 %v507_v20  ;;  %2735 = vmatpush1.msra.mxu0 %v1528_v21  ;;  %v635_v20 = vld [vmem:[%s4649_s14 + $0x5f8] sm:$0xff]  ;;  %v2145_v21 = vpop.f32.mrf.mxu1 }
 0x25f   : > { %2806 = vmatpush1.msra.mxu1 %v506_v22  ;;  %2736 = vmatprep.subr.mxu0 %v1521_v23  ;;  %v1656_v22 = vld [vmem:[%s4649_s14 + $0x25e0] sm:$0xff]  ;;  %v634_v23 = vld [vmem:[%s4649_s14 + $0x5f0] sm:$0xff] }
 0x260   : > { %2807 = vmatprep.subr.mxu1 %v499_v24  ;;  %2737 = vmatpush1.msra.mxu0 %v1520_v25  ;;  %v1649_v24 = vld [vmem:[%s4649_s14 + $0x25a8] sm:$0xff]  ;;  %v627_v25 = vld [vmem:[%s4649_s14 + $0x5b8] sm:$0xff] }
 0x261   : > { %2808 = vmatpush1.msra.mxu1 %v498_v26  ;;  %2738 = vmatprep.subr.mxu0 %v1513_v27  ;;  %v2216_v26 = vpop.f32.mrf.mxu0  ;;  %v1648_v27 = vld [vmem:[%s4649_s14 + $0x25a0] sm:$0xff] }
 0x262   : > { %2809 = vmatprep.subr.mxu1 %v491_v28  ;;  %2739 = vmatpush1.msra.mxu0 %v1512_v29  ;;  %v626_v28 = vld [vmem:[%s4649_s14 + $0x5b0] sm:$0xff]  ;;  %v1641_v29 = vld [vmem:[%s4649_s14 + $0x2568] sm:$0xff] }
 0x263   : > { %2810 = vmatpush1.msra.mxu1 %v490_v30  ;;  %2740 = vmatprep.subr.mxu0 %v1505_v31  ;;  %v619_v30 = vld [vmem:[%s4649_s14 + $0x578] sm:$0xff]  ;;  %v2147_v31 = vpop.f32.mrf.mxu1 }
 0x264   : > { %2811 = vmatprep.subr.mxu1 %v483_v32  ;;  %2741 = vmatpush1.msra.mxu0 %v1504_v33  ;;  %v1640_v32 = vld [vmem:[%s4649_s14 + $0x2560] sm:$0xff]  ;;  %v618_v33 = vld [vmem:[%s4649_s14 + $0x570] sm:$0xff] }
 0x265   : > { %2812 = vmatpush1.msra.mxu1 %v482_v34  ;;  %2742 = vmatprep.subr.mxu0 %v1497_v35  ;;  %v1633_v34 = vld [vmem:[%s4649_s14 + $0x2528] sm:$0xff]  ;;  %v611_v35 = vld [vmem:[%s4649_s14 + $0x538] sm:$0xff] }
 0x266   : > { %2813 = vmatprep.subr.mxu1 %v475_v36  ;;  %2743 = vmatpush1.msra.mxu0 %v1496_v37  ;;  %v2287_v36 = vpop.f32.mrf.mxu1  ;;  %v2218_v37 = vpop.f32.mrf.mxu0 }
 0x267   : > { %2814 = vmatpush1.msra.mxu1 %v474_v38  ;;  %2744 = vmatprep.subr.mxu0 %v1489_v39  ;;  %v1632_v38 = vld [vmem:[%s4649_s14 + $0x2520] sm:$0xff]  ;;  %v610_v39 = vld [vmem:[%s4649_s14 + $0x530] sm:$0xff] }
 0x268   : > { %2815 = vmatprep.subr.mxu1 %v467_v40  ;;  %2745 = vmatpush1.msra.mxu0 %v1488_v41  ;;  %v2217_v40 = vadd.f32 %v2216_v26, %v2145_v21  ;;  %v1625_v41 = vld [vmem:[%s4649_s14 + $0x24e8] sm:$0xff]  ;;  %v811_v21 = vld [vmem:[%s4649_s14 + $0xb78] sm:$0xff] }
 0x269   : > { %2816 = vmatpush1.msra.mxu1 %v466_v42  ;;  %2746 = vmatprep.subr.mxu0 %v1481_v43  ;;  %v603_v42 = vld [vmem:[%s4649_s14 + $0x4f8] sm:$0xff]  ;;  %v1624_v43 = vld [vmem:[%s4649_s14 + $0x24e0] sm:$0xff] }
 0x26a   : > { %2817 = vmatprep.subr.mxu1 %v459_v44  ;;  %2747 = vmatpush1.msra.mxu0 %v1480_v45  ;;  %v602_v44 = vld [vmem:[%s4649_s14 + $0x4f0] sm:$0xff]  ;;  %v2219_v45 = vadd.f32 %v2218_v37, %v2147_v31  ;;  %v1059_v26 = vld [vmem:[%s4649_s14 + $0x1338] sm:$0xff] }
 0x26b   : > { %2818 = vmatpush1.msra.mxu1 %v458_v46  ;;  %2748 = vmatprep.subr.mxu0 %v1473_v47  ;;  %v1617_v46 = vld [vmem:[%s4649_s14 + $0x24a8] sm:$0xff]  ;;  %v595_v47 = vld [vmem:[%s4649_s14 + $0x4b8] sm:$0xff]  ;;  %v794_v31 = vld [vmem:[%s4649_s14 + $0xaf0] sm:$0xff] }
 0x26c   : > { %2819 = vmatprep.subr.mxu1 %v451_v48  ;;  %2749 = vmatpush1.msra.mxu0 %v1472_v49  ;;  %v2289_v48 = vpop.f32.mrf.mxu1  ;;  %v1616_v49 = vld [vmem:[%s4649_s14 + $0x24a0] sm:$0xff]  ;;  %v779_v37 = vld [vmem:[%s4649_s14 + $0xa78] sm:$0xff] }
 0x26d   : > { %2820 = vmatpush1.msra.mxu1 %v450_v50  ;;  %2750 = vmatprep.subr.mxu0 %v1721_v51  ;;  %v594_v50 = vld [vmem:[%s4649_s14 + $0x4b0] sm:$0xff]  ;;  %v2288_v51 = vadd.f32 %v2287_v36, %v2217_v40 }
 0x26e   : > { %2821 = vmatprep.subr.mxu1 %v699_v52  ;;  %2751 = vmatpush2.msra.mxu0 %v1720_v53  ;;  %v1609_v52 = vld [vmem:[%s4649_s14 + $0x2468] sm:$0xff]  ;;  %v587_v53 = vld [vmem:[%s4649_s14 + $0x478] sm:$0xff]  ;;  %v1042_v36 = vld [vmem:[%s4649_s14 + $0x12b0] sm:$0xff] }
 0x26f   : > { %2822 = vmatpush2.msra.mxu1 %v698_v54  ;;  %2752 = vmatprep.subr.mxu0 %v1713_v55  ;;  %v1608_v54 = vld [vmem:[%s4649_s14 + $0x2460] sm:$0xff]  ;;  %v586_v55 = vld [vmem:[%s4649_s14 + $0x470] sm:$0xff] }
 0x270   : > { %2823 = vmatprep.subr.mxu1 %v691_v56  ;;  %2753 = vmatpush2.msra.mxu0 %v1712_v57  ;;  %v2290_v57 = vadd.f32 %v2289_v48, %v2219_v45  ;;  %v1034_v40 = vld [vmem:[%s4649_s14 + $0x1270] sm:$0xff]  ;;  %v763_v45 = vld [vmem:[%s4649_s14 + $0x9f8] sm:$0xff] }
 0x271   : > { %2824 = vmatpush2.msra.mxu1 %v690_v58  ;;  %2754 = vmatprep.subr.mxu0 %v1705_v59  ;;  %v1601_v58 = vld [vmem:[%s4649_s14 + $0x2428] sm:$0xff]  ;;  %v579_v59 = vld [vmem:[%s4649_s14 + $0x438] sm:$0xff]  ;;  %v1018_v48 = vld [vmem:[%s4649_s14 + $0x11f0] sm:$0xff] }
 0x272   : > { %2825 = vmatprep.subr.mxu1 %v683_v60  ;;  %2755 = vmatpush2.msra.mxu0 %v1704_v61  ;;  %v1600_v61 = vld [vmem:[%s4649_s14 + $0x2420] sm:$0xff] }
 0x273   : > { %2826 = vmatpush2.msra.mxu1 %v682_v62  ;;  %2756 = vmatprep.subr.mxu0 %v1697_v63  ;;  %v428_v62 = vld [vmem:[#allocation2 + $0x18] sm:$0xff] }
 0x274   : > { %2827 = vmatprep.subr.mxu1 %v675_v0  ;;  %2757 = vmatpush2.msra.mxu0 %v1696_v1  ;;  %v578_v1 = vld [vmem:[%s4649_s14 + $0x430] sm:$0xff] }
 0x275   : > { %2828 = vmatpush2.msra.mxu1 %v674_v2  ;;  %2758 = vmatprep.subr.mxu0 %v1689_v3 }
 0x276   : > { %2829 = vmatprep.subr.mxu1 %v667_v4  ;;  %2759 = vmatpush2.msra.mxu0 %v1688_v5  ;;  %v827_v4 = vld [vmem:[%s4649_s14 + $0xbf8] sm:$0xff]  ;;  %v429_v5 = vld [vmem:[#allocation2 + $0x10] sm:$0xff] }
 0x277   : > { %2830 = vmatpush2.msra.mxu1 %v666_v6  ;;  %2760 = vmatprep.subr.mxu0 %v1681_v7  ;;  %v4228_v7 = vld [vmem:[%s4671_s10 + $0x48] sm:$0xff] }
 0x278   : > { %2831 = vmatprep.subr.mxu1 %v659_v8  ;;  %2761 = vmatpush2.msra.mxu0 %v1680_v9  ;;  %v1083_v8 = vld [vmem:[%s4649_s14 + $0x13f8] sm:$0xff] }
 0x279   : > { %2832 = vmatpush2.msra.mxu1 %v658_v10  ;;  %2762 = vmatprep.subr.mxu0 %v1673_v11  ;;  %v4229_v11 = vld [vmem:[%s4671_s10 + $0x40] sm:$0xff] }
 0x27a   : > { %2833 = vmatprep.subr.mxu1 %v651_v12  ;;  %2763 = vmatpush2.msra.mxu0 %v1672_v13  ;;  %v826_v12 = vld [vmem:[%s4649_s14 + $0xbf0] sm:$0xff] }
 0x27b   : > { %2834 = vmatpush2.msra.mxu1 %v650_v14  ;;  %2764 = vmatprep.subr.mxu0 %v1665_v15  ;;  %v1082_v13 = vld [vmem:[%s4649_s14 + $0x13f0] sm:$0xff]  ;;  %v4230_v14 = vld [vmem:[%s4671_s10 + $0x8] sm:$0xff]  ;;  %v819_v15 = vld [vmem:[%s4649_s14 + $0xbb8] sm:$0xff] }
 0x27c   : > { %2835 = vmatprep.subr.mxu1 %v643_v16  ;;  %2765 = vmatpush2.msra.mxu0 %v1664_v17  ;;  %v1075_v16 = vld [vmem:[%s4649_s14 + $0x13b8] sm:$0xff] }
 0x27d   : > { %2836 = vmatpush2.msra.mxu1 %v642_v18  ;;  %2766 = vmatprep.subr.mxu0 %v1657_v19  ;;  %v4231_v18 = vld [vmem:[%s4671_s10] sm:$0xff]  ;;  %v818_v19 = vld [vmem:[%s4649_s14 + $0xbb0] sm:$0xff] }
 0x27e   : > { %2837 = vmatprep.subr.mxu1 %v635_v20  ;;  %2767 = vmatpush2.msra.mxu0 %v1656_v22  ;;  %v1074_v20 = vld [vmem:[%s4649_s14 + $0x13b0] sm:$0xff]  ;;  %v1067_v22 = vld [vmem:[%s4649_s14 + $0x1378] sm:$0xff] }
 0x27f   : > { %2838 = vmatpush2.msra.mxu1 %v634_v23  ;;  %2768 = vmatprep.subr.mxu0 %v1649_v24  ;;  %v810_v23 = vld [vmem:[%s4649_s14 + $0xb70] sm:$0xff] }
 0x280   : > { %2839 = vmatprep.subr.mxu1 %v627_v25  ;;  %2769 = vmatpush2.msra.mxu0 %v1648_v27  ;;  %v1066_v24 = vld [vmem:[%s4649_s14 + $0x1370] sm:$0xff]  ;;  %v803_v25 = vld [vmem:[%s4649_s14 + $0xb38] sm:$0xff] }
 0x281   : > { %2840 = vmatpush2.msra.mxu1 %v626_v28  ;;  %2770 = vmatprep.subr.mxu0 %v1641_v29  ;;  %v802_v27 = vld [vmem:[%s4649_s14 + $0xb30] sm:$0xff]  ;;  %v795_v29 = vld [vmem:[%s4649_s14 + $0xaf8] sm:$0xff] }
 0x282   : > { %2841 = vmatprep.subr.mxu1 %v619_v30  ;;  %2771 = vmatpush2.msra.mxu0 %v1640_v32  ;;  %v1058_v28 = vld [vmem:[%s4649_s14 + $0x1330] sm:$0xff]  ;;  %v1051_v30 = vld [vmem:[%s4649_s14 + $0x12f8] sm:$0xff] }
 0x283   : > { %2842 = vmatpush2.msra.mxu1 %v618_v33  ;;  %2772 = vmatprep.subr.mxu0 %v1633_v34  ;;  %v1050_v32 = vld [vmem:[%s4649_s14 + $0x12f0] sm:$0xff]  ;;  %v787_v33 = vld [vmem:[%s4649_s14 + $0xab8] sm:$0xff] }
 0x284   : > { %2843 = vmatprep.subr.mxu1 %v611_v35  ;;  %2773 = vmatpush2.msra.mxu0 %v1632_v38  ;;  %v1043_v34 = vld [vmem:[%s4649_s14 + $0x12b8] sm:$0xff]  ;;  %v786_v35 = vld [vmem:[%s4649_s14 + $0xab0] sm:$0xff] }
 0x285   : > { %2844 = vmatpush2.msra.mxu1 %v610_v39  ;;  %2774 = vmatprep.subr.mxu0 %v1625_v41  ;;  %v1035_v38 = vld [vmem:[%s4649_s14 + $0x1278] sm:$0xff]  ;;  %v778_v39 = vld [vmem:[%s4649_s14 + $0xa70] sm:$0xff] }
 0x286   : > { %2845 = vmatprep.subr.mxu1 %v603_v42  ;;  %2775 = vmatpush2.msra.mxu0 %v1624_v43  ;;  %v771_v41 = vld [vmem:[%s4649_s14 + $0xa38] sm:$0xff]  ;;  %v770_v43 = vld [vmem:[%s4649_s14 + $0xa30] sm:$0xff] }
 0x287   : > { %2846 = vmatpush2.msra.mxu1 %v602_v44  ;;  %2776 = vmatprep.subr.mxu0 %v1617_v46  ;;  %v1027_v42 = vld [vmem:[%s4649_s14 + $0x1238] sm:$0xff]  ;;  %v1026_v44 = vld [vmem:[%s4649_s14 + $0x1230] sm:$0xff] }
 0x288   : > { %2847 = vmatprep.subr.mxu1 %v595_v47  ;;  %v2358_v56 = vpop.f32.mrf.mxu0  ;;  %2777 = vmatpush2.msra.mxu0 %v1616_v49  ;;  %v1019_v46 = vld [vmem:[%s4649_s14 + $0x11f8] sm:$0xff]  ;;  %v762_v47 = vld [vmem:[%s4649_s14 + $0x9f0] sm:$0xff] }
 0x289   : > { %2848 = vmatpush2.msra.mxu1 %v594_v50  ;;  %v2359_v60 = vadd.f32 %v2358_v56, %v2288_v51  ;;  %2778 = vmatprep.subr.mxu0 %v1609_v52  ;;  %v755_v49 = vld [vmem:[%s4649_s14 + $0x9b8] sm:$0xff]  ;;  %v754_v51 = vld [vmem:[%s4649_s14 + $0x9b0] sm:$0xff] }
 0x28a   : > { %2849 = vmatprep.subr.mxu1 %v587_v53  ;;  %v2429_v63 = vpop.f32.mrf.mxu1  ;;  %v2360_v0 = vpop.f32.mrf.mxu0  ;;  %2779 = vmatpush2.msra.mxu0 %v1608_v54  ;;  %v1011_v50 = vld [vmem:[%s4649_s14 + $0x11b8] sm:$0xff]  ;;  %v1010_v52 = vld [vmem:[%s4649_s14 + $0x11b0] sm:$0xff] }
 0x28b   : > { %2850 = vmatpush2.msra.mxu1 %v586_v55  ;;  %v2430_v2 = vadd.f32 %v2429_v63, %v2359_v60  ;;  %v2361_v3 = vadd.f32 %v2360_v0, %v2290_v57  ;;  %2780 = vmatprep.subr.mxu0 %v1601_v58  ;;  %v747_v53 = vld [vmem:[%s4649_s14 + $0x978] sm:$0xff]  ;;  %v746_v55 = vld [vmem:[%s4649_s14 + $0x970] sm:$0xff] }
 0x28c   : > { %2851 = vmatprep.subr.mxu1 %v579_v59  ;;  %v2431_v6 = vpop.f32.mrf.mxu1  ;;  %2781 = vmatpush2.msra.mxu0 %v1600_v61  ;;  %v1003_v54 = vld [vmem:[%s4649_s14 + $0x1178] sm:$0xff]  ;;  %v1002_v56 = vld [vmem:[%s4649_s14 + $0x1170] sm:$0xff] }
 0x28d   : > { %2782 = vmatprep.mubr.f32.mxu0 %v4228_v7  ;;  %v3146_v9 = vadd.f32 %v2430_v2, %v428_v62  ;;  %v2432_v10 = vadd.f32 %v2431_v6, %v2361_v3  ;;  %2852 = vmatpush2.msra.mxu1 %v578_v1  ;;  %v739_v57 = vld [vmem:[%s4649_s14 + $0x938] sm:$0xff]  ;;  %v738_v59 = vld [vmem:[%s4649_s14 + $0x930] sm:$0xff] }
 0x28e   : > { %2783 = vmatmul.mubr.f32.vlgmr.msra.gmra.mxu0 %v4229_v11  ;;  %2853 = vmatprep.mubr.f32.mxu1 %v4230_v14  ;;  %v995_v58 = vld [vmem:[%s4649_s14 + $0x1138] sm:$0xff]  ;;  %v994_v60 = vld [vmem:[%s4649_s14 + $0x1130] sm:$0xff] }
 0x28f   : > { %2860 = vmatprep.subr.mxu0 %v827_v4  ;;  %3154 = vst [vmem:[#allocation2 + $0x18] sm:$0xff] %v3146_v9  ;;  %v3147_v17 = vadd.f32 %v2432_v10, %v429_v5  ;;  %2931 = vmatprep.subr.mxu1 %v1083_v8  ;;  %v731_v61 = vld [vmem:[%s4649_s14 + $0x8f8] sm:$0xff]  ;;  %v730_v63 = vld [vmem:[%s4649_s14 + $0x8f0] sm:$0xff] }
 0x290   : > { %2854 = vmatmul.mubr.f32.vlgmr.msra.gmra.mxu1 %v4231_v18  ;;  %2861 = vmatpush1.msra.mxu0 %v826_v12  ;;  %v987_v62 = vld [vmem:[%s4649_s14 + $0x10f8] sm:$0xff]  ;;  %v986_v0 = vld [vmem:[%s4649_s14 + $0x10f0] sm:$0xff] }
 0x291   : > { %2932 = vmatpush1.msra.mxu1 %v1082_v13  ;;  %3155 = vst [vmem:[#allocation2 + $0x10] sm:$0xff] %v3147_v17  ;;  %2862 = vmatprep.subr.mxu0 %v819_v15  ;;  %v723_v1 = vld [vmem:[%s4649_s14 + $0x8b8] sm:$0xff]  ;;  %v722_v3 = vld [vmem:[%s4649_s14 + $0x8b0] sm:$0xff] }
 0x292   : > { %2933 = vmatprep.subr.mxu1 %v1075_v16  ;;  %2863 = vmatpush1.msra.mxu0 %v818_v19  ;;  %v979_v2 = vld [vmem:[%s4649_s14 + $0x10b8] sm:$0xff]  ;;  %v978_v4 = vld [vmem:[%s4649_s14 + $0x10b0] sm:$0xff] }
 0x293   : > { %2934 = vmatpush1.msra.mxu1 %v1074_v20  ;;  %2864 = vmatprep.subr.mxu0 %v811_v21  ;;  %v715_v5 = vld [vmem:[%s4649_s14 + $0x878] sm:$0xff]  ;;  %v714_v7 = vld [vmem:[%s4649_s14 + $0x870] sm:$0xff] }
 0x294   : > { %2935 = vmatprep.subr.mxu1 %v1067_v22  ;;  %2865 = vmatpush1.msra.mxu0 %v810_v23  ;;  %v971_v6 = vld [vmem:[%s4649_s14 + $0x1078] sm:$0xff]  ;;  %v970_v8 = vld [vmem:[%s4649_s14 + $0x1070] sm:$0xff] }
 0x295   : > { %2936 = vmatpush1.msra.mxu1 %v1066_v24  ;;  %2866 = vmatprep.subr.mxu0 %v803_v25  ;;  %v707_v9 = vld [vmem:[%s4649_s14 + $0x838] sm:$0xff]  ;;  %v706_v11 = vld [vmem:[%s4649_s14 + $0x830] sm:$0xff] }
 0x296   : > { %2937 = vmatprep.subr.mxu1 %v1059_v26  ;;  %2867 = vmatpush1.msra.mxu0 %v802_v27  ;;  %v963_v10 = vld [vmem:[%s4649_s14 + $0x1038] sm:$0xff]  ;;  %v962_v12 = vld [vmem:[%s4649_s14 + $0x1030] sm:$0xff] }
 0x297   : > { %2938 = vmatpush1.msra.mxu1 %v1058_v28  ;;  %2868 = vmatprep.subr.mxu0 %v795_v29  ;;  %v955_v13 = vld [vmem:[%s4649_s14 + $0xff8] sm:$0xff]  ;;  %v954_v15 = vld [vmem:[%s4649_s14 + $0xff0] sm:$0xff] }
 0x298   : > { %2939 = vmatprep.subr.mxu1 %v1051_v30  ;;  %2869 = vmatpush1.msra.mxu0 %v794_v31  ;;  %v1211_v14 = vld [vmem:[%s4649_s14 + $0x17f8] sm:$0xff]  ;;  %v1210_v16 = vld [vmem:[%s4649_s14 + $0x17f0] sm:$0xff] }
 0x299   : > { %2940 = vmatpush1.msra.mxu1 %v1050_v32  ;;  %2870 = vmatprep.subr.mxu0 %v787_v33  ;;  %v947_v17 = vld [vmem:[%s4649_s14 + $0xfb8] sm:$0xff]  ;;  %v946_v19 = vld [vmem:[%s4649_s14 + $0xfb0] sm:$0xff] }
 0x29a   : > { %2941 = vmatprep.subr.mxu1 %v1043_v34  ;;  %2871 = vmatpush1.msra.mxu0 %v786_v35  ;;  %v1203_v18 = vld [vmem:[%s4649_s14 + $0x17b8] sm:$0xff]  ;;  %v1202_v20 = vld [vmem:[%s4649_s14 + $0x17b0] sm:$0xff] }
 0x29b   : > { %2942 = vmatpush1.msra.mxu1 %v1042_v36  ;;  %2872 = vmatprep.subr.mxu0 %v779_v37  ;;  %v939_v21 = vld [vmem:[%s4649_s14 + $0xf78] sm:$0xff]  ;;  %v938_v23 = vld [vmem:[%s4649_s14 + $0xf70] sm:$0xff] }
 0x29c   : > { %2943 = vmatprep.subr.mxu1 %v1035_v38  ;;  %2873 = vmatpush1.msra.mxu0 %v778_v39  ;;  %v1195_v22 = vld [vmem:[%s4649_s14 + $0x1778] sm:$0xff]  ;;  %v1194_v24 = vld [vmem:[%s4649_s14 + $0x1770] sm:$0xff] }
 0x29d   : > { %2944 = vmatpush1.msra.mxu1 %v1034_v40  ;;  %2874 = vmatprep.subr.mxu0 %v771_v41  ;;  %v931_v25 = vld [vmem:[%s4649_s14 + $0xf38] sm:$0xff]  ;;  %v930_v27 = vld [vmem:[%s4649_s14 + $0xf30] sm:$0xff] }
 0x29e   : > { %2945 = vmatprep.subr.mxu1 %v1027_v42  ;;  %2875 = vmatpush1.msra.mxu0 %v770_v43  ;;  %v1187_v26 = vld [vmem:[%s4649_s14 + $0x1738] sm:$0xff]  ;;  %v1186_v28 = vld [vmem:[%s4649_s14 + $0x1730] sm:$0xff] }
 0x29f   : > { %2946 = vmatpush1.msra.mxu1 %v1026_v44  ;;  %2876 = vmatprep.subr.mxu0 %v763_v45  ;;  %v923_v29 = vld [vmem:[%s4649_s14 + $0xef8] sm:$0xff]  ;;  %v922_v31 = vld [vmem:[%s4649_s14 + $0xef0] sm:$0xff] }
 0x2a0   : > { %2947 = vmatprep.subr.mxu1 %v1019_v46  ;;  %2877 = vmatpush1.msra.mxu0 %v762_v47  ;;  %v1179_v30 = vld [vmem:[%s4649_s14 + $0x16f8] sm:$0xff]  ;;  %v1178_v32 = vld [vmem:[%s4649_s14 + $0x16f0] sm:$0xff] }
 0x2a1   : > { %2948 = vmatpush1.msra.mxu1 %v1018_v48  ;;  %2878 = vmatprep.subr.mxu0 %v755_v49  ;;  %v915_v33 = vld [vmem:[%s4649_s14 + $0xeb8] sm:$0xff]  ;;  %v914_v35 = vld [vmem:[%s4649_s14 + $0xeb0] sm:$0xff] }
 0x2a2   : > { %2949 = vmatprep.subr.mxu1 %v1011_v50  ;;  %2879 = vmatpush1.msra.mxu0 %v754_v51  ;;  %v1171_v34 = vld [vmem:[%s4649_s14 + $0x16b8] sm:$0xff]  ;;  %v1170_v36 = vld [vmem:[%s4649_s14 + $0x16b0] sm:$0xff] }
 0x2a3   : > { %2950 = vmatpush1.msra.mxu1 %v1010_v52  ;;  %2880 = vmatprep.subr.mxu0 %v747_v53  ;;  %v907_v37 = vld [vmem:[%s4649_s14 + $0xe78] sm:$0xff]  ;;  %v906_v39 = vld [vmem:[%s4649_s14 + $0xe70] sm:$0xff] }
 0x2a4   : > { %2951 = vmatprep.subr.mxu1 %v1003_v54  ;;  %2881 = vmatpush1.msra.mxu0 %v746_v55  ;;  %v1163_v38 = vld [vmem:[%s4649_s14 + $0x1678] sm:$0xff]  ;;  %v1162_v40 = vld [vmem:[%s4649_s14 + $0x1670] sm:$0xff] }
 0x2a5   : > { %2952 = vmatpush1.msra.mxu1 %v1002_v56  ;;  %2882 = vmatprep.subr.mxu0 %v739_v57  ;;  %v899_v41 = vld [vmem:[%s4649_s14 + $0xe38] sm:$0xff]  ;;  %v898_v43 = vld [vmem:[%s4649_s14 + $0xe30] sm:$0xff] }
 0x2a6   : > { %2953 = vmatprep.subr.mxu1 %v995_v58  ;;  %2883 = vmatpush1.msra.mxu0 %v738_v59  ;;  %v1155_v42 = vld [vmem:[%s4649_s14 + $0x1638] sm:$0xff]  ;;  %v1154_v44 = vld [vmem:[%s4649_s14 + $0x1630] sm:$0xff] }
 0x2a7   : > { %2954 = vmatpush1.msra.mxu1 %v994_v60  ;;  %2884 = vmatprep.subr.mxu0 %v731_v61  ;;  %v891_v45 = vld [vmem:[%s4649_s14 + $0xdf8] sm:$0xff]  ;;  %v890_v47 = vld [vmem:[%s4649_s14 + $0xdf0] sm:$0xff] }
 0x2a8   : > { %2955 = vmatprep.subr.mxu1 %v987_v62  ;;  %2885 = vmatpush1.msra.mxu0 %v730_v63  ;;  %v1147_v46 = vld [vmem:[%s4649_s14 + $0x15f8] sm:$0xff]  ;;  %v1146_v48 = vld [vmem:[%s4649_s14 + $0x15f0] sm:$0xff] }
 0x2a9   : > { %2956 = vmatpush1.msra.mxu1 %v986_v0  ;;  %2886 = vmatprep.subr.mxu0 %v723_v1  ;;  %v883_v49 = vld [vmem:[%s4649_s14 + $0xdb8] sm:$0xff]  ;;  %v882_v51 = vld [vmem:[%s4649_s14 + $0xdb0] sm:$0xff] }
 0x2aa   : > { %2957 = vmatprep.subr.mxu1 %v979_v2  ;;  %2887 = vmatpush1.msra.mxu0 %v722_v3  ;;  %v1139_v50 = vld [vmem:[%s4649_s14 + $0x15b8] sm:$0xff]  ;;  %v1138_v52 = vld [vmem:[%s4649_s14 + $0x15b0] sm:$0xff] }
 0x2ab   : > { %2958 = vmatpush1.msra.mxu1 %v978_v4  ;;  %2888 = vmatprep.subr.mxu0 %v715_v5  ;;  %v875_v53 = vld [vmem:[%s4649_s14 + $0xd78] sm:$0xff]  ;;  %v874_v55 = vld [vmem:[%s4649_s14 + $0xd70] sm:$0xff] }
 0x2ac   : > { %2959 = vmatprep.subr.mxu1 %v971_v6  ;;  %2889 = vmatpush1.msra.mxu0 %v714_v7  ;;  %v1131_v54 = vld [vmem:[%s4649_s14 + $0x1578] sm:$0xff]  ;;  %v1130_v56 = vld [vmem:[%s4649_s14 + $0x1570] sm:$0xff] }
 0x2ad   : > { %2960 = vmatpush1.msra.mxu1 %v970_v8  ;;  %2890 = vmatprep.subr.mxu0 %v707_v9  ;;  %v867_v57 = vld [vmem:[%s4649_s14 + $0xd38] sm:$0xff]  ;;  %v866_v59 = vld [vmem:[%s4649_s14 + $0xd30] sm:$0xff] }
 0x2ae   : > { %2961 = vmatprep.subr.mxu1 %v963_v10  ;;  %2891 = vmatpush1.msra.mxu0 %v706_v11  ;;  %v1123_v58 = vld [vmem:[%s4649_s14 + $0x1538] sm:$0xff]  ;;  %v1122_v60 = vld [vmem:[%s4649_s14 + $0x1530] sm:$0xff] }
 0x2af   : > { %2962 = vmatpush1.msra.mxu1 %v962_v12  ;;  %2892 = vmatprep.subr.mxu0 %v955_v13  ;;  %v859_v61 = vld [vmem:[%s4649_s14 + $0xcf8] sm:$0xff]  ;;  %v858_v63 = vld [vmem:[%s4649_s14 + $0xcf0] sm:$0xff] }
 0x2b0   : > { %2963 = vmatprep.subr.mxu1 %v1211_v14  ;;  %2893 = vmatpush2.msra.mxu0 %v954_v15  ;;  %v1115_v62 = vld [vmem:[%s4649_s14 + $0x14f8] sm:$0xff]  ;;  %v1114_v0 = vld [vmem:[%s4649_s14 + $0x14f0] sm:$0xff] }
 0x2b1   : > { %2964 = vmatpush2.msra.mxu1 %v1210_v16  ;;  %2894 = vmatprep.subr.mxu0 %v947_v17  ;;  %v851_v1 = vld [vmem:[%s4649_s14 + $0xcb8] sm:$0xff]  ;;  %v850_v3 = vld [vmem:[%s4649_s14 + $0xcb0] sm:$0xff] }
 0x2b2   : > { %2965 = vmatprep.subr.mxu1 %v1203_v18  ;;  %2895 = vmatpush2.msra.mxu0 %v946_v19  ;;  %v1107_v2 = vld [vmem:[%s4649_s14 + $0x14b8] sm:$0xff]  ;;  %v1106_v4 = vld [vmem:[%s4649_s14 + $0x14b0] sm:$0xff]  ;;  %v4234_v19 = vld [vmem:[%s4671_s10 + $0x28] sm:$0xff] }
 0x2b3   : > { %2966 = vmatpush2.msra.mxu1 %v1202_v20  ;;  %2896 = vmatprep.subr.mxu0 %v939_v21  ;;  %v843_v5 = vld [vmem:[%s4649_s14 + $0xc78] sm:$0xff]  ;;  %v842_v7 = vld [vmem:[%s4649_s14 + $0xc70] sm:$0xff] }
 0x2b4   : > { %2967 = vmatprep.subr.mxu1 %v1195_v22  ;;  %2897 = vmatpush2.msra.mxu0 %v938_v23  ;;  %v1099_v6 = vld [vmem:[%s4649_s14 + $0x1478] sm:$0xff]  ;;  %v1098_v8 = vld [vmem:[%s4649_s14 + $0x1470] sm:$0xff]  ;;  %v4235_v22 = vld [vmem:[%s4671_s10 + $0x20] sm:$0xff] }
 0x2b5   : > { %2968 = vmatpush2.msra.mxu1 %v1194_v24  ;;  %2898 = vmatprep.subr.mxu0 %v931_v25  ;;  %v835_v9 = vld [vmem:[%s4649_s14 + $0xc38] sm:$0xff]  ;;  %v834_v11 = vld [vmem:[%s4649_s14 + $0xc30] sm:$0xff] }
 0x2b6   : > { %2969 = vmatprep.subr.mxu1 %v1187_v26  ;;  %2899 = vmatpush2.msra.mxu0 %v930_v27  ;;  %v1091_v10 = vld [vmem:[%s4649_s14 + $0x1438] sm:$0xff]  ;;  %v1090_v12 = vld [vmem:[%s4649_s14 + $0x1430] sm:$0xff] }
 0x2b7   : > { %2970 = vmatpush2.msra.mxu1 %v1186_v28  ;;  %2900 = vmatprep.subr.mxu0 %v923_v29  ;;  %v1339_v13 = vld [vmem:[%s4649_s14 + $0x1bf8] sm:$0xff]  ;;  %v4233_v16 = vld [vmem:[%s4671_s10 + $0x10] sm:$0xff] }
 0x2b8   : > { %2971 = vmatprep.subr.mxu1 %v1179_v30  ;;  %2901 = vmatpush2.msra.mxu0 %v922_v31  ;;  %v4232_v14 = vld [vmem:[%s4671_s10 + $0x18] sm:$0xff]  ;;  %v1338_v17 = vld [vmem:[%s4649_s14 + $0x1bf0] sm:$0xff] }
 0x2b9   : > { %2972 = vmatpush2.msra.mxu1 %v1178_v32  ;;  %2902 = vmatprep.subr.mxu0 %v915_v33  ;;  %v1595_v15 = vld [vmem:[%s4649_s14 + $0x23f8] sm:$0xff]  ;;  %v1594_v18 = vld [vmem:[%s4649_s14 + $0x23f0] sm:$0xff] }
 0x2ba   : > { %2973 = vmatprep.subr.mxu1 %v1171_v34  ;;  %2903 = vmatpush2.msra.mxu0 %v914_v35  ;;  %v1331_v20 = vld [vmem:[%s4649_s14 + $0x1bb8] sm:$0xff]  ;;  %v1330_v23 = vld [vmem:[%s4649_s14 + $0x1bb0] sm:$0xff] }
 0x2bb   : > { %2974 = vmatpush2.msra.mxu1 %v1170_v36  ;;  %2904 = vmatprep.subr.mxu0 %v907_v37  ;;  %v1587_v21 = vld [vmem:[%s4649_s14 + $0x23b8] sm:$0xff]  ;;  %v1586_v24 = vld [vmem:[%s4649_s14 + $0x23b0] sm:$0xff] }
 0x2bc   : > { %2975 = vmatprep.subr.mxu1 %v1163_v38  ;;  %2905 = vmatpush2.msra.mxu0 %v906_v39  ;;  %v1323_v25 = vld [vmem:[%s4649_s14 + $0x1b78] sm:$0xff]  ;;  %v1322_v27 = vld [vmem:[%s4649_s14 + $0x1b70] sm:$0xff] }
 0x2bd   : > { %2976 = vmatpush2.msra.mxu1 %v1162_v40  ;;  %2906 = vmatprep.subr.mxu0 %v899_v41  ;;  %v1579_v26 = vld [vmem:[%s4649_s14 + $0x2378] sm:$0xff]  ;;  %v1578_v28 = vld [vmem:[%s4649_s14 + $0x2370] sm:$0xff] }
 0x2be   : > { %2977 = vmatprep.subr.mxu1 %v1155_v42  ;;  %2907 = vmatpush2.msra.mxu0 %v898_v43  ;;  %v1315_v29 = vld [vmem:[%s4649_s14 + $0x1b38] sm:$0xff]  ;;  %v1314_v31 = vld [vmem:[%s4649_s14 + $0x1b30] sm:$0xff] }
 0x2bf   : > { %2978 = vmatpush2.msra.mxu1 %v1154_v44  ;;  %2908 = vmatprep.subr.mxu0 %v891_v45  ;;  %v1571_v30 = vld [vmem:[%s4649_s14 + $0x2338] sm:$0xff]  ;;  %v1570_v32 = vld [vmem:[%s4649_s14 + $0x2330] sm:$0xff] }
 0x2c0   : > { %2979 = vmatprep.subr.mxu1 %v1147_v46  ;;  %2909 = vmatpush2.msra.mxu0 %v890_v47  ;;  %v1307_v33 = vld [vmem:[%s4649_s14 + $0x1af8] sm:$0xff]  ;;  %v1306_v35 = vld [vmem:[%s4649_s14 + $0x1af0] sm:$0xff] }
 0x2c1   : > { %2980 = vmatpush2.msra.mxu1 %v1146_v48  ;;  %2910 = vmatprep.subr.mxu0 %v883_v49  ;;  %v1563_v34 = vld [vmem:[%s4649_s14 + $0x22f8] sm:$0xff]  ;;  %v1562_v36 = vld [vmem:[%s4649_s14 + $0x22f0] sm:$0xff] }
 0x2c2   : > { %2981 = vmatprep.subr.mxu1 %v1139_v50  ;;  %2911 = vmatpush2.msra.mxu0 %v882_v51  ;;  %v1299_v37 = vld [vmem:[%s4649_s14 + $0x1ab8] sm:$0xff]  ;;  %v1298_v39 = vld [vmem:[%s4649_s14 + $0x1ab0] sm:$0xff] }
 0x2c3   : > { %2982 = vmatpush2.msra.mxu1 %v1138_v52  ;;  %2912 = vmatprep.subr.mxu0 %v875_v53  ;;  %v1555_v38 = vld [vmem:[%s4649_s14 + $0x22b8] sm:$0xff]  ;;  %v1554_v40 = vld [vmem:[%s4649_s14 + $0x22b0] sm:$0xff] }
 0x2c4   : > { %2983 = vmatprep.subr.mxu1 %v1131_v54  ;;  %2913 = vmatpush2.msra.mxu0 %v874_v55  ;;  %v1291_v41 = vld [vmem:[%s4649_s14 + $0x1a78] sm:$0xff]  ;;  %v1290_v43 = vld [vmem:[%s4649_s14 + $0x1a70] sm:$0xff] }
 0x2c5   : > { %2984 = vmatpush2.msra.mxu1 %v1130_v56  ;;  %2914 = vmatprep.subr.mxu0 %v867_v57  ;;  %v1547_v42 = vld [vmem:[%s4649_s14 + $0x2278] sm:$0xff]  ;;  %v1546_v44 = vld [vmem:[%s4649_s14 + $0x2270] sm:$0xff] }
 0x2c6   : > { %2985 = vmatprep.subr.mxu1 %v1123_v58  ;;  %2915 = vmatpush2.msra.mxu0 %v866_v59  ;;  %v1283_v45 = vld [vmem:[%s4649_s14 + $0x1a38] sm:$0xff]  ;;  %v1282_v47 = vld [vmem:[%s4649_s14 + $0x1a30] sm:$0xff] }
 0x2c7   : > { %2986 = vmatpush2.msra.mxu1 %v1122_v60  ;;  %2916 = vmatprep.subr.mxu0 %v859_v61  ;;  %v1539_v46 = vld [vmem:[%s4649_s14 + $0x2238] sm:$0xff]  ;;  %v1538_v48 = vld [vmem:[%s4649_s14 + $0x2230] sm:$0xff] }
 0x2c8   : > { %2987 = vmatprep.subr.mxu1 %v1115_v62  ;;  %2917 = vmatpush2.msra.mxu0 %v858_v63  ;;  %v1275_v49 = vld [vmem:[%s4649_s14 + $0x19f8] sm:$0xff]  ;;  %v1274_v51 = vld [vmem:[%s4649_s14 + $0x19f0] sm:$0xff] }
 0x2c9   : > { %2988 = vmatpush2.msra.mxu1 %v1114_v0  ;;  %2918 = vmatprep.subr.mxu0 %v851_v1  ;;  %v1531_v50 = vld [vmem:[%s4649_s14 + $0x21f8] sm:$0xff]  ;;  %v1530_v52 = vld [vmem:[%s4649_s14 + $0x21f0] sm:$0xff] }
 0x2ca   : > { %2989 = vmatprep.subr.mxu1 %v1107_v2  ;;  %2919 = vmatpush2.msra.mxu0 %v850_v3  ;;  %v1267_v53 = vld [vmem:[%s4649_s14 + $0x19b8] sm:$0xff]  ;;  %v1266_v55 = vld [vmem:[%s4649_s14 + $0x19b0] sm:$0xff] }
 0x2cb   : > { %2990 = vmatpush2.msra.mxu1 %v1106_v4  ;;  %2920 = vmatprep.subr.mxu0 %v843_v5  ;;  %v1523_v54 = vld [vmem:[%s4649_s14 + $0x21b8] sm:$0xff]  ;;  %v1522_v56 = vld [vmem:[%s4649_s14 + $0x21b0] sm:$0xff] }
 0x2cc   : > { %2991 = vmatprep.subr.mxu1 %v1099_v6  ;;  %2921 = vmatpush2.msra.mxu0 %v842_v7  ;;  %v1259_v57 = vld [vmem:[%s4649_s14 + $0x1978] sm:$0xff]  ;;  %v1258_v59 = vld [vmem:[%s4649_s14 + $0x1970] sm:$0xff] }
 0x2cd   : > { %2992 = vmatpush2.msra.mxu1 %v1098_v8  ;;  %2922 = vmatprep.subr.mxu0 %v835_v9  ;;  %v1515_v58 = vld [vmem:[%s4649_s14 + $0x2178] sm:$0xff]  ;;  %v1514_v60 = vld [vmem:[%s4649_s14 + $0x2170] sm:$0xff] }
 0x2ce   : > { %2993 = vmatprep.subr.mxu1 %v1091_v10  ;;  %2923 = vmatpush2.msra.mxu0 %v834_v11  ;;  %v1251_v61 = vld [vmem:[%s4649_s14 + $0x1938] sm:$0xff]  ;;  %v1250_v63 = vld [vmem:[%s4649_s14 + $0x1930] sm:$0xff] }
 0x2cf   : > { %2924 = vmatprep.mubr.f32.mxu0 %v4232_v14  ;;  %2994 = vmatpush2.msra.mxu1 %v1090_v12  ;;  %v1507_v62 = vld [vmem:[%s4649_s14 + $0x2138] sm:$0xff]  ;;  %v1506_v0 = vld [vmem:[%s4649_s14 + $0x2130] sm:$0xff] }
 0x2d0   : > { %2925 = vmatmul.mubr.f32.vlgmr.msra.gmra.mxu0 %v4233_v16  ;;  %2995 = vmatprep.mubr.f32.mxu1 %v4234_v19  ;;  %v1243_v1 = vld [vmem:[%s4649_s14 + $0x18f8] sm:$0xff]  ;;  %v1242_v3 = vld [vmem:[%s4649_s14 + $0x18f0] sm:$0xff] }
 0x2d1   : > { %3002 = vmatprep.subr.mxu0 %v1339_v13  ;;  %3073 = vmatprep.subr.mxu1 %v1595_v15  ;;  %v1499_v2 = vld [vmem:[%s4649_s14 + $0x20f8] sm:$0xff]  ;;  %v1498_v4 = vld [vmem:[%s4649_s14 + $0x20f0] sm:$0xff] }
 0x2d2   : > { %2996 = vmatmul.mubr.f32.vlgmr.msra.gmra.mxu1 %v4235_v22  ;;  %3003 = vmatpush1.msra.mxu0 %v1338_v17  ;;  %v1235_v5 = vld [vmem:[%s4649_s14 + $0x18b8] sm:$0xff]  ;;  %v1234_v7 = vld [vmem:[%s4649_s14 + $0x18b0] sm:$0xff] }
 0x2d3   : > { %3074 = vmatpush1.msra.mxu1 %v1594_v18  ;;  %3004 = vmatprep.subr.mxu0 %v1331_v20  ;;  %v1491_v6 = vld [vmem:[%s4649_s14 + $0x20b8] sm:$0xff]  ;;  %v1490_v8 = vld [vmem:[%s4649_s14 + $0x20b0] sm:$0xff] }
 0x2d4   : > { %3075 = vmatprep.subr.mxu1 %v1587_v21  ;;  %3005 = vmatpush1.msra.mxu0 %v1330_v23  ;;  %v1227_v9 = vld [vmem:[%s4649_s14 + $0x1878] sm:$0xff]  ;;  %v1226_v11 = vld [vmem:[%s4649_s14 + $0x1870] sm:$0xff] }
 0x2d5   : > { %3076 = vmatpush1.msra.mxu1 %v1586_v24  ;;  %3006 = vmatprep.subr.mxu0 %v1323_v25  ;;  %v1483_v10 = vld [vmem:[%s4649_s14 + $0x2078] sm:$0xff]  ;;  %v1482_v12 = vld [vmem:[%s4649_s14 + $0x2070] sm:$0xff] }
 0x2d6   : > { %3077 = vmatprep.subr.mxu1 %v1579_v26  ;;  %3007 = vmatpush1.msra.mxu0 %v1322_v27  ;;  %v1219_v13 = vld [vmem:[%s4649_s14 + $0x1838] sm:$0xff]  ;;  %v1218_v15 = vld [vmem:[%s4649_s14 + $0x1830] sm:$0xff] }
 0x2d7   : > { %3078 = vmatpush1.msra.mxu1 %v1578_v28  ;;  %3008 = vmatprep.subr.mxu0 %v1315_v29  ;;  %v1475_v14 = vld [vmem:[%s4649_s14 + $0x2038] sm:$0xff]  ;;  %v1474_v16 = vld [vmem:[%s4649_s14 + $0x2030] sm:$0xff] }
 0x2d8   : > { %3079 = vmatprep.subr.mxu1 %v1571_v30  ;;  %3009 = vmatpush1.msra.mxu0 %v1314_v31  ;;  %v1467_v17 = vld [vmem:[%s4649_s14 + $0x1ff8] sm:$0xff]  ;;  %v1466_v19 = vld [vmem:[%s4649_s14 + $0x1ff0] sm:$0xff] }
 0x2d9   : > { %3080 = vmatpush1.msra.mxu1 %v1570_v32  ;;  %3010 = vmatprep.subr.mxu0 %v1307_v33  ;;  %v1723_v18 = vld [vmem:[%s4649_s14 + $0x27f8] sm:$0xff]  ;;  %v1722_v20 = vld [vmem:[%s4649_s14 + $0x27f0] sm:$0xff] }
 0x2da   : > { %3081 = vmatprep.subr.mxu1 %v1563_v34  ;;  %3011 = vmatpush1.msra.mxu0 %v1306_v35  ;;  %v1459_v21 = vld [vmem:[%s4649_s14 + $0x1fb8] sm:$0xff]  ;;  %v1458_v23 = vld [vmem:[%s4649_s14 + $0x1fb0] sm:$0xff] }
 0x2db   : > { %3082 = vmatpush1.msra.mxu1 %v1562_v36  ;;  %3012 = vmatprep.subr.mxu0 %v1299_v37  ;;  %v1715_v22 = vld [vmem:[%s4649_s14 + $0x27b8] sm:$0xff]  ;;  %v1714_v24 = vld [vmem:[%s4649_s14 + $0x27b0] sm:$0xff] }
 0x2dc   : > { %3083 = vmatprep.subr.mxu1 %v1555_v38  ;;  %3013 = vmatpush1.msra.mxu0 %v1298_v39  ;;  %v1451_v25 = vld [vmem:[%s4649_s14 + $0x1f78] sm:$0xff]  ;;  %v1450_v27 = vld [vmem:[%s4649_s14 + $0x1f70] sm:$0xff] }
 0x2dd   : > { %3084 = vmatpush1.msra.mxu1 %v1554_v40  ;;  %3014 = vmatprep.subr.mxu0 %v1291_v41  ;;  %v1707_v26 = vld [vmem:[%s4649_s14 + $0x2778] sm:$0xff]  ;;  %v1706_v28 = vld [vmem:[%s4649_s14 + $0x2770] sm:$0xff] }
 0x2de   : > { %3085 = vmatprep.subr.mxu1 %v1547_v42  ;;  %3015 = vmatpush1.msra.mxu0 %v1290_v43  ;;  %v1443_v29 = vld [vmem:[%s4649_s14 + $0x1f38] sm:$0xff]  ;;  %v1442_v31 = vld [vmem:[%s4649_s14 + $0x1f30] sm:$0xff] }
 0x2df   : > { %3086 = vmatpush1.msra.mxu1 %v1546_v44  ;;  %3016 = vmatprep.subr.mxu0 %v1283_v45  ;;  %v1699_v30 = vld [vmem:[%s4649_s14 + $0x2738] sm:$0xff]  ;;  %v1698_v32 = vld [vmem:[%s4649_s14 + $0x2730] sm:$0xff] }
 0x2e0   : > { %3087 = vmatprep.subr.mxu1 %v1539_v46  ;;  %3017 = vmatpush1.msra.mxu0 %v1282_v47  ;;  %v1435_v33 = vld [vmem:[%s4649_s14 + $0x1ef8] sm:$0xff]  ;;  %v1434_v35 = vld [vmem:[%s4649_s14 + $0x1ef0] sm:$0xff] }
 0x2e1   : > { %3088 = vmatpush1.msra.mxu1 %v1538_v48  ;;  %3018 = vmatprep.subr.mxu0 %v1275_v49  ;;  %v1691_v34 = vld [vmem:[%s4649_s14 + $0x26f8] sm:$0xff]  ;;  %v1690_v36 = vld [vmem:[%s4649_s14 + $0x26f0] sm:$0xff] }
 0x2e2   : > { %3089 = vmatprep.subr.mxu1 %v1531_v50  ;;  %3019 = vmatpush1.msra.mxu0 %v1274_v51  ;;  %v1427_v37 = vld [vmem:[%s4649_s14 + $0x1eb8] sm:$0xff]  ;;  %v1426_v39 = vld [vmem:[%s4649_s14 + $0x1eb0] sm:$0xff] }
 0x2e3   : > { %3090 = vmatpush1.msra.mxu1 %v1530_v52  ;;  %3020 = vmatprep.subr.mxu0 %v1267_v53  ;;  %v1683_v38 = vld [vmem:[%s4649_s14 + $0x26b8] sm:$0xff]  ;;  %v1682_v40 = vld [vmem:[%s4649_s14 + $0x26b0] sm:$0xff] }
 0x2e4   : > { %3091 = vmatprep.subr.mxu1 %v1523_v54  ;;  %3021 = vmatpush1.msra.mxu0 %v1266_v55  ;;  %v1419_v41 = vld [vmem:[%s4649_s14 + $0x1e78] sm:$0xff]  ;;  %v1418_v43 = vld [vmem:[%s4649_s14 + $0x1e70] sm:$0xff] }
 0x2e5   : > { %3092 = vmatpush1.msra.mxu1 %v1522_v56  ;;  %3022 = vmatprep.subr.mxu0 %v1259_v57  ;;  %v1675_v42 = vld [vmem:[%s4649_s14 + $0x2678] sm:$0xff]  ;;  %v1674_v44 = vld [vmem:[%s4649_s14 + $0x2670] sm:$0xff] }
 0x2e6   : > { %3093 = vmatprep.subr.mxu1 %v1515_v58  ;;  %3023 = vmatpush1.msra.mxu0 %v1258_v59  ;;  %v1411_v45 = vld [vmem:[%s4649_s14 + $0x1e38] sm:$0xff]  ;;  %v1410_v47 = vld [vmem:[%s4649_s14 + $0x1e30] sm:$0xff] }
 0x2e7   : > { %3094 = vmatpush1.msra.mxu1 %v1514_v60  ;;  %3024 = vmatprep.subr.mxu0 %v1251_v61  ;;  %v1667_v46 = vld [vmem:[%s4649_s14 + $0x2638] sm:$0xff]  ;;  %v1666_v48 = vld [vmem:[%s4649_s14 + $0x2630] sm:$0xff] }
 0x2e8   : > { %3095 = vmatprep.subr.mxu1 %v1507_v62  ;;  %3025 = vmatpush1.msra.mxu0 %v1250_v63  ;;  %v1403_v49 = vld [vmem:[%s4649_s14 + $0x1df8] sm:$0xff]  ;;  %v1402_v51 = vld [vmem:[%s4649_s14 + $0x1df0] sm:$0xff] }
 0x2e9   : > { %3096 = vmatpush1.msra.mxu1 %v1506_v0  ;;  %3026 = vmatprep.subr.mxu0 %v1243_v1  ;;  %v1659_v50 = vld [vmem:[%s4649_s14 + $0x25f8] sm:$0xff]  ;;  %v1658_v52 = vld [vmem:[%s4649_s14 + $0x25f0] sm:$0xff] }
 0x2ea   : > { %3097 = vmatprep.subr.mxu1 %v1499_v2  ;;  %3027 = vmatpush1.msra.mxu0 %v1242_v3  ;;  %v1395_v53 = vld [vmem:[%s4649_s14 + $0x1db8] sm:$0xff]  ;;  %v1394_v55 = vld [vmem:[%s4649_s14 + $0x1db0] sm:$0xff] }
 0x2eb   : > { %3098 = vmatpush1.msra.mxu1 %v1498_v4  ;;  %3028 = vmatprep.subr.mxu0 %v1235_v5  ;;  %v1651_v54 = vld [vmem:[%s4649_s14 + $0x25b8] sm:$0xff]  ;;  %v1650_v56 = vld [vmem:[%s4649_s14 + $0x25b0] sm:$0xff] }
 0x2ec   : > { %3099 = vmatprep.subr.mxu1 %v1491_v6  ;;  %3029 = vmatpush1.msra.mxu0 %v1234_v7  ;;  %v1387_v57 = vld [vmem:[%s4649_s14 + $0x1d78] sm:$0xff]  ;;  %v1386_v59 = vld [vmem:[%s4649_s14 + $0x1d70] sm:$0xff] }
 0x2ed   : > { %3100 = vmatpush1.msra.mxu1 %v1490_v8  ;;  %3030 = vmatprep.subr.mxu0 %v1227_v9  ;;  %v1643_v58 = vld [vmem:[%s4649_s14 + $0x2578] sm:$0xff]  ;;  %v1642_v60 = vld [vmem:[%s4649_s14 + $0x2570] sm:$0xff] }
 0x2ee   : > { %3101 = vmatprep.subr.mxu1 %v1483_v10  ;;  %3031 = vmatpush1.msra.mxu0 %v1226_v11  ;;  %v1379_v61 = vld [vmem:[%s4649_s14 + $0x1d38] sm:$0xff]  ;;  %v1378_v63 = vld [vmem:[%s4649_s14 + $0x1d30] sm:$0xff] }
 0x2ef   : > { %3102 = vmatpush1.msra.mxu1 %v1482_v12  ;;  %3032 = vmatprep.subr.mxu0 %v1219_v13  ;;  %v1635_v62 = vld [vmem:[%s4649_s14 + $0x2538] sm:$0xff]  ;;  %v1634_v0 = vld [vmem:[%s4649_s14 + $0x2530] sm:$0xff] }
 0x2f0   : > { %3103 = vmatprep.subr.mxu1 %v1475_v14  ;;  %3033 = vmatpush1.msra.mxu0 %v1218_v15  ;;  %v1371_v1 = vld [vmem:[%s4649_s14 + $0x1cf8] sm:$0xff]  ;;  %v1370_v3 = vld [vmem:[%s4649_s14 + $0x1cf0] sm:$0xff] }
 0x2f1   : > { %3104 = vmatpush1.msra.mxu1 %v1474_v16  ;;  %3034 = vmatprep.subr.mxu0 %v1467_v17  ;;  %v1627_v2 = vld [vmem:[%s4649_s14 + $0x24f8] sm:$0xff]  ;;  %v1626_v4 = vld [vmem:[%s4649_s14 + $0x24f0] sm:$0xff] }
 0x2f2   : > { %3105 = vmatprep.subr.mxu1 %v1723_v18  ;;  %3035 = vmatpush2.msra.mxu0 %v1466_v19  ;;  %v1363_v5 = vld [vmem:[%s4649_s14 + $0x1cb8] sm:$0xff]  ;;  %v1362_v7 = vld [vmem:[%s4649_s14 + $0x1cb0] sm:$0xff]  ;;  %v4237_v18 = vld [vmem:[%s4671_s10 + $0x48] sm:$0xff] }
 0x2f3   : > { %3106 = vmatpush2.msra.mxu1 %v1722_v20  ;;  %3036 = vmatprep.subr.mxu0 %v1459_v21  ;;  %v1619_v6 = vld [vmem:[%s4649_s14 + $0x24b8] sm:$0xff]  ;;  %v1618_v8 = vld [vmem:[%s4649_s14 + $0x24b0] sm:$0xff]  ;;  %v4239_v20 = vld [vmem:[%s4671_s10 + $0x40] sm:$0xff]  ;;  %v2500_v21 = vpop.f32.mrf.mxu0 }
 0x2f4   : > { %3107 = vmatprep.subr.mxu1 %v1715_v22  ;;  %3037 = vmatpush2.msra.mxu0 %v1458_v23  ;;  %v1355_v9 = vld [vmem:[%s4649_s14 + $0x1c78] sm:$0xff]  ;;  %v1354_v11 = vld [vmem:[%s4649_s14 + $0x1c70] sm:$0xff]  ;;  %v2571_v22 = vpop.f32.mrf.mxu1 }
 0x2f5   : > { %3108 = vmatpush2.msra.mxu1 %v1714_v24  ;;  %3038 = vmatprep.subr.mxu0 %v1451_v25  ;;  %v1611_v10 = vld [vmem:[%s4649_s14 + $0x2478] sm:$0xff]  ;;  %v1610_v12 = vld [vmem:[%s4649_s14 + $0x2470] sm:$0xff]  ;;  %v2502_v23 = vpop.f32.mrf.mxu0 }
 0x2f6   : > { %3109 = vmatprep.subr.mxu1 %v1707_v26  ;;  %3039 = vmatpush2.msra.mxu0 %v1450_v27  ;;  %v1347_v13 = vld [vmem:[%s4649_s14 + $0x1c38] sm:$0xff]  ;;  %v1346_v15 = vld [vmem:[%s4649_s14 + $0x1c30] sm:$0xff]  ;;  %v2573_v25 = vpop.f32.mrf.mxu1  ;;  %v2572_v26 = vadd.f32 %v2571_v22, %v2500_v21 }
 0x2f7   : > { %3110 = vmatpush2.msra.mxu1 %v1706_v28  ;;  %3040 = vmatprep.subr.mxu0 %v1443_v29  ;;  %v1603_v14 = vld [vmem:[%s4649_s14 + $0x2438] sm:$0xff]  ;;  %v1602_v16 = vld [vmem:[%s4649_s14 + $0x2430] sm:$0xff]  ;;  %v2574_v29 = vadd.f32 %v2573_v25, %v2502_v23 }
 0x2f8   : > { %3111 = vmatprep.subr.mxu1 %v1699_v30  ;;  %3041 = vmatpush2.msra.mxu0 %v1442_v31  ;;  %v4236_v17 = vld [vmem:[%s4671_s10 + $0x38] sm:$0xff]  ;;  %v4238_v19 = vld [vmem:[%s4671_s10 + $0x30] sm:$0xff] }
 0x2f9   : > { %3112 = vmatpush2.msra.mxu1 %v1698_v32  ;;  %3042 = vmatprep.subr.mxu0 %v1435_v33 }
 0x2fa   : > { %3113 = vmatprep.subr.mxu1 %v1691_v34  ;;  %3043 = vmatpush2.msra.mxu0 %v1434_v35  ;;  %v430_v34 = vld [vmem:[#allocation2 + $0x8] sm:$0xff] }
 0x2fb   : > { %3114 = vmatpush2.msra.mxu1 %v1690_v36  ;;  %3044 = vmatprep.subr.mxu0 %v1427_v37 }
 0x2fc   : > { %3115 = vmatprep.subr.mxu1 %v1683_v38  ;;  %3045 = vmatpush2.msra.mxu0 %v1426_v39  ;;  %v431_v38 = vld [vmem:[#allocation2 + $0x20] sm:$0xff] }
 0x2fd   : > { %3116 = vmatpush2.msra.mxu1 %v1682_v40  ;;  %3046 = vmatprep.subr.mxu0 %v1419_v41 }
 0x2fe   : > { %3117 = vmatprep.subr.mxu1 %v1675_v42  ;;  %3047 = vmatpush2.msra.mxu0 %v1418_v43 }
 0x2ff   : > { %3118 = vmatpush2.msra.mxu1 %v1674_v44  ;;  %3048 = vmatprep.subr.mxu0 %v1411_v45 }
 0x300   : > { %3119 = vmatprep.subr.mxu1 %v1667_v46  ;;  %3049 = vmatpush2.msra.mxu0 %v1410_v47 }
 0x301   : > { %3120 = vmatpush2.msra.mxu1 %v1666_v48  ;;  %3050 = vmatprep.subr.mxu0 %v1403_v49 }
 0x302   : > { %3121 = vmatprep.subr.mxu1 %v1659_v50  ;;  %3051 = vmatpush2.msra.mxu0 %v1402_v51 }
 0x303   : > { %3122 = vmatpush2.msra.mxu1 %v1658_v52  ;;  %3052 = vmatprep.subr.mxu0 %v1395_v53 }
 0x304   : > { %3123 = vmatprep.subr.mxu1 %v1651_v54  ;;  %3053 = vmatpush2.msra.mxu0 %v1394_v55 }
 0x305   : > { %3124 = vmatpush2.msra.mxu1 %v1650_v56  ;;  %3054 = vmatprep.subr.mxu0 %v1387_v57  ;;  %v432_v56 = vld [vmem:[#allocation2 + $0x28] sm:$0xff] }
 0x306   : > { %3125 = vmatprep.subr.mxu1 %v1643_v58  ;;  %3055 = vmatpush2.msra.mxu0 %v1386_v59 }
 0x307   : > { %3126 = vmatpush2.msra.mxu1 %v1642_v60  ;;  %3056 = vmatprep.subr.mxu0 %v1379_v61  ;;  %v433_v60 = vld [vmem:[#allocation2 + $0x38] sm:$0xff] }
 0x308   : > { %3127 = vmatprep.subr.mxu1 %v1635_v62  ;;  %3057 = vmatpush2.msra.mxu0 %v1378_v63 }
 0x309   : > { %3128 = vmatpush2.msra.mxu1 %v1634_v0  ;;  %3058 = vmatprep.subr.mxu0 %v1371_v1 }
 0x30a   : > { %3129 = vmatprep.subr.mxu1 %v1627_v2  ;;  %3059 = vmatpush2.msra.mxu0 %v1370_v3 }
 0x30b   : > { %3130 = vmatpush2.msra.mxu1 %v1626_v4  ;;  %3060 = vmatprep.subr.mxu0 %v1363_v5 }
 0x30c   : > { %3131 = vmatprep.subr.mxu1 %v1619_v6  ;;  %3061 = vmatpush2.msra.mxu0 %v1362_v7  ;;  %v2642_v24 = vpop.f32.mrf.mxu0 }
 0x30d   : > { %3132 = vmatpush2.msra.mxu1 %v1618_v8  ;;  %3062 = vmatprep.subr.mxu0 %v1355_v9  ;;  %v2643_v30 = vadd.f32 %v2642_v24, %v2572_v26 }
 0x30e   : > { %3133 = vmatprep.subr.mxu1 %v1611_v10  ;;  %3063 = vmatpush2.msra.mxu0 %v1354_v11  ;;  %v2713_v27 = vpop.f32.mrf.mxu1  ;;  %v2644_v28 = vpop.f32.mrf.mxu0 }
 0x30f   : > { %3134 = vmatpush2.msra.mxu1 %v1610_v12  ;;  %3064 = vmatprep.subr.mxu0 %v1347_v13  ;;  %v2645_v31 = vadd.f32 %v2644_v28, %v2574_v29  ;;  %v2714_v33 = vadd.f32 %v2713_v27, %v2643_v30 }
 0x310   : > { %3135 = vmatprep.subr.mxu1 %v1603_v14  ;;  %3065 = vmatpush2.msra.mxu0 %v1346_v15  ;;  %v2715_v32 = vpop.f32.mrf.mxu1 }
 0x311   : > { %3066 = vmatprep.mubr.f32.mxu0 %v4236_v17  ;;  %3136 = vmatpush2.msra.mxu1 %v1602_v16  ;;  %v2716_v36 = vadd.f32 %v2715_v32, %v2645_v31 }
 0x312   : > { %3137 = vmatprep.mubr.f32.mxu1 %v4237_v18  ;;  %3067 = vmatmul.mubr.f32.vlgmr.msra.gmra.mxu0 %v4238_v19 }
 0x313   : > { %3138 = vmatmul.mubr.f32.vlgmr.msra.gmra.mxu1 %v4239_v20 }
 0x34e   : > { %v2784_v35 = vpop.f32.mrf.mxu0 }
 0x34f   : > { %v2785_v37 = vadd.f32 %v2784_v35, %v2714_v33 }
 0x350   : > { %v2786_v39 = vpop.f32.mrf.mxu0  ;;  %v2855_v43 = vpop.f32.mrf.mxu1 }
 0x351   : > { %v3148_v40 = vadd.f32 %v2785_v37, %v430_v34  ;;  %v2787_v41 = vadd.f32 %v2786_v39, %v2716_v36 }
 0x352   : > { %v2857_v45 = vpop.f32.mrf.mxu1 }
 0x353   : > { %3156 = vst [vmem:[#allocation2 + $0x8] sm:$0xff] %v3148_v40  ;;  %v3149_v42 = vadd.f32 %v2787_v41, %v431_v38 }
 0x355   : > { %3157 = vst [vmem:[#allocation2 + $0x20] sm:$0xff] %v3149_v42 }
 0x390   : > { %v2926_v44 = vpop.f32.mrf.mxu0 }
 0x391   : > { %v2927_v48 = vadd.f32 %v2926_v44, %v2855_v43 }
 0x392   : > { %v2997_v46 = vpop.f32.mrf.mxu1  ;;  %v2928_v47 = vpop.f32.mrf.mxu0 }
 0x393   : > { %v2929_v49 = vadd.f32 %v2928_v47, %v2857_v45  ;;  %v2998_v51 = vadd.f32 %v2997_v46, %v2927_v48 }
 0x394   : > { %v2999_v50 = vpop.f32.mrf.mxu1 }
 0x395   : > { %v3000_v54 = vadd.f32 %v2999_v50, %v2929_v49 }
 0x3d2   : > { %v3068_v52 = vpop.f32.mrf.mxu0 }
 0x3d3   : > { %v3139_v53 = vpop.f32.mrf.mxu1  ;;  %v3069_v55 = vadd.f32 %v3068_v52, %v2998_v51 }
 0x3d4   : > { %v3070_v57 = vpop.f32.mrf.mxu0 }
 0x3d5   : > { %v3140_v58 = vadd.f32 %v3139_v53, %v3069_v55  ;;  %v3071_v59 = vadd.f32 %v3070_v57, %v3000_v54  ;;  %v3141_v61 = vpop.f32.mrf.mxu1 }
 0x3d7   : > { %v3150_v62 = vadd.f32 %v3140_v58, %v432_v56  ;;  %v3142_v63 = vadd.f32 %v3141_v61, %v3071_v59  ;;  %3163 = sbr.rel (%p3894_p13) target bundleno = 1456 (0x5b0), region = 80 }
 0x3d9   : > { %3158 = vst [vmem:[#allocation2 + $0x28] sm:$0xff] %v3150_v62  ;;  %v3151_v0 = vadd.f32 %v3142_v63, %v433_v60 }
 0x3db   : > { %3159 = vst [vmem:[#allocation2 + $0x38] sm:$0xff] %v3151_v0 }
 0x3dc   : > { %v3261_v1 = vld [vmem:[#allocation7 + $0xf8] sm:$0xff]  ;;  %v3260_v5 = vld [vmem:[#allocation7 + $0xf0] sm:$0xff]  ;;  %v3259_v9 = vld [vmem:[#allocation7 + $0xe8] sm:$0xff]  ;;  %v3174_v27 = vlaneseq  ;;  %vm4474_vm0 = vmmov 0  }
 0x3dd   : > { %v3293_v2 = vld [vmem:[#allocation7 + $0x1f8] sm:$0xff]  ;;  %3903 = vmatprep.subr.mxu0 %v3261_v1  ;;  %v3292_v6 = vld [vmem:[#allocation7 + $0x1f0] sm:$0xff]  ;;  %v3291_v10 = vld [vmem:[#allocation7 + $0x1e8] sm:$0xff] }
 0x3de   : > { %v3245_v3 = vld [vmem:[#allocation7 + $0x78] sm:$0xff]  ;;  %3938 = vmatprep.subr.mxu1 %v3293_v2  ;;  %v3244_v7 = vld [vmem:[#allocation7 + $0x70] sm:$0xff]  ;;  %v3243_v11 = vld [vmem:[#allocation7 + $0x68] sm:$0xff]  ;;  %v5995_v36 = vshrl.u32 %v3174_v27, 7 }
 0x3df   : > { %v3277_v4 = vld [vmem:[#allocation7 + $0x178] sm:$0xff]  ;;  %3904 = vmatpush3.msra.mxu0 %v3245_v3  ;;  %v3276_v8 = vld [vmem:[#allocation7 + $0x170] sm:$0xff]  ;;  %v3275_v12 = vld [vmem:[#allocation7 + $0x168] sm:$0xff] }
 0x3e0   : > { %3939 = vmatpush3.msra.mxu1 %v3277_v4  ;;  %3905 = vmatprep.subr.mxu0 %v3260_v5  ;;  %v3258_v13 = vld [vmem:[#allocation7 + $0xe0] sm:$0xff]  ;;  %v3257_v17 = vld [vmem:[#allocation7 + $0xd8] sm:$0xff]  ;;  %v3256_v21 = vld [vmem:[#allocation7 + $0xd0] sm:$0xff]  ;;  %v3180_v45 = vsub.s32 1, %v5995_v36  ;;  %v3176_v46 = vsub.s32 0, %v5995_v36  ;;  %v3188_v47 = vsub.s32 3, %v5995_v36 }
 0x3e1   : > { %3940 = vmatprep.subr.mxu1 %v3292_v6  ;;  %3906 = vmatpush3.msra.mxu0 %v3244_v7  ;;  %v3290_v14 = vld [vmem:[#allocation7 + $0x1e0] sm:$0xff]  ;;  %v3289_v18 = vld [vmem:[#allocation7 + $0x1d8] sm:$0xff]  ;;  %v3288_v22 = vld [vmem:[#allocation7 + $0x1d0] sm:$0xff]  ;;  %v3184_v50 = vsub.s32 2, %v5995_v36 }
 0x3e2   : > { %3941 = vmatpush3.msra.mxu1 %v3276_v8  ;;  %3907 = vmatprep.subr.mxu0 %v3259_v9  ;;  %v3242_v15 = vld [vmem:[#allocation7 + $0x60] sm:$0xff]  ;;  %v3241_v19 = vld [vmem:[#allocation7 + $0x58] sm:$0xff]  ;;  %v3240_v23 = vld [vmem:[#allocation7 + $0x50] sm:$0xff] }
 0x3e3   : > { %3942 = vmatprep.subr.mxu1 %v3291_v10  ;;  %v3274_v16 = vld [vmem:[#allocation7 + $0x160] sm:$0xff]  ;;  %3908 = vmatpush3.msra.mxu0 %v3243_v11  ;;  %v3273_v20 = vld [vmem:[#allocation7 + $0x158] sm:$0xff]  ;;  %v3272_v24 = vld [vmem:[#allocation7 + $0x150] sm:$0xff] }
 0x3e4   : > { %3943 = vmatpush3.msra.mxu1 %v3275_v12  ;;  %3909 = vmatprep.subr.mxu0 %v3258_v13  ;;  %v3255_v25 = vld [vmem:[#allocation7 + $0xc8] sm:$0xff]  ;;  %v3254_v30 = vld [vmem:[#allocation7 + $0xc0] sm:$0xff]  ;;  %v3253_v34 = vld [vmem:[#allocation7 + $0xb8] sm:$0xff] }
 0x3e5   : > { %3944 = vmatprep.subr.mxu1 %v3290_v14  ;;  %3910 = vmatpush3.msra.mxu0 %v3242_v15  ;;  %v3287_v26 = vld [vmem:[#allocation7 + $0x1c8] sm:$0xff]  ;;  %v3286_v31 = vld [vmem:[#allocation7 + $0x1c0] sm:$0xff]  ;;  %v3285_v35 = vld [vmem:[#allocation7 + $0x1b8] sm:$0xff] }
 0x3e6   : > { %3945 = vmatpush3.msra.mxu1 %v3274_v16  ;;  %3911 = vmatprep.subr.mxu0 %v3257_v17  ;;  %v3239_v28 = vld [vmem:[#allocation7 + $0x48] sm:$0xff]  ;;  %v3238_v32 = vld [vmem:[#allocation7 + $0x40] sm:$0xff]  ;;  %v3237_v37 = vld [vmem:[#allocation7 + $0x38] sm:$0xff] }
 0x3e7   : > { %3946 = vmatprep.subr.mxu1 %v3289_v18  ;;  %3912 = vmatpush3.msra.mxu0 %v3241_v19  ;;  %v3271_v29 = vld [vmem:[#allocation7 + $0x148] sm:$0xff]  ;;  %v3270_v33 = vld [vmem:[#allocation7 + $0x140] sm:$0xff]  ;;  %v3269_v38 = vld [vmem:[#allocation7 + $0x138] sm:$0xff] }
 0x3e8   : > { %3947 = vmatpush3.msra.mxu1 %v3273_v20  ;;  %3913 = vmatprep.subr.mxu0 %v3256_v21  ;;  %v3252_v39 = vld [vmem:[#allocation7 + $0xb0] sm:$0xff]  ;;  %v3251_v43 = vld [vmem:[#allocation7 + $0xa8] sm:$0xff]  ;;  %v3250_v51 = vld [vmem:[#allocation7 + $0xa0] sm:$0xff] }
 0x3e9   : > { %3948 = vmatprep.subr.mxu1 %v3288_v22  ;;  %3914 = vmatpush3.msra.mxu0 %v3240_v23  ;;  %v3284_v40 = vld [vmem:[#allocation7 + $0x1b0] sm:$0xff]  ;;  %v3283_v44 = vld [vmem:[#allocation7 + $0x1a8] sm:$0xff]  ;;  %v3282_v52 = vld [vmem:[#allocation7 + $0x1a0] sm:$0xff] }
 0x3ea   : > { %3949 = vmatpush3.msra.mxu1 %v3272_v24  ;;  %3915 = vmatprep.subr.mxu0 %v3255_v25  ;;  %v3236_v41 = vld [vmem:[#allocation7 + $0x30] sm:$0xff]  ;;  %v3235_v48 = vld [vmem:[#allocation7 + $0x28] sm:$0xff]  ;;  %v3234_v53 = vld [vmem:[#allocation7 + $0x20] sm:$0xff] }
 0x3eb   : > { %3950 = vmatprep.subr.mxu1 %v3287_v26  ;;  %3916 = vmatpush3.msra.mxu0 %v3239_v28  ;;  %v3268_v42 = vld [vmem:[#allocation7 + $0x130] sm:$0xff]  ;;  %v3267_v49 = vld [vmem:[#allocation7 + $0x128] sm:$0xff]  ;;  %v3266_v54 = vld [vmem:[#allocation7 + $0x120] sm:$0xff] }
 0x3ec   : > { %3951 = vmatpush3.msra.mxu1 %v3271_v29  ;;  %3917 = vmatprep.subr.mxu0 %v3254_v30  ;;  %v3165_v55 = vld [vmem:[#allocation2] sm:$0xff]  ;;  %v3164_v60 = vld [vmem:[#allocation2 + $0x30] sm:$0xff]  ;;  %v3248_v3 = vld [vmem:[#allocation7 + $0x90] sm:$0xff] }
 0x3ed   : > { %3952 = vmatprep.subr.mxu1 %v3286_v31  ;;  %3918 = vmatpush3.msra.mxu0 %v3238_v32  ;;  %v6001_v56 = vld [vmem:[#allocation5] sm:$0xff]  ;;  %v3167_v1 = vld [vmem:[#allocation2 + $0x10] sm:$0xff]  ;;  %v3280_v4 = vld [vmem:[#allocation7 + $0x190] sm:$0xff] }
 0x3ee   : > { %3953 = vmatpush3.msra.mxu1 %v3270_v33  ;;  %3919 = vmatprep.subr.mxu0 %v3253_v34  ;;  %v3249_v57 = vld [vmem:[#allocation7 + $0x98] sm:$0xff]  ;;  %v3181_v59 = vrot.slane %v6001_v56, %v3180_v45  ;;  %v3177_v61 = vrot.slane %v6001_v56, %v3176_v46  ;;  %v3189_v62 = vrot.slane %v6001_v56, %v3188_v47  ;;  %v3166_v6 = vld [vmem:[#allocation2 + $0x18] sm:$0xff]  ;;  %v3247_v10 = vld [vmem:[#allocation7 + $0x88] sm:$0xff] }
 0x3ef   : > { %3954 = vmatprep.subr.mxu1 %v3285_v35  ;;  %3920 = vmatpush3.msra.mxu0 %v3237_v37  ;;  %v3281_v58 = vld [vmem:[#allocation7 + $0x198] sm:$0xff]  ;;  %v3185_v2 = vrot.slane %v6001_v56, %v3184_v50  ;;  %v3232_v7 = vld [vmem:[#allocation7 + $0x10] sm:$0xff]  ;;  %v3279_v11 = vld [vmem:[#allocation7 + $0x188] sm:$0xff] }
 0x3f0   : > { %3955 = vmatpush3.msra.mxu1 %v3269_v38  ;;  %3921 = vmatprep.subr.mxu0 %v3252_v39  ;;  %v3233_v63 = vld [vmem:[#allocation7 + $0x18] sm:$0xff]  ;;  %v3215_v5 = vadd.f32 %v3181_v59, %v3165_v55  ;;  %v3264_v8 = vld [vmem:[#allocation7 + $0x110] sm:$0xff]  ;;  %v3214_v9 = vadd.f32 %v3177_v61, %v3164_v60  ;;  %v3217_v12 = vadd.f32 %v3189_v62, %v3167_v1  ;;  %v3231_v13 = vld [vmem:[#allocation7 + $0x8] sm:$0xff] }
 0x3f1   : > { %3956 = vmatprep.subr.mxu1 %v3284_v40  ;;  %3922 = vmatpush3.msra.mxu0 %v3236_v41  ;;  %v3265_v0 = vld [vmem:[#allocation7 + $0x118] sm:$0xff]  ;;  %v3263_v14 = vld [vmem:[#allocation7 + $0x108] sm:$0xff]  ;;  %v3216_v15 = vadd.f32 %v3185_v2, %v3166_v6  ;;  %v3246_v16 = vld [vmem:[#allocation7 + $0x80] sm:$0xff]  ;;  %v3192_v6 = vsub.s32 4, %v5995_v36 }
 0x3f2   : > { %3957 = vmatpush3.msra.mxu1 %v3268_v42  ;;  %3923 = vmatprep.subr.mxu0 %v3251_v43  ;;  %v3278_v17 = vld [vmem:[#allocation7 + $0x180] sm:$0xff]  ;;  %v3223_v18 = vmax.f32 %v3215_v5, 0.0  ;;  %v3222_v20 = vmax.f32 %v3214_v9, 0.0  ;;  %v3225_v22 = vmax.f32 %v3217_v12, 0.0  ;;  %v3325_v23 = vld [vmem:[#allocation7 + $0x2f8] sm:$0xff]  ;;  %v3324_v28 = vld [vmem:[#allocation7 + $0x2f0] sm:$0xff] }
 0x3f3   : > { %3958 = vmatprep.subr.mxu1 %v3283_v44  ;;  %3924 = vmatpush3.msra.mxu0 %v3235_v48  ;;  %v3230_v19 = vld [vmem:[#allocation7] sm:$0xff]  ;;  %v3224_v24 = vmax.f32 %v3216_v15, 0.0  ;;  %v3357_v25 = vld [vmem:[#allocation7 + $0x3f8] sm:$0xff]  ;;  %v3356_v29 = vld [vmem:[#allocation7 + $0x3f0] sm:$0xff] }
 0x3f4   : > { %3959 = vmatpush3.msra.mxu1 %v3267_v49  ;;  %3925 = vmatprep.subr.mxu0 %v3250_v51  ;;  %v3262_v21 = vld [vmem:[#allocation7 + $0x100] sm:$0xff]  ;;  %v3309_v26 = vld [vmem:[#allocation7 + $0x278] sm:$0xff]  ;;  %v3308_v30 = vld [vmem:[#allocation7 + $0x270] sm:$0xff] }
 0x3f5   : > { %3960 = vmatprep.subr.mxu1 %v3282_v52  ;;  %3926 = vmatpush3.msra.mxu0 %v3234_v53  ;;  %v3341_v27 = vld [vmem:[#allocation7 + $0x378] sm:$0xff]  ;;  %v3340_v31 = vld [vmem:[#allocation7 + $0x370] sm:$0xff]  ;;  %v3323_v32 = vld [vmem:[#allocation7 + $0x2e8] sm:$0xff] }
 0x3f6   : > { %3961 = vmatpush3.msra.mxu1 %v3266_v54  ;;  %3927 = vmatprep.subr.mxu0 %v3249_v57  ;;  %v3355_v33 = vld [vmem:[#allocation7 + $0x3e8] sm:$0xff]  ;;  %v3322_v37 = vld [vmem:[#allocation7 + $0x2e0] sm:$0xff]  ;;  %v3321_v41 = vld [vmem:[#allocation7 + $0x2d8] sm:$0xff] }
 0x3f7   : > { %3962 = vmatprep.subr.mxu1 %v3281_v58  ;;  %3928 = vmatpush3.msra.mxu0 %v3233_v63  ;;  %v3307_v34 = vld [vmem:[#allocation7 + $0x268] sm:$0xff]  ;;  %v3354_v38 = vld [vmem:[#allocation7 + $0x3e0] sm:$0xff]  ;;  %v3353_v42 = vld [vmem:[#allocation7 + $0x3d8] sm:$0xff] }
 0x3f8   : > { %3963 = vmatpush3.msra.mxu1 %v3265_v0  ;;  %3929 = vmatprep.subr.mxu0 %v3248_v3  ;;  %v3339_v35 = vld [vmem:[#allocation7 + $0x368] sm:$0xff]  ;;  %v3306_v39 = vld [vmem:[#allocation7 + $0x260] sm:$0xff]  ;;  %v3305_v43 = vld [vmem:[#allocation7 + $0x258] sm:$0xff]  ;;  %v3196_v0 = vsub.s32 5, %v5995_v36  ;;  %v3204_v3 = vsub.s32 7, %v5995_v36 }
 0x3f9   : > { %3964 = vmatprep.subr.mxu1 %v3280_v4  ;;  %3930 = vmatpush3.msra.mxu0 %v3232_v7  ;;  %v3338_v40 = vld [vmem:[#allocation7 + $0x360] sm:$0xff]  ;;  %v3337_v44 = vld [vmem:[#allocation7 + $0x358] sm:$0xff]  ;;  %v3320_v45 = vld [vmem:[#allocation7 + $0x2d0] sm:$0xff]  ;;  %v3200_v7 = vsub.s32 6, %v5995_v36 }
 0x3fa   : > { %3965 = vmatpush3.msra.mxu1 %v3264_v8  ;;  %3931 = vmatprep.subr.mxu0 %v3247_v10  ;;  %v3352_v46 = vld [vmem:[#allocation7 + $0x3d0] sm:$0xff]  ;;  %v3319_v49 = vld [vmem:[#allocation7 + $0x2c8] sm:$0xff]  ;;  %v3318_v53 = vld [vmem:[#allocation7 + $0x2c0] sm:$0xff] }
 0x3fb   : > { %3966 = vmatprep.subr.mxu1 %v3279_v11  ;;  %3932 = vmatpush3.msra.mxu0 %v3231_v13  ;;  %v3304_v47 = vld [vmem:[#allocation7 + $0x250] sm:$0xff]  ;;  %v3351_v50 = vld [vmem:[#allocation7 + $0x3c8] sm:$0xff]  ;;  %v3350_v54 = vld [vmem:[#allocation7 + $0x3c0] sm:$0xff]  ;;  %v3197_v13 = vrot.slane %v6001_v56, %v3196_v0 }
 0x3fc   : > { %3967 = vmatpush3.msra.mxu1 %v3263_v14  ;;  %3933 = vmatprep.subr.mxu0 %v3246_v16  ;;  %v3336_v48 = vld [vmem:[#allocation7 + $0x350] sm:$0xff]  ;;  %v3303_v51 = vld [vmem:[#allocation7 + $0x248] sm:$0xff]  ;;  %v3302_v55 = vld [vmem:[#allocation7 + $0x240] sm:$0xff] }
 0x3fd   : > { %3968 = vmatprep.subr.mxu1 %v3278_v17  ;;  %3934 = vmatpush3.msra.mxu0 %v3230_v19  ;;  %v3335_v52 = vld [vmem:[#allocation7 + $0x348] sm:$0xff]  ;;  %v3334_v57 = vld [vmem:[#allocation7 + $0x340] sm:$0xff]  ;;  %v3317_v58 = vld [vmem:[#allocation7 + $0x2b8] sm:$0xff]  ;;  %v3205_v17 = vrot.slane %v6001_v56, %v3204_v3 }
 0x3fe   : > { %3429 = vmatprep.mubr.f32.mxu0 %v3223_v18  ;;  %3969 = vmatpush3.msra.mxu1 %v3262_v21  ;;  %v3349_v59 = vld [vmem:[#allocation7 + $0x3b8] sm:$0xff]  ;;  %v3316_v62 = vld [vmem:[#allocation7 + $0x2b0] sm:$0xff]  ;;  %v3315_v4 = vld [vmem:[#allocation7 + $0x2a8] sm:$0xff]  ;;  %v3201_v21 = vrot.slane %v6001_v56, %v3200_v7 }
 0x3ff   : > { %3430 = vmatmul.mubr.f32.vlgmr.msra.gmra.mxu0 %v3222_v20  ;;  %3499 = vmatprep.mubr.f32.mxu1 %v3225_v22  ;;  %v3301_v60 = vld [vmem:[#allocation7 + $0x238] sm:$0xff]  ;;  %v3348_v63 = vld [vmem:[#allocation7 + $0x3b0] sm:$0xff]  ;;  %v3347_v5 = vld [vmem:[#allocation7 + $0x3a8] sm:$0xff]  ;;  %v3193_v20 = vrot.slane %v6001_v56, %v3192_v6 }
 0x400   : > { %3973 = vmatprep.subr.mxu0 %v3325_v23  ;;  %4008 = vmatprep.subr.mxu1 %v3357_v25  ;;  %v3333_v61 = vld [vmem:[#allocation7 + $0x338] sm:$0xff]  ;;  %v3300_v1 = vld [vmem:[#allocation7 + $0x230] sm:$0xff]  ;;  %v3299_v8 = vld [vmem:[#allocation7 + $0x228] sm:$0xff] }
 0x401   : > { %3500 = vmatmul.mubr.f32.vlgmr.msra.gmra.mxu1 %v3224_v24  ;;  %3974 = vmatpush3.msra.mxu0 %v3309_v26  ;;  %v3332_v2 = vld [vmem:[#allocation7 + $0x330] sm:$0xff]  ;;  %v3331_v9 = vld [vmem:[#allocation7 + $0x328] sm:$0xff]  ;;  %v3314_v10 = vld [vmem:[#allocation7 + $0x2a0] sm:$0xff] }
 0x402   : > { %4009 = vmatpush3.msra.mxu1 %v3341_v27  ;;  %3975 = vmatprep.subr.mxu0 %v3324_v28  ;;  %v3346_v11 = vld [vmem:[#allocation7 + $0x3a0] sm:$0xff]  ;;  %v3313_v15 = vld [vmem:[#allocation7 + $0x298] sm:$0xff]  ;;  %v3171_v19 = vld [vmem:[#allocation2 + $0x38] sm:$0xff] }
 0x403   : > { %4010 = vmatprep.subr.mxu1 %v3356_v29  ;;  %3976 = vmatpush3.msra.mxu0 %v3308_v30  ;;  %v3298_v12 = vld [vmem:[#allocation7 + $0x220] sm:$0xff]  ;;  %v3169_v16 = vld [vmem:[#allocation2 + $0x20] sm:$0xff]  ;;  %v3312_v25 = vld [vmem:[#allocation7 + $0x290] sm:$0xff]  ;;  %v3221_v30 = vadd.f32 %v3205_v17, %v3171_v19 }
 0x404   : > { %4011 = vmatpush3.msra.mxu1 %v3340_v31  ;;  %3977 = vmatprep.subr.mxu0 %v3323_v32  ;;  %v3330_v14 = vld [vmem:[#allocation7 + $0x320] sm:$0xff]  ;;  %v3345_v36 = vld [vmem:[#allocation7 + $0x398] sm:$0xff]  ;;  %v3344_v26 = vld [vmem:[#allocation7 + $0x390] sm:$0xff]  ;;  %v3219_v27 = vadd.f32 %v3197_v13, %v3169_v16 }
 0x405   : > { %4012 = vmatprep.subr.mxu1 %v3355_v33  ;;  %3978 = vmatpush3.msra.mxu0 %v3307_v34  ;;  %v3297_v18 = vld [vmem:[#allocation7 + $0x218] sm:$0xff]  ;;  %v3168_v23 = vld [vmem:[#allocation2 + $0x8] sm:$0xff]  ;;  %v3296_v28 = vld [vmem:[#allocation7 + $0x210] sm:$0xff] }
 0x406   : > { %4013 = vmatpush3.msra.mxu1 %v3339_v35  ;;  %3979 = vmatprep.subr.mxu0 %v3322_v37  ;;  %v3329_v22 = vld [vmem:[#allocation7 + $0x318] sm:$0xff]  ;;  %v3170_v24 = vld [vmem:[#allocation2 + $0x28] sm:$0xff]  ;;  %v3328_v29 = vld [vmem:[#allocation7 + $0x310] sm:$0xff]  ;;  %v3218_v56 = vadd.f32 %v3193_v20, %v3168_v23 }
 0x407   : > { %4014 = vmatprep.subr.mxu1 %v3354_v38  ;;  %3980 = vmatpush3.msra.mxu0 %v3306_v39  ;;  %v3311_v31 = vld [vmem:[#allocation7 + $0x288] sm:$0xff]  ;;  %v3220_v33 = vadd.f32 %v3201_v21, %v3170_v24  ;;  %v3310_v37 = vld [vmem:[#allocation7 + $0x280] sm:$0xff]  ;;  %v3227_v39 = vmax.f32 %v3219_v27, 0.0 }
 0x408   : > { %4015 = vmatpush3.msra.mxu1 %v3338_v40  ;;  %3981 = vmatprep.subr.mxu0 %v3321_v41  ;;  %v3343_v32 = vld [vmem:[#allocation7 + $0x388] sm:$0xff]  ;;  %v3342_v38 = vld [vmem:[#allocation7 + $0x380] sm:$0xff]  ;;  %v3229_v41 = vmax.f32 %v3221_v30, 0.0 }
 0x409   : > { %4016 = vmatprep.subr.mxu1 %v3353_v42  ;;  %3982 = vmatpush3.msra.mxu0 %v3305_v43  ;;  %v3295_v34 = vld [vmem:[#allocation7 + $0x208] sm:$0xff]  ;;  %v3294_v40 = vld [vmem:[#allocation7 + $0x200] sm:$0xff]  ;;  %v3226_v43 = vmax.f32 %v3218_v56, 0.0 }
 0x40a   : > { %4017 = vmatpush3.msra.mxu1 %v3337_v44  ;;  %3983 = vmatprep.subr.mxu0 %v3320_v45  ;;  %v3327_v35 = vld [vmem:[#allocation7 + $0x308] sm:$0xff]  ;;  %v3326_v42 = vld [vmem:[#allocation7 + $0x300] sm:$0xff]  ;;  %v3228_v44 = vmax.f32 %v3220_v33, 0.0 }
 0x40b   : > { %4018 = vmatprep.subr.mxu1 %v3352_v46  ;;  %3984 = vmatpush3.msra.mxu0 %v3304_v47  ;;  %v3661_v45 = vld [vmem:[#allocation10 + $0x78] sm:$0xff]  ;;  %v4473_v46 = vmov 0.0   ;;  %v3660_v47 = vld [vmem:[#allocation10 + $0x70] sm:$0xff]  ;;  %v3896_v17 = vld [vmem:[#allocation11] ss:$0 sm:$0xff] }
 0x40c   : > { %4019 = vmatpush3.msra.mxu1 %v3336_v48  ;;  %3985 = vmatprep.subr.mxu0 %v3319_v49  ;;  %v3659_v48 = vld [vmem:[#allocation10 + $0x68] sm:$0xff]  ;;  %v3658_v49 = vld [vmem:[#allocation10 + $0x60] sm:$0xff]  ;;  %v3895_v3 = vld [vmem:[#allocation8] ss:$0 sm:$0xff] }
 0x40d   : > { %4020 = vmatprep.subr.mxu1 %v3351_v50  ;;  %3986 = vmatpush3.msra.mxu0 %v3303_v51  ;;  %v3657_v50 = vld [vmem:[#allocation10 + $0x58] sm:$0xff]  ;;  %v3656_v51 = vld [vmem:[#allocation10 + $0x50] sm:$0xff] }
 0x40e   : > { %4021 = vmatpush3.msra.mxu1 %v3335_v52  ;;  %3987 = vmatprep.subr.mxu0 %v3318_v53  ;;  %v3655_v52 = vld [vmem:[#allocation10 + $0x48] sm:$0xff]  ;;  %v3654_v53 = vld [vmem:[#allocation10 + $0x40] sm:$0xff] }
 0x40f   : > { %4022 = vmatprep.subr.mxu1 %v3350_v54  ;;  %3988 = vmatpush3.msra.mxu0 %v3302_v55  ;;  %v3653_v54 = vld [vmem:[#allocation10 + $0x38] sm:$0xff]  ;;  %v3652_v55 = vld [vmem:[#allocation10 + $0x30] sm:$0xff] }
 0x410   : > { %4023 = vmatpush3.msra.mxu1 %v3334_v57  ;;  %3989 = vmatprep.subr.mxu0 %v3317_v58  ;;  %v3651_v57 = vld [vmem:[#allocation10 + $0x28] sm:$0xff]  ;;  %v3650_v58 = vld [vmem:[#allocation10 + $0x20] sm:$0xff] }
 0x411   : > { %4024 = vmatprep.subr.mxu1 %v3349_v59  ;;  %3990 = vmatpush3.msra.mxu0 %v3301_v60  ;;  %v3649_v59 = vld [vmem:[#allocation10 + $0x18] sm:$0xff]  ;;  %v3648_v60 = vld [vmem:[#allocation10 + $0x10] sm:$0xff] }
 0x412   : > { %4025 = vmatpush3.msra.mxu1 %v3333_v61  ;;  %3991 = vmatprep.subr.mxu0 %v3316_v62  ;;  %v3647_v61 = vld [vmem:[#allocation10 + $0x8] sm:$0xff]  ;;  %v3646_v62 = vld [vmem:[#allocation10] sm:$0xff] }
 0x413   : > { %4026 = vmatprep.subr.mxu1 %v3348_v63  ;;  %3992 = vmatpush3.msra.mxu0 %v3300_v1 }
 0x414   : > { %4027 = vmatpush3.msra.mxu1 %v3332_v2  ;;  %3993 = vmatprep.subr.mxu0 %v3315_v4 }
 0x415   : > { %4028 = vmatprep.subr.mxu1 %v3347_v5  ;;  %3994 = vmatpush3.msra.mxu0 %v3299_v8 }
 0x416   : > { %4029 = vmatpush3.msra.mxu1 %v3331_v9  ;;  %3995 = vmatprep.subr.mxu0 %v3314_v10 }
 0x417   : > { %4030 = vmatprep.subr.mxu1 %v3346_v11  ;;  %3996 = vmatpush3.msra.mxu0 %v3298_v12 }
 0x418   : > { %4031 = vmatpush3.msra.mxu1 %v3330_v14  ;;  %3997 = vmatprep.subr.mxu0 %v3313_v15 }
 0x419   : > { %4032 = vmatprep.subr.mxu1 %v3345_v36  ;;  %3998 = vmatpush3.msra.mxu0 %v3297_v18 }
 0x41a   : > { %4033 = vmatpush3.msra.mxu1 %v3329_v22  ;;  %3999 = vmatprep.subr.mxu0 %v3312_v25 }
 0x41b   : > { %4034 = vmatprep.subr.mxu1 %v3344_v26  ;;  %4000 = vmatpush3.msra.mxu0 %v3296_v28 }
 0x41c   : > { %4035 = vmatpush3.msra.mxu1 %v3328_v29  ;;  %4001 = vmatprep.subr.mxu0 %v3311_v31 }
 0x41d   : > { %4036 = vmatprep.subr.mxu1 %v3343_v32  ;;  %4002 = vmatpush3.msra.mxu0 %v3295_v34 }
 0x41e   : > { %4037 = vmatpush3.msra.mxu1 %v3327_v35  ;;  %4003 = vmatprep.subr.mxu0 %v3310_v37 }
 0x41f   : > { %4038 = vmatprep.subr.mxu1 %v3342_v38  ;;  %4004 = vmatpush3.msra.mxu0 %v3294_v40 }
 0x420   : > { %3569 = vmatprep.mubr.f32.mxu0 %v3227_v39  ;;  %4039 = vmatpush3.msra.mxu1 %v3326_v42 }
 0x421   : > { %3639 = vmatprep.mubr.f32.mxu1 %v3229_v41  ;;  %3570 = vmatmul.mubr.f32.vlgmr.msra.gmra.mxu0 %v3226_v43 }
 0x422   : > { %3640 = vmatmul.mubr.f32.vlgmr.msra.gmra.mxu1 %v3228_v44  ;;  %4060 = vmatprep.subr.mxu0 %v4473_v46 }
 0x423   : > { %4061 = vmatpush3.msra.mxu0 %v3661_v45  ;;  %4092 = vmatprep.mubr.msk.f32.mxu0 %vm4474_vm0, %v4473_v46 }
 0x424   : > { %4062 = vmatprep.subr.mxu0 %v4473_v46 }
 0x425   : > { %4063 = vmatpush3.msra.mxu0 %v3660_v47 }
 0x426   : > { %4064 = vmatprep.subr.mxu0 %v4473_v46 }
 0x427   : > { %4065 = vmatpush3.msra.mxu0 %v3659_v48 }
 0x428   : > { %4066 = vmatprep.subr.mxu0 %v4473_v46 }
 0x429   : > { %4067 = vmatpush3.msra.mxu0 %v3658_v49 }
 0x42a   : > { %4068 = vmatprep.subr.mxu0 %v4473_v46 }
 0x42b   : > { %4069 = vmatpush3.msra.mxu0 %v3657_v50 }
 0x42c   : > { %4070 = vmatprep.subr.mxu0 %v4473_v46 }
 0x42d   : > { %4071 = vmatpush3.msra.mxu0 %v3656_v51 }
 0x42e   : > { %4072 = vmatprep.subr.mxu0 %v4473_v46 }
 0x42f   : > { %4073 = vmatpush3.msra.mxu0 %v3655_v52 }
 0x430   : > { %4074 = vmatprep.subr.mxu0 %v4473_v46 }
 0x431   : > { %4075 = vmatpush3.msra.mxu0 %v3654_v53 }
 0x432   : > { %4076 = vmatprep.subr.mxu0 %v4473_v46 }
 0x433   : > { %4077 = vmatpush3.msra.mxu0 %v3653_v54 }
 0x434   : > { %4078 = vmatprep.subr.mxu0 %v4473_v46 }
 0x435   : > { %4079 = vmatpush3.msra.mxu0 %v3652_v55 }
 0x436   : > { %4080 = vmatprep.subr.mxu0 %v4473_v46 }
 0x437   : > { %4081 = vmatpush3.msra.mxu0 %v3651_v57 }
 0x438   : > { %4082 = vmatprep.subr.mxu0 %v4473_v46 }
 0x439   : > { %4083 = vmatpush3.msra.mxu0 %v3650_v58 }
 0x43a   : > { %4084 = vmatprep.subr.mxu0 %v4473_v46 }
 0x43b   : > { %4085 = vmatpush3.msra.mxu0 %v3649_v59 }
 0x43c   : > { %4086 = vmatprep.subr.mxu0 %v4473_v46 }
 0x43d   : > { %4087 = vmatpush3.msra.mxu0 %v3648_v60 }
 0x43e   : > { %4088 = vmatprep.subr.mxu0 %v4473_v46 }
 0x43f   : > { %4089 = vmatpush3.msra.mxu0 %v3647_v61 }
 0x440   : > { %4090 = vmatprep.subr.mxu0 %v4473_v46 }
 0x441   : > { %4091 = vmatpush3.msra.mxu0 %v3646_v62 }
 0x4bf   : > { %v3935_v63 = vpop.f32.mrf.mxu0 }
 0x4c1   : > { %v3970_v0 = vpop.f32.mrf.mxu1  ;;  %v3936_v1 = vpop.f32.mrf.mxu0 }
 0x4c2   : > { %v3937_v2 = vadd.f32 %v3936_v1, %v3935_v63 }
 0x4c3   : > { %v3971_v4 = vpop.f32.mrf.mxu1 }
 0x4c4   : > { %v3432_v5 = vadd.f32 %v3937_v2, %v3895_v3  ;;  %v3972_v6 = vadd.f32 %v3971_v4, %v3970_v0 }
 0x4c6   : > { %v3502_v11 = vadd.f32 %v3972_v6, %v3432_v5 }
 0x4e1   : > { %v4005_v7 = vpop.f32.mrf.mxu0 }
 0x4e2   : > { %v4040_v8 = vpop.f32.mrf.mxu1 }
 0x4e3   : > { %v4006_v9 = vpop.f32.mrf.mxu0 }
 0x4e4   : > { %v4041_v10 = vpop.f32.mrf.mxu1  ;;  %v4007_v12 = vadd.f32 %v4006_v9, %v4005_v7 }
 0x4e5   : > { %v4042_v14 = vadd.f32 %v4041_v10, %v4040_v8 }
 0x4e6   : > { %v3572_v13 = vadd.f32 %v4007_v12, %v3502_v11 }
 0x4e8   : > { %v3642_v15 = vadd.f32 %v4042_v14, %v3572_v13 }
 0x4ea   : > { %v3645_v16 = vmax.f32 %v3642_v15, 0.0 }
 0x4ec   : > { %4093 = vmatmul.mubr.f32.vlgmr.msra.gmra.mxu0 %v3645_v16 }
 0x5ac   : > { %v3735_v36 = vpop.f32.mrf.mxu0 }
 0x5ad   : > { %v3736_v18 = vadd.f32 %v3896_v17, %v3735_v36 }
 0x5ae   : > { %v4094_v19 = vpop.f32.mrf.mxu0 }
 0x5af   : > { %3739 = vst [vmem:[%s6043_s7] sm:$0xff] %v3736_v18 }
 0x5b0 PF: > { %s23_s29 = sadd.s32 1, %s4460_s29   ;;  %s6056_s24 = smov %s4444_s25 }
 0x5b1   : > { %p20_p5 = scmp.ge.s32.totalorder %s23_s29, 9   ;;  %s6057_s25 = smov %s4448_s26 }
 0x5b2   : > { %s6058_s26 = smov %s4633_s20  ;;  %s6059_s27 = smov %s4456_s28 }
 0x5b3   : > { %s6060_s28 = smov %s6062_s17  ;;  %22 = sbr.rel (!%p20_p5) target bundleno = 7 (0x7), region = 119 }
 0x5b8   :  { %3759 = vsyncpa [#allocation4], 1 }
 0x5b9   :  { %3761 = vsyncpa [#allocation4 + $0x1], 1 }
 0x5ba   :  { %3762 = vsyncpa [#allocation6], 1 }
 0x5bb   :  { %3763 = vsyncpa [#allocation9], 1 }
 0x5bc   :  { %3764 = vsyncpa [#allocation12], 1 }

</bundles_post_ra>
